<compile_context>
chip_gen: v7x
topology: tpu7x:2x2x1
jax: 0.10.0
libtpu: 0.0.40
codegen_flags: <defaults>
</compile_context>

<pallas_src>
import numpy as np
import jax
import jax.numpy as jnp
from jax.experimental import pallas as pl
from jax.experimental.pallas import tpu as pltpu


PACK = 8          # rows per MXU group / per dense (8, S) store (one sublane granule)
_MAX_ROW_BLK = 512


def crop_resize_kernel(off_ref, step_ref, lo_ref, hi_ref, x_ref, o_ref):
    """Scalar-prefetch refs (SMEM, shape (B,)): off/step/lo/hi per-row f32 params.
    x_ref / o_ref: (ROW_BLK, S) VMEM tiles.

    For row i, output sample j is linear interpolation of x[i] at fractional
    source position pos = clip(off_i + step_i * j, lo_i, hi_i)  (crop + resize,
    flip folded into the sign of step_i).
    """
    R, S = x_ref.shape
    n_rows = off_ref.shape[0]                     # true batch size B
    row0 = pl.program_id(0) * R                   # global row offset of this block

    # Hoisted constants (built once per grid step, reused across groups).
    j = jax.lax.broadcasted_iota(jnp.int32, (1, S), 1).astype(jnp.float32)
    k = jax.lax.broadcasted_iota(jnp.int32, (S, S), 0).astype(jnp.float32)
    ridx = jax.lax.broadcasted_iota(jnp.int32, (PACK, S), 0)

    def group(g, carry):
        base = pl.multiple_of(g * PACK, PACK)
        xg = x_ref[pl.ds(base, PACK), :]          # (PACK, S) — one aligned load/group
        acc = jnp.zeros((PACK, S), jnp.float32)
        for r in range(PACK):                     # static: fully unrolled in-group
            # Clamp the global row index so tail-block SMEM reads stay in bounds
            # (tail rows' outputs are dropped by the partial-block writeback).
            row = jnp.minimum(row0 + base + r, n_rows - 1)
            off = off_ref[row]
            st = step_ref[row]
            lo = lo_ref[row]
            hi = hi_ref[row]
            # Fractional source position of every output sample of this row.
            pos = jnp.clip(off + st * j, lo, hi)                  # (1, S)
            # Tent (linear-interpolation) weights  w[k, j] = max(0, 1 - |k - pos_j|).
            w = jnp.maximum(0.0, 1.0 - jnp.abs(k - pos))          # (S, S)
            # Full-group matmul: same MXU push/pop cost as a (1,S) matvec
            # (8-sublane granules), but the result lands already packed.
            # Default Mosaic f32 matmul path is accurate (verified vs f64 ref).
            y = jnp.dot(xg, w, preferred_element_type=jnp.float32)  # (PACK, S)
            acc = jnp.where(ridx == r, y, acc)    # keep only row r of this result
        # One dense, sublane-aligned (PACK, S) store per group (no vst.msk).
        o_ref[pl.ds(base, PACK), :] = acc.astype(o_ref.dtype)
        return carry

    # unroll=2: lets the scheduler overlap group i+1's VALU tent-build with
    # group i's MXU pushes and store.
    jax.lax.fori_loop(0, R // PACK, group, 0, unroll=2)


def _num_tensorcores_per_chip():
    # v5e/v6e: 1 TensorCore per chip; v7x: 2. Falls back to 1 (safe: just means
    # one bigger block, which is the right call on single-TC parts anyway).
    try:
        kind = jax.devices()[0].device_kind.lower()
        return 2 if "v7" in kind else 1
    except Exception:  # pragma: no cover
        return 1


def _choose_row_blk(B):
    n_tc = _num_tensorcores_per_chip()
    # Single-TC (v5e/v6e): one big block (grid=1 is fine, per-step overhead gone).
    # Multi-TC (v7x): target >=4 grid steps so each core gets >=2 (pipelining +
    # load balance), with dimension_semantics=("parallel",).
    target_steps = 2 * n_tc if n_tc > 1 else 1
    blk = -(-B // target_steps)                   # cdiv
    blk = min(blk, _MAX_ROW_BLK)                  # VMEM is not the constraint at S=128
    blk = -(-blk // PACK) * PACK                  # multiple of 8 (sublane / PACK aligned)
    return max(blk, PACK)


def crop_resize_pallas(x, off, step, lo, hi):
    B, S = x.shape
    row_blk = _choose_row_blk(B)
    # No padding / output slice: partial last block reads are padded, writes
    # beyond B are dropped; rows are independent so this is safe.
    grid = (pl.cdiv(B, row_blk),)

    grid_spec = pltpu.PrefetchScalarGridSpec(
        num_scalar_prefetch=4,                    # off, step, lo, hi -> SMEM
        grid=grid,
        in_specs=[pl.BlockSpec((row_blk, S), lambda b, *_: (b, 0))],   # x
        out_specs=pl.BlockSpec((row_blk, S), lambda b, *_: (b, 0)),
    )
    return pl.pallas_call(
        crop_resize_kernel,
        out_shape=jax.ShapeDtypeStruct((B, S), x.dtype),
        grid_spec=grid_spec,
        compiler_params=pltpu.CompilerParams(dimension_semantics=("parallel",)),
    )(off, step, lo, hi, x)


def augmentator_forward(x, key, crop_ratio_range=(0.6, 0.9)):
    """JAX glue: sample per-row crop params and reduce them to 4 per-row f32
    scalars consumed in-kernel (no (B,S) pos array materialized in HBM)."""
    B, S = x.shape
    k1, k2, k3 = jax.random.split(key, 3)
    ratios = jax.random.uniform(
        k1, (B,), minval=crop_ratio_range[0], maxval=crop_ratio_range[1],
        dtype=jnp.float32)
    clen = (S * ratios).astype(jnp.int32)                       # (S * ratio).long()
    start = jax.random.randint(k2, (B,), 0, S - clen, dtype=jnp.int32)
    flip = jax.random.uniform(k3, (B,)) < 0.5

    # pos[i, j] = clip(off_i + step_i * j, lo_i, hi_i)
    #   non-flip: off = start,            step = +scale
    #   flip:     off = start + clen - 1, step = -scale      (flip == reversed sampling)
    # with scale = (clen-1)/(S-1); clamps guard f32 roundoff only.
    scale = (clen - 1).astype(jnp.float32) / jnp.float32(S - 1)
    lo = start.astype(jnp.float32)
    hi = lo + (clen - 1).astype(jnp.float32)
    off = jnp.where(flip, hi, lo)
    step = jnp.where(flip, -scale, scale)

    out = crop_resize_pallas(x, off, step, lo, hi)
    return out, (start, clen, flip.astype(jnp.int32))


def numpy_reference(x, start, clen, flip):
    """Mirror of random_crop_1d given fixed crop params (np.interp + flip)."""
    x = np.asarray(x)
    B, S = x.shape
    out = np.zeros_like(x)
    for i in range(B):
        s, c, f = int(start[i]), int(clen[i]), int(flip[i])
        cropped = x[i, s:s + c]
        x_idx = np.linspace(0, c - 1, c)
        new_idx = np.linspace(0, c - 1, S)
        row = np.interp(new_idx, x_idx, cropped)
        if f:
            row = row[::-1]
        out[i] = row
    return out


if __name__ == "__main__":
    # NOTE: Augmentator has no learnable parameters, so nothing to initialize.
    key = jax.random.PRNGKey(0)
    kx, kaug = jax.random.split(key)
    B, S = 16, 128
    x = jax.random.normal(kx, (B, S), dtype=jnp.float32)

    out, (start, clen, flip) = augmentator_forward(x, kaug)
    out = jax.block_until_ready(out)

    ref = numpy_reference(x, np.asarray(start), np.asarray(clen), np.asarray(flip))
    # TODO(synk): PyTorch/NumPy host RNG stream cannot be reproduced bit-exactly;
    # randomness comes from jax.random with PRNGKey(0) instead.
    np.testing.assert_allclose(np.asarray(out), ref, rtol=1e-4, atol=1e-4)
    print("KERNEL_OK")
</pallas_src>

<mosaic_0001>
module attributes {stable_mosaic.version = 11 : i64} {
  func.func @crop_resize_kernel(%arg0: i32, %arg1: memref<16xf32, #tpu.memory_space<smem>>, %arg2: memref<16xf32, #tpu.memory_space<smem>>, %arg3: memref<16xf32, #tpu.memory_space<smem>>, %arg4: memref<16xf32, #tpu.memory_space<smem>>, %arg5: memref<16x128xf32, #tpu.memory_space<vmem>>, %arg6: memref<16x128xf32, #tpu.memory_space<vmem>>) attributes {dimension_semantics = [#tpu.dimension_semantics<parallel>], iteration_bounds = array<i64: 1>, scalar_prefetch = 4 : i64, scratch_operands = 0 : i64, tpu.core_type = #tpu.core_type<tc>, window_params = [{transform_indices = @transform_0, window_bounds = array<i64: 16, 128>}, {transform_indices = @transform_1, window_bounds = array<i64: 16, 128>}]} {
    %c16_i32 = arith.constant 16 : i32
    %0 = arith.muli %arg0, %c16_i32 : i32
    %1 = tpu.iota {dimensions = array<i32: 1>} : vector<1x128xi32>
    %2 = arith.sitofp %1 : vector<1x128xi32> to vector<1x128xf32>
    %3 = tpu.iota {dimensions = array<i32: 0>} : vector<128x128xi32>
    %4 = arith.sitofp %3 : vector<128x128xi32> to vector<128x128xf32>
    %5 = tpu.iota {dimensions = array<i32: 0>} : vector<8x128xi32>
    %c0_i32 = arith.constant 0 : i32
    %c8_i32 = arith.constant 8 : i32
    %6 = arith.muli %c0_i32, %c8_i32 : i32
    %7 = tpu.assume_multiple %6, 8 : i32
    %8 = arith.index_cast %7 : i32 to index
    %c0 = arith.constant 0 : index
    %9 = vector.load %arg5[%8, %c0] : memref<16x128xf32, #tpu.memory_space<vmem>>, vector<8x128xf32>
    %cst = arith.constant 0.000000e+00 : f32
    %10 = vector.broadcast %cst : f32 to vector<8x128xf32>
    %11 = arith.addi %0, %7 : i32
    %c0_i32_0 = arith.constant 0 : i32
    %12 = arith.addi %11, %c0_i32_0 : i32
    %c15_i32 = arith.constant 15 : i32
    %13 = arith.minsi %12, %c15_i32 : i32
    %14 = arith.index_cast %13 : i32 to index
    %15 = memref.load %arg1[%14] : memref<16xf32, #tpu.memory_space<smem>>
    %16 = arith.index_cast %13 : i32 to index
    %17 = memref.load %arg2[%16] : memref<16xf32, #tpu.memory_space<smem>>
    %18 = arith.index_cast %13 : i32 to index
    %19 = memref.load %arg3[%18] : memref<16xf32, #tpu.memory_space<smem>>
    %20 = arith.index_cast %13 : i32 to index
    %21 = memref.load %arg4[%20] : memref<16xf32, #tpu.memory_space<smem>>
    %22 = vector.broadcast %17 : f32 to vector<1x128xf32>
    %23 = arith.mulf %22, %2 : vector<1x128xf32>
    %24 = vector.broadcast %15 : f32 to vector<1x128xf32>
    %25 = arith.addf %24, %23 : vector<1x128xf32>
    %26 = vector.broadcast %19 : f32 to vector<1x128xf32>
    %27 = arith.maximumf %26, %25 : vector<1x128xf32>
    %28 = vector.broadcast %21 : f32 to vector<1x128xf32>
    %29 = arith.minimumf %28, %27 : vector<1x128xf32>
    %30 = vector.broadcast %29 : vector<1x128xf32> to vector<128x128xf32>
    %31 = arith.subf %4, %30 : vector<128x128xf32>
    %32 = math.absf %31 : vector<128x128xf32>
    %cst_1 = arith.constant 1.000000e+00 : f32
    %33 = vector.broadcast %cst_1 : f32 to vector<128x128xf32>
    %34 = arith.subf %33, %32 : vector<128x128xf32>
    %cst_2 = arith.constant 0.000000e+00 : f32
    %35 = vector.broadcast %cst_2 : f32 to vector<128x128xf32>
    %36 = arith.maximumf %35, %34 : vector<128x128xf32>
    %cst_3 = arith.constant dense<0.000000e+00> : vector<8x128xf32>
    %37 = tpu.matmul %9, %36, %cst_3 {dimension_numbers = #tpu.dot_dimension_numbers<[1], [0], [0], [1], [0, 0, 1, 1], [], []>} : vector<8x128xf32>, vector<128x128xf32>, vector<8x128xf32> -> vector<8x128xf32>
    %c0_i32_4 = arith.constant 0 : i32
    %38 = vector.broadcast %c0_i32_4 : i32 to vector<8x128xi32>
    %39 = arith.cmpi eq, %5, %38 : vector<8x128xi32>
    %40 = arith.select %39, %37, %10 : vector<8x128xi1>, vector<8x128xf32>
    %41 = arith.addi %0, %7 : i32
    %c1_i32 = arith.constant 1 : i32
    %42 = arith.addi %41, %c1_i32 : i32
    %c15_i32_5 = arith.constant 15 : i32
    %43 = arith.minsi %42, %c15_i32_5 : i32
    %44 = arith.index_cast %43 : i32 to index
    %45 = memref.load %arg1[%44] : memref<16xf32, #tpu.memory_space<smem>>
    %46 = arith.index_cast %43 : i32 to index
    %47 = memref.load %arg2[%46] : memref<16xf32, #tpu.memory_space<smem>>
    %48 = arith.index_cast %43 : i32 to index
    %49 = memref.load %arg3[%48] : memref<16xf32, #tpu.memory_space<smem>>
    %50 = arith.index_cast %43 : i32 to index
    %51 = memref.load %arg4[%50] : memref<16xf32, #tpu.memory_space<smem>>
    %52 = vector.broadcast %47 : f32 to vector<1x128xf32>
    %53 = arith.mulf %52, %2 : vector<1x128xf32>
    %54 = vector.broadcast %45 : f32 to vector<1x128xf32>
    %55 = arith.addf %54, %53 : vector<1x128xf32>
    %56 = vector.broadcast %49 : f32 to vector<1x128xf32>
    %57 = arith.maximumf %56, %55 : vector<1x128xf32>
    %58 = vector.broadcast %51 : f32 to vector<1x128xf32>
    %59 = arith.minimumf %58, %57 : vector<1x128xf32>
    %60 = vector.broadcast %59 : vector<1x128xf32> to vector<128x128xf32>
    %61 = arith.subf %4, %60 : vector<128x128xf32>
    %62 = math.absf %61 : vector<128x128xf32>
    %cst_6 = arith.constant 1.000000e+00 : f32
    %63 = vector.broadcast %cst_6 : f32 to vector<128x128xf32>
    %64 = arith.subf %63, %62 : vector<128x128xf32>
    %cst_7 = arith.constant 0.000000e+00 : f32
    %65 = vector.broadcast %cst_7 : f32 to vector<128x128xf32>
    %66 = arith.maximumf %65, %64 : vector<128x128xf32>
    %cst_8 = arith.constant dense<0.000000e+00> : vector<8x128xf32>
    %67 = tpu.matmul %9, %66, %cst_8 {dimension_numbers = #tpu.dot_dimension_numbers<[1], [0], [0], [1], [0, 0, 1, 1], [], []>} : vector<8x128xf32>, vector<128x128xf32>, vector<8x128xf32> -> vector<8x128xf32>
    %c1_i32_9 = arith.constant 1 : i32
    %68 = vector.broadcast %c1_i32_9 : i32 to vector<8x128xi32>
    %69 = arith.cmpi eq, %5, %68 : vector<8x128xi32>
    %70 = arith.select %69, %67, %40 : vector<8x128xi1>, vector<8x128xf32>
    %71 = arith.addi %0, %7 : i32
    %c2_i32 = arith.constant 2 : i32
    %72 = arith.addi %71, %c2_i32 : i32
    %c15_i32_10 = arith.constant 15 : i32
    %73 = arith.minsi %72, %c15_i32_10 : i32
    %74 = arith.index_cast %73 : i32 to index
    %75 = memref.load %arg1[%74] : memref<16xf32, #tpu.memory_space<smem>>
    %76 = arith.index_cast %73 : i32 to index
    %77 = memref.load %arg2[%76] : memref<16xf32, #tpu.memory_space<smem>>
    %78 = arith.index_cast %73 : i32 to index
    %79 = memref.load %arg3[%78] : memref<16xf32, #tpu.memory_space<smem>>
    %80 = arith.index_cast %73 : i32 to index
    %81 = memref.load %arg4[%80] : memref<16xf32, #tpu.memory_space<smem>>
    %82 = vector.broadcast %77 : f32 to vector<1x128xf32>
    %83 = arith.mulf %82, %2 : vector<1x128xf32>
    %84 = vector.broadcast %75 : f32 to vector<1x128xf32>
    %85 = arith.addf %84, %83 : vector<1x128xf32>
    %86 = vector.broadcast %79 : f32 to vector<1x128xf32>
    %87 = arith.maximumf %86, %85 : vector<1x128xf32>
    %88 = vector.broadcast %81 : f32 to vector<1x128xf32>
    %89 = arith.minimumf %88, %87 : vector<1x128xf32>
    %90 = vector.broadcast %89 : vector<1x128xf32> to vector<128x128xf32>
    %91 = arith.subf %4, %90 : vector<128x128xf32>
    %92 = math.absf %91 : vector<128x128xf32>
    %cst_11 = arith.constant 1.000000e+00 : f32
    %93 = vector.broadcast %cst_11 : f32 to vector<128x128xf32>
    %94 = arith.subf %93, %92 : vector<128x128xf32>
    %cst_12 = arith.constant 0.000000e+00 : f32
    %95 = vector.broadcast %cst_12 : f32 to vector<128x128xf32>
    %96 = arith.maximumf %95, %94 : vector<128x128xf32>
    %cst_13 = arith.constant dense<0.000000e+00> : vector<8x128xf32>
    %97 = tpu.matmul %9, %96, %cst_13 {dimension_numbers = #tpu.dot_dimension_numbers<[1], [0], [0], [1], [0, 0, 1, 1], [], []>} : vector<8x128xf32>, vector<128x128xf32>, vector<8x128xf32> -> vector<8x128xf32>
    %c2_i32_14 = arith.constant 2 : i32
    %98 = vector.broadcast %c2_i32_14 : i32 to vector<8x128xi32>
    %99 = arith.cmpi eq, %5, %98 : vector<8x128xi32>
    %100 = arith.select %99, %97, %70 : vector<8x128xi1>, vector<8x128xf32>
    %101 = arith.addi %0, %7 : i32
    %c3_i32 = arith.constant 3 : i32
    %102 = arith.addi %101, %c3_i32 : i32
    %c15_i32_15 = arith.constant 15 : i32
    %103 = arith.minsi %102, %c15_i32_15 : i32
    %104 = arith.index_cast %103 : i32 to index
    %105 = memref.load %arg1[%104] : memref<16xf32, #tpu.memory_space<smem>>
    %106 = arith.index_cast %103 : i32 to index
    %107 = memref.load %arg2[%106] : memref<16xf32, #tpu.memory_space<smem>>
    %108 = arith.index_cast %103 : i32 to index
    %109 = memref.load %arg3[%108] : memref<16xf32, #tpu.memory_space<smem>>
    %110 = arith.index_cast %103 : i32 to index
    %111 = memref.load %arg4[%110] : memref<16xf32, #tpu.memory_space<smem>>
    %112 = vector.broadcast %107 : f32 to vector<1x128xf32>
    %113 = arith.mulf %112, %2 : vector<1x128xf32>
    %114 = vector.broadcast %105 : f32 to vector<1x128xf32>
    %115 = arith.addf %114, %113 : vector<1x128xf32>
    %116 = vector.broadcast %109 : f32 to vector<1x128xf32>
    %117 = arith.maximumf %116, %115 : vector<1x128xf32>
    %118 = vector.broadcast %111 : f32 to vector<1x128xf32>
    %119 = arith.minimumf %118, %117 : vector<1x128xf32>
    %120 = vector.broadcast %119 : vector<1x128xf32> to vector<128x128xf32>
    %121 = arith.subf %4, %120 : vector<128x128xf32>
    %122 = math.absf %121 : vector<128x128xf32>
    %cst_16 = arith.constant 1.000000e+00 : f32
    %123 = vector.broadcast %cst_16 : f32 to vector<128x128xf32>
    %124 = arith.subf %123, %122 : vector<128x128xf32>
    %cst_17 = arith.constant 0.000000e+00 : f32
    %125 = vector.broadcast %cst_17 : f32 to vector<128x128xf32>
    %126 = arith.maximumf %125, %124 : vector<128x128xf32>
    %cst_18 = arith.constant dense<0.000000e+00> : vector<8x128xf32>
    %127 = tpu.matmul %9, %126, %cst_18 {dimension_numbers = #tpu.dot_dimension_numbers<[1], [0], [0], [1], [0, 0, 1, 1], [], []>} : vector<8x128xf32>, vector<128x128xf32>, vector<8x128xf32> -> vector<8x128xf32>
    %c3_i32_19 = arith.constant 3 : i32
    %128 = vector.broadcast %c3_i32_19 : i32 to vector<8x128xi32>
    %129 = arith.cmpi eq, %5, %128 : vector<8x128xi32>
    %130 = arith.select %129, %127, %100 : vector<8x128xi1>, vector<8x128xf32>
    %131 = arith.addi %0, %7 : i32
    %c4_i32 = arith.constant 4 : i32
    %132 = arith.addi %131, %c4_i32 : i32
    %c15_i32_20 = arith.constant 15 : i32
    %133 = arith.minsi %132, %c15_i32_20 : i32
    %134 = arith.index_cast %133 : i32 to index
    %135 = memref.load %arg1[%134] : memref<16xf32, #tpu.memory_space<smem>>
    %136 = arith.index_cast %133 : i32 to index
    %137 = memref.load %arg2[%136] : memref<16xf32, #tpu.memory_space<smem>>
    %138 = arith.index_cast %133 : i32 to index
    %139 = memref.load %arg3[%138] : memref<16xf32, #tpu.memory_space<smem>>
    %140 = arith.index_cast %133 : i32 to index
    %141 = memref.load %arg4[%140] : memref<16xf32, #tpu.memory_space<smem>>
    %142 = vector.broadcast %137 : f32 to vector<1x128xf32>
    %143 = arith.mulf %142, %2 : vector<1x128xf32>
    %144 = vector.broadcast %135 : f32 to vector<1x128xf32>
    %145 = arith.addf %144, %143 : vector<1x128xf32>
    %146 = vector.broadcast %139 : f32 to vector<1x128xf32>
    %147 = arith.maximumf %146, %145 : vector<1x128xf32>
    %148 = vector.broadcast %141 : f32 to vector<1x128xf32>
    %149 = arith.minimumf %148, %147 : vector<1x128xf32>
    %150 = vector.broadcast %149 : vector<1x128xf32> to vector<128x128xf32>
    %151 = arith.subf %4, %150 : vector<128x128xf32>
    %152 = math.absf %151 : vector<128x128xf32>
    %cst_21 = arith.constant 1.000000e+00 : f32
    %153 = vector.broadcast %cst_21 : f32 to vector<128x128xf32>
    %154 = arith.subf %153, %152 : vector<128x128xf32>
    %cst_22 = arith.constant 0.000000e+00 : f32
    %155 = vector.broadcast %cst_22 : f32 to vector<128x128xf32>
    %156 = arith.maximumf %155, %154 : vector<128x128xf32>
    %cst_23 = arith.constant dense<0.000000e+00> : vector<8x128xf32>
    %157 = tpu.matmul %9, %156, %cst_23 {dimension_numbers = #tpu.dot_dimension_numbers<[1], [0], [0], [1], [0, 0, 1, 1], [], []>} : vector<8x128xf32>, vector<128x128xf32>, vector<8x128xf32> -> vector<8x128xf32>
    %c4_i32_24 = arith.constant 4 : i32
    %158 = vector.broadcast %c4_i32_24 : i32 to vector<8x128xi32>
    %159 = arith.cmpi eq, %5, %158 : vector<8x128xi32>
    %160 = arith.select %159, %157, %130 : vector<8x128xi1>, vector<8x128xf32>
    %161 = arith.addi %0, %7 : i32
    %c5_i32 = arith.constant 5 : i32
    %162 = arith.addi %161, %c5_i32 : i32
    %c15_i32_25 = arith.constant 15 : i32
    %163 = arith.minsi %162, %c15_i32_25 : i32
    %164 = arith.index_cast %163 : i32 to index
    %165 = memref.load %arg1[%164] : memref<16xf32, #tpu.memory_space<smem>>
    %166 = arith.index_cast %163 : i32 to index
    %167 = memref.load %arg2[%166] : memref<16xf32, #tpu.memory_space<smem>>
    %168 = arith.index_cast %163 : i32 to index
    %169 = memref.load %arg3[%168] : memref<16xf32, #tpu.memory_space<smem>>
    %170 = arith.index_cast %163 : i32 to index
    %171 = memref.load %arg4[%170] : memref<16xf32, #tpu.memory_space<smem>>
    %172 = vector.broadcast %167 : f32 to vector<1x128xf32>
    %173 = arith.mulf %172, %2 : vector<1x128xf32>
    %174 = vector.broadcast %165 : f32 to vector<1x128xf32>
    %175 = arith.addf %174, %173 : vector<1x128xf32>
    %176 = vector.broadcast %169 : f32 to vector<1x128xf32>
    %177 = arith.maximumf %176, %175 : vector<1x128xf32>
    %178 = vector.broadcast %171 : f32 to vector<1x128xf32>
    %179 = arith.minimumf %178, %177 : vector<1x128xf32>
    %180 = vector.broadcast %179 : vector<1x128xf32> to vector<128x128xf32>
    %181 = arith.subf %4, %180 : vector<128x128xf32>
    %182 = math.absf %181 : vector<128x128xf32>
    %cst_26 = arith.constant 1.000000e+00 : f32
    %183 = vector.broadcast %cst_26 : f32 to vector<128x128xf32>
    %184 = arith.subf %183, %182 : vector<128x128xf32>
    %cst_27 = arith.constant 0.000000e+00 : f32
    %185 = vector.broadcast %cst_27 : f32 to vector<128x128xf32>
    %186 = arith.maximumf %185, %184 : vector<128x128xf32>
    %cst_28 = arith.constant dense<0.000000e+00> : vector<8x128xf32>
    %187 = tpu.matmul %9, %186, %cst_28 {dimension_numbers = #tpu.dot_dimension_numbers<[1], [0], [0], [1], [0, 0, 1, 1], [], []>} : vector<8x128xf32>, vector<128x128xf32>, vector<8x128xf32> -> vector<8x128xf32>
    %c5_i32_29 = arith.constant 5 : i32
    %188 = vector.broadcast %c5_i32_29 : i32 to vector<8x128xi32>
    %189 = arith.cmpi eq, %5, %188 : vector<8x128xi32>
    %190 = arith.select %189, %187, %160 : vector<8x128xi1>, vector<8x128xf32>
    %191 = arith.addi %0, %7 : i32
    %c6_i32 = arith.constant 6 : i32
    %192 = arith.addi %191, %c6_i32 : i32
    %c15_i32_30 = arith.constant 15 : i32
    %193 = arith.minsi %192, %c15_i32_30 : i32
    %194 = arith.index_cast %193 : i32 to index
    %195 = memref.load %arg1[%194] : memref<16xf32, #tpu.memory_space<smem>>
    %196 = arith.index_cast %193 : i32 to index
    %197 = memref.load %arg2[%196] : memref<16xf32, #tpu.memory_space<smem>>
    %198 = arith.index_cast %193 : i32 to index
    %199 = memref.load %arg3[%198] : memref<16xf32, #tpu.memory_space<smem>>
    %200 = arith.index_cast %193 : i32 to index
    %201 = memref.load %arg4[%200] : memref<16xf32, #tpu.memory_space<smem>>
    %202 = vector.broadcast %197 : f32 to vector<1x128xf32>
    %203 = arith.mulf %202, %2 : vector<1x128xf32>
    %204 = vector.broadcast %195 : f32 to vector<1x128xf32>
    %205 = arith.addf %204, %203 : vector<1x128xf32>
    %206 = vector.broadcast %199 : f32 to vector<1x128xf32>
    %207 = arith.maximumf %206, %205 : vector<1x128xf32>
    %208 = vector.broadcast %201 : f32 to vector<1x128xf32>
    %209 = arith.minimumf %208, %207 : vector<1x128xf32>
    %210 = vector.broadcast %209 : vector<1x128xf32> to vector<128x128xf32>
    %211 = arith.subf %4, %210 : vector<128x128xf32>
    %212 = math.absf %211 : vector<128x128xf32>
    %cst_31 = arith.constant 1.000000e+00 : f32
    %213 = vector.broadcast %cst_31 : f32 to vector<128x128xf32>
    %214 = arith.subf %213, %212 : vector<128x128xf32>
    %cst_32 = arith.constant 0.000000e+00 : f32
    %215 = vector.broadcast %cst_32 : f32 to vector<128x128xf32>
    %216 = arith.maximumf %215, %214 : vector<128x128xf32>
    %cst_33 = arith.constant dense<0.000000e+00> : vector<8x128xf32>
    %217 = tpu.matmul %9, %216, %cst_33 {dimension_numbers = #tpu.dot_dimension_numbers<[1], [0], [0], [1], [0, 0, 1, 1], [], []>} : vector<8x128xf32>, vector<128x128xf32>, vector<8x128xf32> -> vector<8x128xf32>
    %c6_i32_34 = arith.constant 6 : i32
    %218 = vector.broadcast %c6_i32_34 : i32 to vector<8x128xi32>
    %219 = arith.cmpi eq, %5, %218 : vector<8x128xi32>
    %220 = arith.select %219, %217, %190 : vector<8x128xi1>, vector<8x128xf32>
    %221 = arith.addi %0, %7 : i32
    %c7_i32 = arith.constant 7 : i32
    %222 = arith.addi %221, %c7_i32 : i32
    %c15_i32_35 = arith.constant 15 : i32
    %223 = arith.minsi %222, %c15_i32_35 : i32
    %224 = arith.index_cast %223 : i32 to index
    %225 = memref.load %arg1[%224] : memref<16xf32, #tpu.memory_space<smem>>
    %226 = arith.index_cast %223 : i32 to index
    %227 = memref.load %arg2[%226] : memref<16xf32, #tpu.memory_space<smem>>
    %228 = arith.index_cast %223 : i32 to index
    %229 = memref.load %arg3[%228] : memref<16xf32, #tpu.memory_space<smem>>
    %230 = arith.index_cast %223 : i32 to index
    %231 = memref.load %arg4[%230] : memref<16xf32, #tpu.memory_space<smem>>
    %232 = vector.broadcast %227 : f32 to vector<1x128xf32>
    %233 = arith.mulf %232, %2 : vector<1x128xf32>
    %234 = vector.broadcast %225 : f32 to vector<1x128xf32>
    %235 = arith.addf %234, %233 : vector<1x128xf32>
    %236 = vector.broadcast %229 : f32 to vector<1x128xf32>
    %237 = arith.maximumf %236, %235 : vector<1x128xf32>
    %238 = vector.broadcast %231 : f32 to vector<1x128xf32>
    %239 = arith.minimumf %238, %237 : vector<1x128xf32>
    %240 = vector.broadcast %239 : vector<1x128xf32> to vector<128x128xf32>
    %241 = arith.subf %4, %240 : vector<128x128xf32>
    %242 = math.absf %241 : vector<128x128xf32>
    %cst_36 = arith.constant 1.000000e+00 : f32
    %243 = vector.broadcast %cst_36 : f32 to vector<128x128xf32>
    %244 = arith.subf %243, %242 : vector<128x128xf32>
    %cst_37 = arith.constant 0.000000e+00 : f32
    %245 = vector.broadcast %cst_37 : f32 to vector<128x128xf32>
    %246 = arith.maximumf %245, %244 : vector<128x128xf32>
    %cst_38 = arith.constant dense<0.000000e+00> : vector<8x128xf32>
    %247 = tpu.matmul %9, %246, %cst_38 {dimension_numbers = #tpu.dot_dimension_numbers<[1], [0], [0], [1], [0, 0, 1, 1], [], []>} : vector<8x128xf32>, vector<128x128xf32>, vector<8x128xf32> -> vector<8x128xf32>
    %c7_i32_39 = arith.constant 7 : i32
    %248 = vector.broadcast %c7_i32_39 : i32 to vector<8x128xi32>
    %249 = arith.cmpi eq, %5, %248 : vector<8x128xi32>
    %250 = arith.select %249, %247, %220 : vector<8x128xi1>, vector<8x128xf32>
    %251 = arith.index_cast %7 : i32 to index
    %c0_40 = arith.constant 0 : index
    %252 = vector.load %arg6[%251, %c0_40] : memref<16x128xf32, #tpu.memory_space<vmem>>, vector<8x128xf32>
    tpu.vector_store %arg6[%251, %c0_40], %250 {strides = array<i32>} : memref<16x128xf32, #tpu.memory_space<vmem>>, vector<8x128xf32>,
    %c1_i32_41 = arith.constant 1 : i32
    %c8_i32_42 = arith.constant 8 : i32
    %253 = arith.muli %c1_i32_41, %c8_i32_42 : i32
    %254 = tpu.assume_multiple %253, 8 : i32
    %255 = arith.index_cast %254 : i32 to index
    %c0_43 = arith.constant 0 : index
    %256 = vector.load %arg5[%255, %c0_43] : memref<16x128xf32, #tpu.memory_space<vmem>>, vector<8x128xf32>
    %cst_44 = arith.constant 0.000000e+00 : f32
    %257 = vector.broadcast %cst_44 : f32 to vector<8x128xf32>
    %258 = arith.addi %0, %254 : i32
    %c0_i32_45 = arith.constant 0 : i32
    %259 = arith.addi %258, %c0_i32_45 : i32
    %c15_i32_46 = arith.constant 15 : i32
    %260 = arith.minsi %259, %c15_i32_46 : i32
    %261 = arith.index_cast %260 : i32 to index
    %262 = memref.load %arg1[%261] : memref<16xf32, #tpu.memory_space<smem>>
    %263 = arith.index_cast %260 : i32 to index
    %264 = memref.load %arg2[%263] : memref<16xf32, #tpu.memory_space<smem>>
    %265 = arith.index_cast %260 : i32 to index
    %266 = memref.load %arg3[%265] : memref<16xf32, #tpu.memory_space<smem>>
    %267 = arith.index_cast %260 : i32 to index
    %268 = memref.load %arg4[%267] : memref<16xf32, #tpu.memory_space<smem>>
    %269 = vector.broadcast %264 : f32 to vector<1x128xf32>
    %270 = arith.mulf %269, %2 : vector<1x128xf32>
    %271 = vector.broadcast %262 : f32 to vector<1x128xf32>
    %272 = arith.addf %271, %270 : vector<1x128xf32>
    %273 = vector.broadcast %266 : f32 to vector<1x128xf32>
    %274 = arith.maximumf %273, %272 : vector<1x128xf32>
    %275 = vector.broadcast %268 : f32 to vector<1x128xf32>
    %276 = arith.minimumf %275, %274 : vector<1x128xf32>
    %277 = vector.broadcast %276 : vector<1x128xf32> to vector<128x128xf32>
    %278 = arith.subf %4, %277 : vector<128x128xf32>
    %279 = math.absf %278 : vector<128x128xf32>
    %cst_47 = arith.constant 1.000000e+00 : f32
    %280 = vector.broadcast %cst_47 : f32 to vector<128x128xf32>
    %281 = arith.subf %280, %279 : vector<128x128xf32>
    %cst_48 = arith.constant 0.000000e+00 : f32
    %282 = vector.broadcast %cst_48 : f32 to vector<128x128xf32>
    %283 = arith.maximumf %282, %281 : vector<128x128xf32>
    %cst_49 = arith.constant dense<0.000000e+00> : vector<8x128xf32>
    %284 = tpu.matmul %256, %283, %cst_49 {dimension_numbers = #tpu.dot_dimension_numbers<[1], [0], [0], [1], [0, 0, 1, 1], [], []>} : vector<8x128xf32>, vector<128x128xf32>, vector<8x128xf32> -> vector<8x128xf32>
    %c0_i32_50 = arith.constant 0 : i32
    %285 = vector.broadcast %c0_i32_50 : i32 to vector<8x128xi32>
    %286 = arith.cmpi eq, %5, %285 : vector<8x128xi32>
    %287 = arith.select %286, %284, %257 : vector<8x128xi1>, vector<8x128xf32>
    %288 = arith.addi %0, %254 : i32
    %c1_i32_51 = arith.constant 1 : i32
    %289 = arith.addi %288, %c1_i32_51 : i32
    %c15_i32_52 = arith.constant 15 : i32
    %290 = arith.minsi %289, %c15_i32_52 : i32
    %291 = arith.index_cast %290 : i32 to index
    %292 = memref.load %arg1[%291] : memref<16xf32, #tpu.memory_space<smem>>
    %293 = arith.index_cast %290 : i32 to index
    %294 = memref.load %arg2[%293] : memref<16xf32, #tpu.memory_space<smem>>
    %295 = arith.index_cast %290 : i32 to index
    %296 = memref.load %arg3[%295] : memref<16xf32, #tpu.memory_space<smem>>
    %297 = arith.index_cast %290 : i32 to index
    %298 = memref.load %arg4[%297] : memref<16xf32, #tpu.memory_space<smem>>
    %299 = vector.broadcast %294 : f32 to vector<1x128xf32>
    %300 = arith.mulf %299, %2 : vector<1x128xf32>
    %301 = vector.broadcast %292 : f32 to vector<1x128xf32>
    %302 = arith.addf %301, %300 : vector<1x128xf32>
    %303 = vector.broadcast %296 : f32 to vector<1x128xf32>
    %304 = arith.maximumf %303, %302 : vector<1x128xf32>
    %305 = vector.broadcast %298 : f32 to vector<1x128xf32>
    %306 = arith.minimumf %305, %304 : vector<1x128xf32>
    %307 = vector.broadcast %306 : vector<1x128xf32> to vector<128x128xf32>
    %308 = arith.subf %4, %307 : vector<128x128xf32>
    %309 = math.absf %308 : vector<128x128xf32>
    %cst_53 = arith.constant 1.000000e+00 : f32
    %310 = vector.broadcast %cst_53 : f32 to vector<128x128xf32>
    %311 = arith.subf %310, %309 : vector<128x128xf32>
    %cst_54 = arith.constant 0.000000e+00 : f32
    %312 = vector.broadcast %cst_54 : f32 to vector<128x128xf32>
    %313 = arith.maximumf %312, %311 : vector<128x128xf32>
    %cst_55 = arith.constant dense<0.000000e+00> : vector<8x128xf32>
    %314 = tpu.matmul %256, %313, %cst_55 {dimension_numbers = #tpu.dot_dimension_numbers<[1], [0], [0], [1], [0, 0, 1, 1], [], []>} : vector<8x128xf32>, vector<128x128xf32>, vector<8x128xf32> -> vector<8x128xf32>
    %c1_i32_56 = arith.constant 1 : i32
    %315 = vector.broadcast %c1_i32_56 : i32 to vector<8x128xi32>
    %316 = arith.cmpi eq, %5, %315 : vector<8x128xi32>
    %317 = arith.select %316, %314, %287 : vector<8x128xi1>, vector<8x128xf32>
    %318 = arith.addi %0, %254 : i32
    %c2_i32_57 = arith.constant 2 : i32
    %319 = arith.addi %318, %c2_i32_57 : i32
    %c15_i32_58 = arith.constant 15 : i32
    %320 = arith.minsi %319, %c15_i32_58 : i32
    %321 = arith.index_cast %320 : i32 to index
    %322 = memref.load %arg1[%321] : memref<16xf32, #tpu.memory_space<smem>>
    %323 = arith.index_cast %320 : i32 to index
    %324 = memref.load %arg2[%323] : memref<16xf32, #tpu.memory_space<smem>>
    %325 = arith.index_cast %320 : i32 to index
    %326 = memref.load %arg3[%325] : memref<16xf32, #tpu.memory_space<smem>>
    %327 = arith.index_cast %320 : i32 to index
    %328 = memref.load %arg4[%327] : memref<16xf32, #tpu.memory_space<smem>>
    %329 = vector.broadcast %324 : f32 to vector<1x128xf32>
    %330 = arith.mulf %329, %2 : vector<1x128xf32>
    %331 = vector.broadcast %322 : f32 to vector<1x128xf32>
    %332 = arith.addf %331, %330 : vector<1x128xf32>
    %333 = vector.broadcast %326 : f32 to vector<1x128xf32>
    %334 = arith.maximumf %333, %332 : vector<1x128xf32>
    %335 = vector.broadcast %328 : f32 to vector<1x128xf32>
    %336 = arith.minimumf %335, %334 : vector<1x128xf32>
    %337 = vector.broadcast %336 : vector<1x128xf32> to vector<128x128xf32>
    %338 = arith.subf %4, %337 : vector<128x128xf32>
    %339 = math.absf %338 : vector<128x128xf32>
    %cst_59 = arith.constant 1.000000e+00 : f32
    %340 = vector.broadcast %cst_59 : f32 to vector<128x128xf32>
    %341 = arith.subf %340, %339 : vector<128x128xf32>
    %cst_60 = arith.constant 0.000000e+00 : f32
    %342 = vector.broadcast %cst_60 : f32 to vector<128x128xf32>
    %343 = arith.maximumf %342, %341 : vector<128x128xf32>
    %cst_61 = arith.constant dense<0.000000e+00> : vector<8x128xf32>
    %344 = tpu.matmul %256, %343, %cst_61 {dimension_numbers = #tpu.dot_dimension_numbers<[1], [0], [0], [1], [0, 0, 1, 1], [], []>} : vector<8x128xf32>, vector<128x128xf32>, vector<8x128xf32> -> vector<8x128xf32>
    %c2_i32_62 = arith.constant 2 : i32
    %345 = vector.broadcast %c2_i32_62 : i32 to vector<8x128xi32>
    %346 = arith.cmpi eq, %5, %345 : vector<8x128xi32>
    %347 = arith.select %346, %344, %317 : vector<8x128xi1>, vector<8x128xf32>
    %348 = arith.addi %0, %254 : i32
    %c3_i32_63 = arith.constant 3 : i32
    %349 = arith.addi %348, %c3_i32_63 : i32
    %c15_i32_64 = arith.constant 15 : i32
    %350 = arith.minsi %349, %c15_i32_64 : i32
    %351 = arith.index_cast %350 : i32 to index
    %352 = memref.load %arg1[%351] : memref<16xf32, #tpu.memory_space<smem>>
    %353 = arith.index_cast %350 : i32 to index
    %354 = memref.load %arg2[%353] : memref<16xf32, #tpu.memory_space<smem>>
    %355 = arith.index_cast %350 : i32 to index
    %356 = memref.load %arg3[%355] : memref<16xf32, #tpu.memory_space<smem>>
    %357 = arith.index_cast %350 : i32 to index
    %358 = memref.load %arg4[%357] : memref<16xf32, #tpu.memory_space<smem>>
    %359 = vector.broadcast %354 : f32 to vector<1x128xf32>
    %360 = arith.mulf %359, %2 : vector<1x128xf32>
    %361 = vector.broadcast %352 : f32 to vector<1x128xf32>
    %362 = arith.addf %361, %360 : vector<1x128xf32>
    %363 = vector.broadcast %356 : f32 to vector<1x128xf32>
    %364 = arith.maximumf %363, %362 : vector<1x128xf32>
    %365 = vector.broadcast %358 : f32 to vector<1x128xf32>
    %366 = arith.minimumf %365, %364 : vector<1x128xf32>
    %367 = vector.broadcast %366 : vector<1x128xf32> to vector<128x128xf32>
    %368 = arith.subf %4, %367 : vector<128x128xf32>
    %369 = math.absf %368 : vector<128x128xf32>
    %cst_65 = arith.constant 1.000000e+00 : f32
    %370 = vector.broadcast %cst_65 : f32 to vector<128x128xf32>
    %371 = arith.subf %370, %369 : vector<128x128xf32>
    %cst_66 = arith.constant 0.000000e+00 : f32
    %372 = vector.broadcast %cst_66 : f32 to vector<128x128xf32>
    %373 = arith.maximumf %372, %371 : vector<128x128xf32>
    %cst_67 = arith.constant dense<0.000000e+00> : vector<8x128xf32>
    %374 = tpu.matmul %256, %373, %cst_67 {dimension_numbers = #tpu.dot_dimension_numbers<[1], [0], [0], [1], [0, 0, 1, 1], [], []>} : vector<8x128xf32>, vector<128x128xf32>, vector<8x128xf32> -> vector<8x128xf32>
    %c3_i32_68 = arith.constant 3 : i32
    %375 = vector.broadcast %c3_i32_68 : i32 to vector<8x128xi32>
    %376 = arith.cmpi eq, %5, %375 : vector<8x128xi32>
    %377 = arith.select %376, %374, %347 : vector<8x128xi1>, vector<8x128xf32>
    %378 = arith.addi %0, %254 : i32
    %c4_i32_69 = arith.constant 4 : i32
    %379 = arith.addi %378, %c4_i32_69 : i32
    %c15_i32_70 = arith.constant 15 : i32
    %380 = arith.minsi %379, %c15_i32_70 : i32
    %381 = arith.index_cast %380 : i32 to index
    %382 = memref.load %arg1[%381] : memref<16xf32, #tpu.memory_space<smem>>
    %383 = arith.index_cast %380 : i32 to index
    %384 = memref.load %arg2[%383] : memref<16xf32, #tpu.memory_space<smem>>
    %385 = arith.index_cast %380 : i32 to index
    %386 = memref.load %arg3[%385] : memref<16xf32, #tpu.memory_space<smem>>
    %387 = arith.index_cast %380 : i32 to index
    %388 = memref.load %arg4[%387] : memref<16xf32, #tpu.memory_space<smem>>
    %389 = vector.broadcast %384 : f32 to vector<1x128xf32>
    %390 = arith.mulf %389, %2 : vector<1x128xf32>
    %391 = vector.broadcast %382 : f32 to vector<1x128xf32>
    %392 = arith.addf %391, %390 : vector<1x128xf32>
    %393 = vector.broadcast %386 : f32 to vector<1x128xf32>
    %394 = arith.maximumf %393, %392 : vector<1x128xf32>
    %395 = vector.broadcast %388 : f32 to vector<1x128xf32>
    %396 = arith.minimumf %395, %394 : vector<1x128xf32>
    %397 = vector.broadcast %396 : vector<1x128xf32> to vector<128x128xf32>
    %398 = arith.subf %4, %397 : vector<128x128xf32>
    %399 = math.absf %398 : vector<128x128xf32>
    %cst_71 = arith.constant 1.000000e+00 : f32
    %400 = vector.broadcast %cst_71 : f32 to vector<128x128xf32>
    %401 = arith.subf %400, %399 : vector<128x128xf32>
    %cst_72 = arith.constant 0.000000e+00 : f32
    %402 = vector.broadcast %cst_72 : f32 to vector<128x128xf32>
    %403 = arith.maximumf %402, %401 : vector<128x128xf32>
    %cst_73 = arith.constant dense<0.000000e+00> : vector<8x128xf32>
    %404 = tpu.matmul %256, %403, %cst_73 {dimension_numbers = #tpu.dot_dimension_numbers<[1], [0], [0], [1], [0, 0, 1, 1], [], []>} : vector<8x128xf32>, vector<128x128xf32>, vector<8x128xf32> -> vector<8x128xf32>
    %c4_i32_74 = arith.constant 4 : i32
    %405 = vector.broadcast %c4_i32_74 : i32 to vector<8x128xi32>
    %406 = arith.cmpi eq, %5, %405 : vector<8x128xi32>
    %407 = arith.select %406, %404, %377 : vector<8x128xi1>, vector<8x128xf32>
    %408 = arith.addi %0, %254 : i32
    %c5_i32_75 = arith.constant 5 : i32
    %409 = arith.addi %408, %c5_i32_75 : i32
    %c15_i32_76 = arith.constant 15 : i32
    %410 = arith.minsi %409, %c15_i32_76 : i32
    %411 = arith.index_cast %410 : i32 to index
    %412 = memref.load %arg1[%411] : memref<16xf32, #tpu.memory_space<smem>>
    %413 = arith.index_cast %410 : i32 to index
    %414 = memref.load %arg2[%413] : memref<16xf32, #tpu.memory_space<smem>>
    %415 = arith.index_cast %410 : i32 to index
    %416 = memref.load %arg3[%415] : memref<16xf32, #tpu.memory_space<smem>>
    %417 = arith.index_cast %410 : i32 to index
    %418 = memref.load %arg4[%417] : memref<16xf32, #tpu.memory_space<smem>>
    %419 = vector.broadcast %414 : f32 to vector<1x128xf32>
    %420 = arith.mulf %419, %2 : vector<1x128xf32>
    %421 = vector.broadcast %412 : f32 to vector<1x128xf32>
    %422 = arith.addf %421, %420 : vector<1x128xf32>
    %423 = vector.broadcast %416 : f32 to vector<1x128xf32>
    %424 = arith.maximumf %423, %422 : vector<1x128xf32>
    %425 = vector.broadcast %418 : f32 to vector<1x128xf32>
    %426 = arith.minimumf %425, %424 : vector<1x128xf32>
    %427 = vector.broadcast %426 : vector<1x128xf32> to vector<128x128xf32>
    %428 = arith.subf %4, %427 : vector<128x128xf32>
    %429 = math.absf %428 : vector<128x128xf32>
    %cst_77 = arith.constant 1.000000e+00 : f32
    %430 = vector.broadcast %cst_77 : f32 to vector<128x128xf32>
    %431 = arith.subf %430, %429 : vector<128x128xf32>
    %cst_78 = arith.constant 0.000000e+00 : f32
    %432 = vector.broadcast %cst_78 : f32 to vector<128x128xf32>
    %433 = arith.maximumf %432, %431 : vector<128x128xf32>
    %cst_79 = arith.constant dense<0.000000e+00> : vector<8x128xf32>
    %434 = tpu.matmul %256, %433, %cst_79 {dimension_numbers = #tpu.dot_dimension_numbers<[1], [0], [0], [1], [0, 0, 1, 1], [], []>} : vector<8x128xf32>, vector<128x128xf32>, vector<8x128xf32> -> vector<8x128xf32>
    %c5_i32_80 = arith.constant 5 : i32
    %435 = vector.broadcast %c5_i32_80 : i32 to vector<8x128xi32>
    %436 = arith.cmpi eq, %5, %435 : vector<8x128xi32>
    %437 = arith.select %436, %434, %407 : vector<8x128xi1>, vector<8x128xf32>
    %438 = arith.addi %0, %254 : i32
    %c6_i32_81 = arith.constant 6 : i32
    %439 = arith.addi %438, %c6_i32_81 : i32
    %c15_i32_82 = arith.constant 15 : i32
    %440 = arith.minsi %439, %c15_i32_82 : i32
    %441 = arith.index_cast %440 : i32 to index
    %442 = memref.load %arg1[%441] : memref<16xf32, #tpu.memory_space<smem>>
    %443 = arith.index_cast %440 : i32 to index
    %444 = memref.load %arg2[%443] : memref<16xf32, #tpu.memory_space<smem>>
    %445 = arith.index_cast %440 : i32 to index
    %446 = memref.load %arg3[%445] : memref<16xf32, #tpu.memory_space<smem>>
    %447 = arith.index_cast %440 : i32 to index
    %448 = memref.load %arg4[%447] : memref<16xf32, #tpu.memory_space<smem>>
    %449 = vector.broadcast %444 : f32 to vector<1x128xf32>
    %450 = arith.mulf %449, %2 : vector<1x128xf32>
    %451 = vector.broadcast %442 : f32 to vector<1x128xf32>
    %452 = arith.addf %451, %450 : vector<1x128xf32>
    %453 = vector.broadcast %446 : f32 to vector<1x128xf32>
    %454 = arith.maximumf %453, %452 : vector<1x128xf32>
    %455 = vector.broadcast %448 : f32 to vector<1x128xf32>
    %456 = arith.minimumf %455, %454 : vector<1x128xf32>
    %457 = vector.broadcast %456 : vector<1x128xf32> to vector<128x128xf32>
    %458 = arith.subf %4, %457 : vector<128x128xf32>
    %459 = math.absf %458 : vector<128x128xf32>
    %cst_83 = arith.constant 1.000000e+00 : f32
    %460 = vector.broadcast %cst_83 : f32 to vector<128x128xf32>
    %461 = arith.subf %460, %459 : vector<128x128xf32>
    %cst_84 = arith.constant 0.000000e+00 : f32
    %462 = vector.broadcast %cst_84 : f32 to vector<128x128xf32>
    %463 = arith.maximumf %462, %461 : vector<128x128xf32>
    %cst_85 = arith.constant dense<0.000000e+00> : vector<8x128xf32>
    %464 = tpu.matmul %256, %463, %cst_85 {dimension_numbers = #tpu.dot_dimension_numbers<[1], [0], [0], [1], [0, 0, 1, 1], [], []>} : vector<8x128xf32>, vector<128x128xf32>, vector<8x128xf32> -> vector<8x128xf32>
    %c6_i32_86 = arith.constant 6 : i32
    %465 = vector.broadcast %c6_i32_86 : i32 to vector<8x128xi32>
    %466 = arith.cmpi eq, %5, %465 : vector<8x128xi32>
    %467 = arith.select %466, %464, %437 : vector<8x128xi1>, vector<8x128xf32>
    %468 = arith.addi %0, %254 : i32
    %c7_i32_87 = arith.constant 7 : i32
    %469 = arith.addi %468, %c7_i32_87 : i32
    %c15_i32_88 = arith.constant 15 : i32
    %470 = arith.minsi %469, %c15_i32_88 : i32
    %471 = arith.index_cast %470 : i32 to index
    %472 = memref.load %arg1[%471] : memref<16xf32, #tpu.memory_space<smem>>
    %473 = arith.index_cast %470 : i32 to index
    %474 = memref.load %arg2[%473] : memref<16xf32, #tpu.memory_space<smem>>
    %475 = arith.index_cast %470 : i32 to index
    %476 = memref.load %arg3[%475] : memref<16xf32, #tpu.memory_space<smem>>
    %477 = arith.index_cast %470 : i32 to index
    %478 = memref.load %arg4[%477] : memref<16xf32, #tpu.memory_space<smem>>
    %479 = vector.broadcast %474 : f32 to vector<1x128xf32>
    %480 = arith.mulf %479, %2 : vector<1x128xf32>
    %481 = vector.broadcast %472 : f32 to vector<1x128xf32>
    %482 = arith.addf %481, %480 : vector<1x128xf32>
    %483 = vector.broadcast %476 : f32 to vector<1x128xf32>
    %484 = arith.maximumf %483, %482 : vector<1x128xf32>
    %485 = vector.broadcast %478 : f32 to vector<1x128xf32>
    %486 = arith.minimumf %485, %484 : vector<1x128xf32>
    %487 = vector.broadcast %486 : vector<1x128xf32> to vector<128x128xf32>
    %488 = arith.subf %4, %487 : vector<128x128xf32>
    %489 = math.absf %488 : vector<128x128xf32>
    %cst_89 = arith.constant 1.000000e+00 : f32
    %490 = vector.broadcast %cst_89 : f32 to vector<128x128xf32>
    %491 = arith.subf %490, %489 : vector<128x128xf32>
    %cst_90 = arith.constant 0.000000e+00 : f32
    %492 = vector.broadcast %cst_90 : f32 to vector<128x128xf32>
    %493 = arith.maximumf %492, %491 : vector<128x128xf32>
    %cst_91 = arith.constant dense<0.000000e+00> : vector<8x128xf32>
    %494 = tpu.matmul %256, %493, %cst_91 {dimension_numbers = #tpu.dot_dimension_numbers<[1], [0], [0], [1], [0, 0, 1, 1], [], []>} : vector<8x128xf32>, vector<128x128xf32>, vector<8x128xf32> -> vector<8x128xf32>
    %c7_i32_92 = arith.constant 7 : i32
    %495 = vector.broadcast %c7_i32_92 : i32 to vector<8x128xi32>
    %496 = arith.cmpi eq, %5, %495 : vector<8x128xi32>
    %497 = arith.select %496, %494, %467 : vector<8x128xi1>, vector<8x128xf32>
    %498 = arith.index_cast %254 : i32 to index
    %c0_93 = arith.constant 0 : index
    %499 = vector.load %arg6[%498, %c0_93] : memref<16x128xf32, #tpu.memory_space<vmem>>, vector<8x128xf32>
    tpu.vector_store %arg6[%498, %c0_93], %497 {strides = array<i32>} : memref<16x128xf32, #tpu.memory_space<vmem>>, vector<8x128xf32>,
    %c2_i32_94 = arith.constant 2 : i32
    return
  }
  func.func @transform_0(%arg0: i32, %arg1: memref<16xf32, #tpu.memory_space<smem>>, %arg2: memref<16xf32, #tpu.memory_space<smem>>, %arg3: memref<16xf32, #tpu.memory_space<smem>>, %arg4: memref<16xf32, #tpu.memory_space<smem>>) -> (i32, i32) {
    %c0_i32 = arith.constant 0 : i32
    %c0_i32_0 = arith.constant 0 : i32
    return %arg0, %c0_i32 : i32, i32
  }
  func.func @transform_1(%arg0: i32, %arg1: memref<16xf32, #tpu.memory_space<smem>>, %arg2: memref<16xf32, #tpu.memory_space<smem>>, %arg3: memref<16xf32, #tpu.memory_space<smem>>, %arg4: memref<16xf32, #tpu.memory_space<smem>>) -> (i32, i32) {
    %c0_i32 = arith.constant 0 : i32
    %c0_i32_0 = arith.constant 0 : i32
    return %arg0, %c0_i32 : i32, i32
  }
}

</mosaic_0001>

<bundles_post_ra>
// kernel: tpu_custom_call.1
= control target key start
LH: loop header
LB: loop body
LE: loop exit
PB: predicated region body
PF: predicated region fallthrough
CT: control target
= control target key end

     0   :  { %s5077_s0 = inlined_call_operand.hbm [shape: f32[16], index: 0, kind: input, shape index: {}]   ;;  %s5078_s4 = inlined_call_operand.hbm [shape: f32[16,128], index: 4, kind: input, shape index: {}]   ;;  %s5079_s5 = inlined_call_operand.hbm [shape: f32[16,128], index: 5, kind: output, shape index: {}]   ;;  %s5080_s1 = inlined_call_operand.vmem [shape: f32[16], index: 1, kind: input, shape index: {}]   ;;  %s5081_s2 = inlined_call_operand.vmem [shape: f32[16], index: 2, kind: input, shape index: {}]   ;;  %s5082_s3 = inlined_call_operand.vmem [shape: f32[16], index: 3, kind: input, shape index: {}]  }
   0x1   :  { %s3800_s20 = scalar_lea.hbm %s5077_s0, 16 }
   0x2   :  { %p3801_p0 = scmp.ne.s32.totalorder %s5077_s0, %s3800_s20  ;;  %p3804_p1 = scmp.lt.u32.totalorder %s3800_s20, %s5077_s0 }
   0x4   :  { %p3806_p2 = pnand %p3804_p1, %p3801_p0 }
   0x6   :  { %3809 = shalt.err (!%p3806_p2)  }
   0x7   :  { %s3896_s25 = smov [#allocation3]   ;;  %s12_s30 = sshll.u32 %s5080_s1, 4  ;;  %s13_s30 = int_to_ptr.vmem [resolvable:$true] %s12_s30 }
   0x8   :  { %11 = dma.hbm_to_smem %s5077_s0, 16, %s3896_s25, [#allocation2] }
   0x9   :  { %s16_s8 = sshll.u32 %s5081_s2, 4  ;;  %s3810_s9 = scalar_lea.vmem %s13_s30, 16  ;;  %s17_s8 = int_to_ptr.vmem [resolvable:$true] %s16_s8 }
   0xa   :  { %p3811_p3 = scmp.ne.s32.totalorder %s13_s30, %s3810_s9  ;;  %p3815_p4 = scmp.lt.s32.totalorder %s13_s30, %s13_s30 }
   0xb   :  { %p3816_p5 = scmp.lt.s32.totalorder %s3810_s9, %s3810_s9 }
   0xd   :  { %p3817_p6 = por %p3816_p5, %p3815_p4 }
   0xf   :  { %p3818_p7 = pnand %p3817_p6, %p3811_p3 }
  0x11   :  { %3821 = shalt.err (!%p3818_p7)  }
  0x12   :  { %s3897_s10 = smov [#allocation4]   ;;  %s20_s12 = sshll.u32 %s5082_s3, 4  ;;  %s21_s12 = int_to_ptr.vmem [resolvable:$true] %s20_s12 }
  0x13   :  { %15 = dma.vmem_to_smem %s13_s30, 16, %s3897_s10, [#allocation2] }
  0x14   :  { %s3822_s1 = scalar_lea.vmem %s17_s8, 16  ;;  %p3827_p9 = scmp.lt.s32.totalorder %s17_s8, %s17_s8 }
  0x15   :  { %p3823_p8 = scmp.ne.s32.totalorder %s17_s8, %s3822_s1  ;;  %p3828_p10 = scmp.lt.s32.totalorder %s3822_s1, %s3822_s1 }
  0x17   :  { %p3829_p11 = por %p3828_p10, %p3827_p9 }
  0x19   :  { %p3830_p12 = pnand %p3829_p11, %p3823_p8 }
  0x1b   :  { %3833 = shalt.err (!%p3830_p12)  }
  0x1c   :  { %s3898_s2 = smov [#allocation5]   ;;  %s3834_s13 = scalar_lea.vmem %s21_s12, 16 }
  0x1d   :  { %19 = dma.vmem_to_smem %s17_s8, 16, %s3898_s2, [#allocation2] }
  0x1e   :  { %p3835_p13 = scmp.ne.s32.totalorder %s21_s12, %s3834_s13  ;;  %p3839_p0 = scmp.lt.s32.totalorder %s21_s12, %s21_s12 }
  0x1f   :  { %p3840_p1 = scmp.lt.s32.totalorder %s3834_s13, %s3834_s13 }
  0x21   :  { %p3841_p2 = por %p3840_p1, %p3839_p0 }
  0x23   :  { %p3842_p3 = pnand %p3841_p2, %p3835_p13 }
  0x25   :  { %3845 = shalt.err (!%p3842_p3)  }
  0x26   :  { %s3899_s14 = smov [#allocation6]  }
  0x27   :  { %23 = dma.vmem_to_smem %s21_s12, 16, %s3899_s14, [#allocation2] }
  0x28   :  { %3890 = dma.done.wait [#allocation2], 64 }
  0x29   :  { %3891 = vsyncadd [#allocation2], 4294967232 }
  0x2a   :  { %25 = sfence }
  0x2b   :  { %26 = vsyncpa [#allocation8], 0 }
  0x2c   :  { %27 = vsyncpa [#allocation9], 0  ;;  %s3900_s3 = smov [#allocation7]   ;;  %s3846_s18 = scalar_lea.hbm %s5078_s4, 256 }
  0x2d   :  { %s33_s15 = sshll.u32 %s3900_s3, 4  ;;  %p3847_p4 = scmp.ne.s32.totalorder %s5078_s4, %s3846_s18  ;;  %s34_s15 = int_to_ptr.vmem [resolvable:$true] %s33_s15 }
  0x2e   :  { %p3850_p5 = scmp.lt.u32.totalorder %s3846_s18, %s5078_s4 }
  0x30   :  { %p3852_p6 = pnand %p3850_p5, %p3847_p4 }
  0x32   :  { %3855 = shalt.err (!%p3852_p6)
}
  0x33   :  { %s3856_s23 = scalar_lea.vmem %s34_s15, 256  ;;  %p3861_p8 = scmp.lt.s32.totalorder %s34_s15, %s34_s15 }
  0x34   :  { %p3857_p7 = scmp.ne.s32.totalorder %s34_s15, %s3856_s23  ;;  %p3862_p9 = scmp.lt.s32.totalorder %s3856_s23, %s3856_s23 }
  0x36   :  { %p3863_p10 = por %p3862_p9, %p3861_p8 }
  0x38   :  { %p3864_p11 = pnand %p3863_p10, %p3857_p7 }
  0x3a   :  { %3867 = shalt.err (!%p3864_p11)
}
  0x3b   :  { %s3901_s24 = smov 128   ;;  %s3902_s25 = smov 8  }
  0x3c   :  { %39 = dma.hbm_to_vmem [thread:$0]  %s5078_s4, 256, %s34_s15, [#allocation8], %s3901_s24, %s3901_s24, %s3902_s25  }
  0x3d   :  { %3892 = dma.done.wait [#allocation8], 256  }
  0x3e   :  { %3893 = vsyncadd [#allocation8], 4294967040  ;;  %v44_v0 = vlaneseq  ;;  %v3903_v1 = vmov 0.0|0.0   ;;  %s3975_s28 = sld [smem:[#allocation3]]  ;;  %vm3904_vm0 = vmmov 0   ;;  %v3905_v4 = vmov 0.0  }
  0x3f   :  { %3403 = vmatprep.subr.bf16.mxu0 %v3903_v1  ;;  %3427 = vmatprep.subr.bf16.mxu1 %v3903_v1  ;;  %s3977_s29 = sld [smem:[#allocation4]]  ;;  %s3989_s4 = sld [smem:[#allocation3 + $0x1]] }
  0x40   :  { %v45_v2 = vand.u32 127, %v44_v0  ;;  %v3979_v3 = vshrl.u32 %v44_v0, 7  ;;  %s3981_s30 = sld [smem:[#allocation5]]  ;;  %2875 = vmatprep.mubr.msk.f32.mxu0 %vm3904_vm0, %v3905_v4  ;;  %2910 = vmatprep.mubr.msk.f32.mxu1 %vm3904_vm0, %v3905_v4  ;;  %s2512_s7 = sld [smem:[#allocation4 + $0x1]] }
  0x41   :  { %s3983_s6 = sld [smem:[#allocation6]]  ;;  %s3997_s8 = sld [smem:[#allocation5 + $0x1]] }
  0x42   :  { %v3991_v5 = vcvt.s32.f32 %v45_v2  ;;  %v49_v6 = vadd.s32 8, %v3979_v3  ;;  %v3995_v7 = vcvt.s32.f32 %v3979_v3  ;;  %s3999_s9 = sld [smem:[#allocation6 + $0x1]]  ;;  %v50_v8 = vadd.s32 16, %v3979_v3  ;;  %s4018_s10 = sld [smem:[#allocation3 + $0x2]] }
  0x43   :  { %v51_v9 = vadd.s32 24, %v3979_v3  ;;  %v52_v10 = vadd.s32 32, %v3979_v3  ;;  %v53_v11 = vadd.s32 40, %v3979_v3  ;;  %v54_v12 = vadd.s32 48, %v3979_v3  ;;  %s4020_s0 = sld [smem:[#allocation4 + $0x2]]  ;;  %s4125_s1 = sld [smem:[#allocation3 + $0x3]] }
  0x44   :  { %v4006_v13 = vcvt.s32.f32 %v49_v6  ;;  %v4008_v14 = vcvt.s32.f32 %v50_v8  ;;  %v55_v15 = vadd.s32 56, %v3979_v3  ;;  %v56_v16 = vadd.s32 64, %v3979_v3  ;;  %s4116_s11 = sld [smem:[#allocation5 + $0x2]]  ;;  %s4127_s2 = sld [smem:[#allocation4 + $0x3]] }
  0x45   :  { %v88_v17 = vstv %s3977_s29  ;;  %v90_v18 = vstv %s3975_s28  ;;  %v4014_v19 = vcvt.s32.f32 %v51_v9  ;;  %v4016_v20 = vcvt.s32.f32 %v52_v10  ;;  %s4118_s12 = sld [smem:[#allocation6 + $0x2]]  ;;  %s4134_s13 = sld [smem:[#allocation5 + $0x3]] }
  0x46   :  { %v89_v21 = vmul.f32 %v88_v17, %v3991_v5  ;;  %v92_v22 = vstv %s3981_s30  ;;  %v4025_v24 = vcvt.s32.f32 %v53_v11  ;;  %v239_v25 = vstv %s2512_s7  ;;  %s4136_s14 = sld [smem:[#allocation6 + $0x3]]  ;;  %s4144_s3 = sld [smem:[#allocation3 + $0x4]] }
  0x47   :  { %v94_v23 = vstv %s3983_s6  ;;  %v241_v26 = vstv %s3989_s4  ;;  %v4028_v27 = vcvt.s32.f32 %v54_v12  ;;  %v4030_v28 = vcvt.s32.f32 %v55_v15  ;;  %s4146_s15 = sld [smem:[#allocation4 + $0x4]]  ;;  %s4162_s18 = sld [smem:[#allocation4 + $0x5]] }
  0x48   :  { %v91_v29 = vadd.f32 %v90_v18, %v89_v21  ;;  %v240_v30 = vmul.f32 %v239_v25, %v3991_v5  ;;  %v243_v31 = vstv %s3997_s8  ;;  %v245_v32 = vstv %s3999_s9  ;;  %s4151_s16 = sld [smem:[#allocation5 + $0x4]]  ;;  %s4260_s19 = sld [smem:[#allocation3 + $0x5]] }
  0x49   :  { %v57_v33 = vadd.s32 72, %v3979_v3  ;;  %v4036_v34 = vcvt.s32.f32 %v56_v16  ;;  %v58_v35 = vadd.s32 80, %v3979_v3  ;;  %v59_v36 = vadd.s32 88, %v3979_v3  ;;  %s4157_s17 = sld [smem:[#allocation6 + $0x4]]  ;;  %s4264_s20 = sld [smem:[#allocation5 + $0x5]] }
  0x4a   :  { %v93_v37 = vmax.f32 %v92_v22, %v91_v29  ;;  %v242_v38 = vadd.f32 %v241_v26, %v240_v30  ;;  %v60_v39 = vadd.s32 96, %v3979_v3  ;;  %v61_v40 = vadd.s32 104, %v3979_v3  ;;  %s4272_s21 = sld [smem:[#allocation6 + $0x5]]  ;;  %s4276_s22 = sld [smem:[#allocation3 + $0x6]] }
  0x4b   :  { %v4042_v41 = vcvt.s32.f32 %v57_v33  ;;  %v4044_v42 = vcvt.s32.f32 %v58_v35  ;;  %v4046_v43 = vcvt.s32.f32 %v59_v36  ;;  %v62_v44 = vadd.s32 112, %v3979_v3  ;;  %s4278_s23 = sld [smem:[#allocation4 + $0x6]]  ;;  %s4383_s28 = sld [smem:[#allocation3 + $0x7]] }
  0x4c   :  { %v4049_v45 = vmin.f32 %v94_v23, %v93_v37  ;;  %v244_v46 = vmax.f32 %v243_v31, %v242_v38  ;;  %v4051_v47 = vcvt.s32.f32 %v60_v39  ;;  %v4053_v48 = vcvt.s32.f32 %v61_v40  ;;  %s4283_s26 = sld [smem:[#allocation5 + $0x6]]  ;;  %s4386_s29 = sld [smem:[#allocation4 + $0x7]] }
  0x4d   :  { %v4056_v49 = vadd.s32 120, %v3979_v3  ;;  %v4058_v50 = vcvt.s32.f32 %v62_v44  ;;  %v390_v51 = vstv %s4020_s0  ;;  %v392_v52 = vstv %s4018_s10  ;;  %s4378_s27 = sld [smem:[#allocation6 + $0x6]]  ;;  %s4390_s30 = sld [smem:[#allocation5 + $0x7]] }
  0x4e   :  { %v96_v53 = vsub.f32 %v3995_v7, %v4049_v45  ;;  %v97_v54 = vsub.f32 %v4006_v13, %v4049_v45  ;;  %v4066_v55 = vmin.f32 %v245_v32, %v244_v46  ;;  %v98_v56 = vsub.f32 %v4008_v14, %v4049_v45  ;;  %s4394_s6 = sld [smem:[#allocation6 + $0x7]]  ;;  %s4396_s4 = sld [smem:[#allocation4 + $0x8]] }
  0x4f   :  { %v99_v57 = vsub.f32 %v4014_v19, %v4049_v45  ;;  %v100_v58 = vsub.f32 %v4016_v20, %v4049_v45  ;;  %v101_v59 = vsub.f32 %v4025_v24, %v4049_v45  ;;  %v102_v60 = vsub.f32 %v4028_v27, %v4049_v45  ;;  %s4401_s7 = sld [smem:[#allocation3 + $0x8]]  ;;  %s4504_s10 = sld [smem:[#allocation4 + $0x9]] }
  0x50   :  { %v112_v61 = vand.u32 2147483647, %v96_v53  ;;  %v113_v62 = vand.u32 2147483647, %v97_v54  ;;  %v247_v63 = vsub.f32 %v3995_v7, %v4066_v55  ;;  %v248_v0 = vsub.f32 %v4006_v13, %v4066_v55  ;;  %s4405_s8 = sld [smem:[#allocation5 + $0x8]]  ;;  %s4508_s0 = sld [smem:[#allocation3 + $0x9]] }
  0x51   :  { %v114_v2 = vand.u32 2147483647, %v98_v56  ;;  %v115_v6 = vand.u32 2147483647, %v99_v57  ;;  %v249_v8 = vsub.f32 %v4008_v14, %v4066_v55  ;;  %v250_v9 = vsub.f32 %v4014_v19, %v4066_v55  ;;  %s4410_s9 = sld [smem:[#allocation6 + $0x8]] }
  0x52   :  { %v128_v10 = vsub.f32 1.0, %v112_v61  ;;  %v129_v11 = vsub.f32 1.0, %v113_v62  ;;  %v263_v12 = vand.u32 2147483647, %v247_v63  ;;  %v264_v15 = vand.u32 2147483647, %v248_v0 }
  0x53   :  { %v130_v16 = vsub.f32 1.0, %v114_v2  ;;  %v131_v17 = vsub.f32 1.0, %v115_v6  ;;  %v265_v18 = vand.u32 2147483647, %v249_v8  ;;  %v266_v21 = vand.u32 2147483647, %v250_v9 }
  0x54   :  { %v144_v22 = vmax.f32 %v128_v10, 0.0  ;;  %v145_v23 = vmax.f32 %v129_v11, 0.0  ;;  %v279_v25 = vsub.f32 1.0, %v263_v12  ;;  %v280_v26 = vsub.f32 1.0, %v264_v15 }
  0x55   :  { %v146_v29 = vmax.f32 %v130_v16, 0.0  ;;  %v147_v30 = vmax.f32 %v131_v17, 0.0  ;;  %v281_v31 = vsub.f32 1.0, %v265_v18  ;;  %v282_v32 = vsub.f32 1.0, %v266_v21 }
  0x56   :  { %v3404_v33 = vpack.c.bf16 %v145_v23, %v144_v22  ;;  %v295_v35 = vmax.f32 %v279_v25, 0.0  ;;  %v296_v36 = vmax.f32 %v280_v26, 0.0  ;;  %v116_v37 = vand.u32 2147483647, %v100_v58 }
  0x57   :  { %v3407_v38 = vpack.c.bf16 %v147_v30, %v146_v29  ;;  %v297_v39 = vmax.f32 %v281_v31, 0.0  ;;  %v298_v40 = vmax.f32 %v282_v32, 0.0  ;;  %v117_v44 = vand.u32 2147483647, %v101_v59 }
  0x58   :  { %3405 = vmatpush3.bf16.msra.mxu0 %v3404_v33  ;;  %v3428_v46 = vpack.c.bf16 %v296_v36, %v295_v35  ;;  %v132_v53 = vsub.f32 1.0, %v116_v37  ;;  %v251_v54 = vsub.f32 %v4016_v20, %v4066_v55  ;;  %v252_v56 = vsub.f32 %v4025_v24, %v4066_v55 }
  0x59   :  { %3406 = vmatprep.subr.bf16.mxu0 %v3903_v1  ;;  %v3431_v57 = vpack.c.bf16 %v298_v40, %v297_v39  ;;  %v133_v61 = vsub.f32 1.0, %v117_v44  ;;  %v103_v58 = vsub.f32 %v4030_v28, %v4049_v45  ;;  %v118_v62 = vand.u32 2147483647, %v102_v60 }
  0x5a   :  { %3429 = vmatpush3.bf16.msra.mxu1 %v3428_v46  ;;  %v148_v63 = vmax.f32 %v132_v53, 0.0  ;;  %v267_v59 = vand.u32 2147483647, %v251_v54  ;;  %v268_v0 = vand.u32 2147483647, %v252_v56  ;;  %v253_v2 = vsub.f32 %v4028_v27, %v4066_v55 }
  0x5b   :  { %3430 = vmatprep.subr.bf16.mxu1 %v3903_v1  ;;  %v149_v6 = vmax.f32 %v133_v61, 0.0  ;;  %v119_v8 = vand.u32 2147483647, %v103_v58  ;;  %v134_v9 = vsub.f32 1.0, %v118_v62  ;;  %v254_v10 = vsub.f32 %v4030_v28, %v4066_v55 }
  0x5c   :  { %3408 = vmatpush3.bf16.msra.mxu0 %v3407_v38  ;;  %v283_v11 = vsub.f32 1.0, %v267_v59  ;;  %v284_v12 = vsub.f32 1.0, %v268_v0  ;;  %v269_v15 = vand.u32 2147483647, %v253_v2  ;;  %v104_v60 = vsub.f32 %v4036_v34, %v4049_v45 }
  0x5d   :  { %3409 = vmatprep.subr.bf16.mxu0 %v3903_v1  ;;  %v3410_v16 = vpack.c.bf16 %v149_v6, %v148_v63  ;;  %v135_v17 = vsub.f32 1.0, %v119_v8  ;;  %v150_v18 = vmax.f32 %v134_v9, 0.0  ;;  %v270_v21 = vand.u32 2147483647, %v254_v10 }
  0x5e   :  { %3432 = vmatpush3.bf16.msra.mxu1 %v3431_v57  ;;  %v299_v22 = vmax.f32 %v283_v11, 0.0  ;;  %v300_v23 = vmax.f32 %v284_v12, 0.0  ;;  %v285_v25 = vsub.f32 1.0, %v269_v15  ;;  %v105_v26 = vsub.f32 %v4042_v41, %v4049_v45 }
  0x5f   :  { %3433 = vmatprep.subr.bf16.mxu1 %v3903_v1  ;;  %v151_v29 = vmax.f32 %v135_v17, 0.0  ;;  %v286_v30 = vsub.f32 1.0, %v270_v21  ;;  %v120_v31 = vand.u32 2147483647, %v104_v60  ;;  %v255_v32 = vsub.f32 %v4036_v34, %v4066_v55 }
  0x60   :  { %3411 = vmatpush3.bf16.msra.mxu0 %v3410_v16  ;;  %v3434_v33 = vpack.c.bf16 %v300_v23, %v299_v22  ;;  %v301_v35 = vmax.f32 %v285_v25, 0.0  ;;  %v121_v36 = vand.u32 2147483647, %v105_v26  ;;  %v256_v37 = vsub.f32 %v4042_v41, %v4066_v55 }
  0x61   :  { %3412 = vmatprep.subr.bf16.mxu0 %v3903_v1  ;;  %v3413_v38 = vpack.c.bf16 %v151_v29, %v150_v18  ;;  %v302_v39 = vmax.f32 %v286_v30, 0.0  ;;  %v136_v40 = vsub.f32 1.0, %v120_v31  ;;  %v271_v44 = vand.u32 2147483647, %v255_v32 }
  0x62   :  { %3435 = vmatpush3.bf16.msra.mxu1 %v3434_v33  ;;  %v137_v46 = vsub.f32 1.0, %v121_v36  ;;  %v272_v53 = vand.u32 2147483647, %v256_v37  ;;  %v106_v54 = vsub.f32 %v4044_v42, %v4049_v45  ;;  %v107_v56 = vsub.f32 %v4046_v43, %v4049_v45 }
  0x63   :  { %3436 = vmatprep.subr.bf16.mxu1 %v3903_v1  ;;  %v3437_v57 = vpack.c.bf16 %v302_v39, %v301_v35  ;;  %v152_v61 = vmax.f32 %v136_v40, 0.0  ;;  %v287_v58 = vsub.f32 1.0, %v271_v44  ;;  %v257_v62 = vsub.f32 %v4044_v42, %v4066_v55 }
  0x64   :  { %3414 = vmatpush3.bf16.msra.mxu0 %v3413_v38  ;;  %v153_v63 = vmax.f32 %v137_v46, 0.0  ;;  %v288_v59 = vsub.f32 1.0, %v272_v53  ;;  %v122_v0 = vand.u32 2147483647, %v106_v54  ;;  %v123_v2 = vand.u32 2147483647, %v107_v56 }
  0x65   :  { %3415 = vmatprep.subr.bf16.mxu0 %v3903_v1  ;;  %v303_v6 = vmax.f32 %v287_v58, 0.0  ;;  %v258_v8 = vsub.f32 %v4046_v43, %v4066_v55  ;;  %v273_v9 = vand.u32 2147483647, %v257_v62  ;;  %v108_v10 = vsub.f32 %v4051_v47, %v4049_v45 }
  0x66   :  { %3438 = vmatpush3.bf16.msra.mxu1 %v3437_v57  ;;  %v3416_v11 = vpack.c.bf16 %v153_v63, %v152_v61  ;;  %v304_v12 = vmax.f32 %v288_v59, 0.0  ;;  %v138_v15 = vsub.f32 1.0, %v122_v0  ;;  %v139_v60 = vsub.f32 1.0, %v123_v2 }
  0x67   :  { %3439 = vmatprep.subr.bf16.mxu1 %v3903_v1  ;;  %v274_v16 = vand.u32 2147483647, %v258_v8  ;;  %v289_v17 = vsub.f32 1.0, %v273_v9  ;;  %v109_v18 = vsub.f32 %v4053_v48, %v4049_v45  ;;  %v124_v21 = vand.u32 2147483647, %v108_v10 }
  0x68   :  { %3417 = vmatpush3.bf16.msra.mxu0 %v3416_v11  ;;  %v3440_v22 = vpack.c.bf16 %v304_v12, %v303_v6  ;;  %v154_v23 = vmax.f32 %v138_v15, 0.0  ;;  %v155_v25 = vmax.f32 %v139_v60, 0.0  ;;  %v259_v26 = vsub.f32 %v4051_v47, %v4066_v55 }
  0x69   :  { %3418 = vmatprep.subr.bf16.mxu0 %v3903_v1  ;;  %v290_v29 = vsub.f32 1.0, %v274_v16  ;;  %v305_v30 = vmax.f32 %v289_v17, 0.0  ;;  %v125_v31 = vand.u32 2147483647, %v109_v18  ;;  %v140_v32 = vsub.f32 1.0, %v124_v21 }
  0x6a   :  { %3441 = vmatpush3.bf16.msra.mxu1 %v3440_v22  ;;  %v3419_v33 = vpack.c.bf16 %v155_v25, %v154_v23  ;;  %v260_v35 = vsub.f32 %v4053_v48, %v4066_v55  ;;  %v275_v36 = vand.u32 2147483647, %v259_v26  ;;  %v4142_v37 = vcvt.s32.f32 %v4056_v49 }
  0x6b   :  { %3442 = vmatprep.subr.bf16.mxu1 %v3903_v1  ;;  %v306_v38 = vmax.f32 %v290_v29, 0.0  ;;  %v141_v39 = vsub.f32 1.0, %v125_v31  ;;  %v156_v40 = vmax.f32 %v140_v32, 0.0  ;;  %v110_v44 = vsub.f32 %v4058_v50, %v4049_v45 }
  0x6c   :  { %3420 = vmatpush3.bf16.msra.mxu0 %v3419_v33  ;;  %v276_v46 = vand.u32 2147483647, %v260_v35  ;;  %v291_v53 = vsub.f32 1.0, %v275_v36  ;;  %v111_v49 = vsub.f32 %v4142_v37, %v4049_v45  ;;  %v261_v54 = vsub.f32 %v4058_v50, %v4066_v55 }
  0x6d   :  { %v3443_v56 = vpack.c.bf16 %v306_v38, %v305_v30  ;;  %3421 = vmatprep.subr.bf16.mxu0 %v3903_v1  ;;  %v157_v57 = vmax.f32 %v141_v39, 0.0  ;;  %v126_v61 = vand.u32 2147483647, %v110_v44  ;;  %v262_v58 = vsub.f32 %v4142_v37, %v4066_v55  ;;  %v4185_v38 = vld [vmem:[#allocation7] sm:$0xff] }
  0x6e   :  { %v292_v62 = vsub.f32 1.0, %v276_v46  ;;  %v307_v63 = vmax.f32 %v291_v53, 0.0  ;;  %v127_v45 = vand.u32 2147483647, %v111_v49  ;;  %v277_v59 = vand.u32 2147483647, %v261_v54 }
  0x6f   :  { %3444 = vmatpush3.bf16.msra.mxu1 %v3443_v56  ;;  %v3422_v0 = vpack.c.bf16 %v157_v57, %v156_v40  ;;  %v142_v2 = vsub.f32 1.0, %v126_v61  ;;  %v278_v6 = vand.u32 2147483647, %v262_v58  ;;  %v391_v8 = vmul.f32 %v390_v51, %v3991_v5 }
  0x70   :  { %3445 = vmatprep.subr.bf16.mxu1 %v3903_v1  ;;  %v308_v9 = vmax.f32 %v292_v62, 0.0  ;;  %v143_v55 = vsub.f32 1.0, %v127_v45  ;;  %v293_v10 = vsub.f32 1.0, %v277_v59  ;;  %v394_v11 = vstv %s4116_s11  ;;  %s4513_s11 = sld [smem:[#allocation5 + $0x9]] }
  0x71   :  { %3423 = vmatpush3.bf16.msra.mxu0 %v3422_v0  ;;  %v158_v12 = vmax.f32 %v142_v2, 0.0  ;;  %v294_v15 = vsub.f32 1.0, %v278_v6  ;;  %v393_v60 = vadd.f32 %v392_v52, %v391_v8  ;;  %v396_v16 = vstv %s4118_s12  ;;  %s4518_s12 = sld [smem:[#allocation6 + $0x9]] }
  0x72   :  { %v3446_v17 = vpack.c.bf16 %v308_v9, %v307_v63  ;;  %3424 = vmatprep.subr.bf16.mxu0 %v3903_v1  ;;  %v159_v51 = vmax.f32 %v143_v55, 0.0  ;;  %v309_v18 = vmax.f32 %v293_v10, 0.0  ;;  %v541_v21 = vstv %s4127_s2  ;;  %s4526_s2 = sld [smem:[#allocation3 + $0xa]] }
  0x73   :  { %v310_v22 = vmax.f32 %v294_v15, 0.0  ;;  %v395_v23 = vmax.f32 %v394_v11, %v393_v60  ;;  %v542_v25 = vmul.f32 %v541_v21, %v3991_v5  ;;  %v543_v26 = vstv %s4125_s1  ;;  %s4522_s1 = sld [smem:[#allocation4 + $0xa]] }
  0x74   :  { %3447 = vmatpush3.bf16.msra.mxu1 %v3446_v17  ;;  %v3425_v29 = vpack.c.bf16 %v159_v51, %v158_v12  ;;  %v545_v30 = vstv %s4134_s13  ;;  %v547_v52 = vstv %s4136_s14  ;;  %v692_v31 = vstv %s4146_s15  ;;  %s4531_s13 = sld [smem:[#allocation5 + $0xa]]  ;;  %s4629_s15 = sld [smem:[#allocation4 + $0xb]] }
  0x75   :  { %3448 = vmatprep.subr.bf16.mxu1 %v3903_v1  ;;  %v3449_v32 = vpack.c.bf16 %v310_v22, %v309_v18  ;;  %v4180_v33 = vmin.f32 %v396_v16, %v395_v23  ;;  %v544_v35 = vadd.f32 %v543_v26, %v542_v25  ;;  %v4183_v36 = vmul.f32 %v692_v31, %v3991_v5  ;;  %s4621_s14 = sld [smem:[#allocation6 + $0xa]] }
  0x76   :  { %3426 = vmatpush3.bf16.msra.mxu0 %v3425_v29  ;;  %v694_v39 = vstv %s4144_s3  ;;  %v696_v40 = vstv %s4151_s16  ;;  %v698_v44 = vstv %s4157_s17  ;;  %v843_v46 = vstv %s4162_s18  ;;  %s4625_s3 = sld [smem:[#allocation3 + $0xb]]  ;;  %s4641_s18 = sld [smem:[#allocation4 + $0xc]] }
  0x77   :  { %3451 = vmatprep.subr.bf16.mxu0 %v3903_v1  ;;  %v398_v53 = vsub.f32 %v3995_v7, %v4180_v33  ;;  %v399_v49 = vsub.f32 %v4006_v13, %v4180_v33  ;;  %v546_v54 = vmax.f32 %v545_v30, %v544_v35  ;;  %v400_v56 = vsub.f32 %v4008_v14, %v4180_v33  ;;  %s4635_s16 = sld [smem:[#allocation5 + $0xb]] }
  0x78   :  { %3450 = vmatpush3.bf16.msra.mxu1 %v3449_v32  ;;  %v401_v57 = vsub.f32 %v4014_v19, %v4180_v33  ;;  %v402_v61 = vsub.f32 %v4016_v20, %v4180_v33  ;;  %v403_v58 = vsub.f32 %v4025_v24, %v4180_v33  ;;  %v404_v62 = vsub.f32 %v4028_v27, %v4180_v33  ;;  %s4639_s17 = sld [smem:[#allocation6 + $0xb]] }
  0x79   :  { %2876 = vmatmul.mubr.f32.vlgmr.msra.gmra.mrb[0].mxu0 %v4185_v38  ;;  %3475 = vmatprep.subr.bf16.mxu1 %v3903_v1  ;;  %v414_v63 = vand.u32 2147483647, %v398_v53  ;;  %v415_v45 = vand.u32 2147483647, %v399_v49  ;;  %v4208_v59 = vmin.f32 %v547_v52, %v546_v54  ;;  %v416_v0 = vand.u32 2147483647, %v400_v56 }
  0x7a   :  { %v417_v2 = vand.u32 2147483647, %v401_v57  ;;  %v418_v6 = vand.u32 2147483647, %v402_v61  ;;  %v419_v8 = vand.u32 2147483647, %v403_v58  ;;  %v405_v9 = vsub.f32 %v4030_v28, %v4180_v33  ;;  %2945 = vmatprep.mubr.msk.f32.mxu0 %vm3904_vm0, %v3905_v4 }
  0x7b   :  { %2911 = vmatmul.mubr.f32.vlgmr.msra.gmra.mrb[0].mxu1 %v4185_v38  ;;  %v430_v55 = vsub.f32 1.0, %v414_v63  ;;  %v431_v10 = vsub.f32 1.0, %v415_v45  ;;  %v549_v11 = vsub.f32 %v3995_v7, %v4208_v59  ;;  %v550_v12 = vsub.f32 %v4006_v13, %v4208_v59 }
  0x7c   :  { %v432_v15 = vsub.f32 1.0, %v416_v0  ;;  %v433_v60 = vsub.f32 1.0, %v417_v2  ;;  %v551_v16 = vsub.f32 %v4008_v14, %v4208_v59  ;;  %v552_v17 = vsub.f32 %v4014_v19, %v4208_v59  ;;  %2980 = vmatprep.mubr.msk.f32.mxu1 %vm3904_vm0, %v3905_v4 }
  0x7d   :  { %v446_v51 = vmax.f32 %v430_v55, 0.0  ;;  %v447_v18 = vmax.f32 %v431_v10, 0.0  ;;  %v565_v21 = vand.u32 2147483647, %v549_v11  ;;  %v566_v22 = vand.u32 2147483647, %v550_v12 }
  0x7e   :  { %v448_v23 = vmax.f32 %v432_v15, 0.0  ;;  %v449_v25 = vmax.f32 %v433_v60, 0.0  ;;  %v567_v26 = vand.u32 2147483647, %v551_v16  ;;  %v568_v29 = vand.u32 2147483647, %v552_v17 }
  0x7f   :  { %v3452_v30 = vpack.c.bf16 %v447_v18, %v446_v51  ;;  %v581_v52 = vsub.f32 1.0, %v565_v21  ;;  %v582_v31 = vsub.f32 1.0, %v566_v22  ;;  %v434_v32 = vsub.f32 1.0, %v418_v6 }
  0x80   :  { %v3455_v35 = vpack.c.bf16 %v449_v25, %v448_v23  ;;  %v583_v53 = vsub.f32 1.0, %v567_v26  ;;  %v584_v49 = vsub.f32 1.0, %v568_v29  ;;  %v435_v54 = vsub.f32 1.0, %v419_v8 }
  0x81   :  { %3453 = vmatpush3.bf16.msra.mxu0 %v3452_v30  ;;  %v597_v56 = vmax.f32 %v581_v52, 0.0  ;;  %v598_v57 = vmax.f32 %v582_v31, 0.0  ;;  %v450_v61 = vmax.f32 %v434_v32, 0.0  ;;  %v553_v58 = vsub.f32 %v4016_v20, %v4208_v59 }
  0x82   :  { %3454 = vmatprep.subr.bf16.mxu0 %v3903_v1  ;;  %v599_v63 = vmax.f32 %v583_v53, 0.0  ;;  %v600_v45 = vmax.f32 %v584_v49, 0.0  ;;  %v451_v0 = vmax.f32 %v435_v54, 0.0  ;;  %v554_v2 = vsub.f32 %v4025_v24, %v4208_v59 }
  0x83   :  { %v3476_v6 = vpack.c.bf16 %v598_v57, %v597_v56  ;;  %v569_v55 = vand.u32 2147483647, %v553_v58  ;;  %v420_v10 = vand.u32 2147483647, %v404_v62  ;;  %v421_v11 = vand.u32 2147483647, %v405_v9 }
  0x84   :  { %v3479_v8 = vpack.c.bf16 %v600_v45, %v599_v63  ;;  %v3458_v12 = vpack.c.bf16 %v451_v0, %v450_v61  ;;  %v570_v15 = vand.u32 2147483647, %v554_v2  ;;  %v555_v60 = vsub.f32 %v4028_v27, %v4208_v59 }
  0x85   :  { %3477 = vmatpush3.bf16.msra.mxu1 %v3476_v6  ;;  %3456 = vmatpush3.bf16.msra.mxu0 %v3455_v35  ;;  %v585_v16 = vsub.f32 1.0, %v569_v55  ;;  %v436_v17 = vsub.f32 1.0, %v420_v10  ;;  %v437_v51 = vsub.f32 1.0, %v421_v11  ;;  %v556_v18 = vsub.f32 %v4030_v28, %v4208_v59 }
  0x86   :  { %3478 = vmatprep.subr.bf16.mxu1 %v3903_v1  ;;  %3457 = vmatprep.subr.bf16.mxu0 %v3903_v1  ;;  %v586_v62 = vsub.f32 1.0, %v570_v15  ;;  %v571_v9 = vand.u32 2147483647, %v555_v60  ;;  %v406_v21 = vsub.f32 %v4036_v34, %v4180_v33  ;;  %v407_v22 = vsub.f32 %v4042_v41, %v4180_v33 }
  0x87   :  { %v601_v23 = vmax.f32 %v585_v16, 0.0  ;;  %v452_v25 = vmax.f32 %v436_v17, 0.0  ;;  %v453_v26 = vmax.f32 %v437_v51, 0.0  ;;  %v572_v29 = vand.u32 2147483647, %v556_v18 }
  0x88   :  { %v602_v30 = vmax.f32 %v586_v62, 0.0  ;;  %v587_v52 = vsub.f32 1.0, %v571_v9  ;;  %v422_v31 = vand.u32 2147483647, %v406_v21  ;;  %v423_v32 = vand.u32 2147483647, %v407_v22 }
  0x89   :  { %3480 = vmatpush3.bf16.msra.mxu1 %v3479_v8  ;;  %3459 = vmatpush3.bf16.msra.mxu0 %v3458_v12  ;;  %v3461_v35 = vpack.c.bf16 %v453_v26, %v452_v25  ;;  %v588_v53 = vsub.f32 1.0, %v572_v29  ;;  %v557_v49 = vsub.f32 %v4036_v34, %v4208_v59  ;;  %v558_v54 = vsub.f32 %v4042_v41, %v4208_v59 }
  0x8a   :  { %3481 = vmatprep.subr.bf16.mxu1 %v3903_v1  ;;  %v3482_v56 = vpack.c.bf16 %v602_v30, %v601_v23  ;;  %3460 = vmatprep.subr.bf16.mxu0 %v3903_v1  ;;  %v603_v57 = vmax.f32 %v587_v52, 0.0  ;;  %v438_v61 = vsub.f32 1.0, %v422_v31  ;;  %v439_v58 = vsub.f32 1.0, %v423_v32 }
  0x8b   :  { %v604_v63 = vmax.f32 %v588_v53, 0.0  ;;  %v573_v45 = vand.u32 2147483647, %v557_v49  ;;  %v574_v0 = vand.u32 2147483647, %v558_v54  ;;  %v408_v2 = vsub.f32 %v4044_v42, %v4180_v33 }
  0x8c   :  { %v454_v6 = vmax.f32 %v438_v61, 0.0  ;;  %v455_v55 = vmax.f32 %v439_v58, 0.0  ;;  %v409_v10 = vsub.f32 %v4046_v43, %v4180_v33  ;;  %v559_v11 = vsub.f32 %v4044_v42, %v4208_v59 }
  0x8d   :  { %3483 = vmatpush3.bf16.msra.mxu1 %v3482_v56  ;;  %3462 = vmatpush3.bf16.msra.mxu0 %v3461_v35  ;;  %v3485_v8 = vpack.c.bf16 %v604_v63, %v603_v57  ;;  %v589_v12 = vsub.f32 1.0, %v573_v45  ;;  %v590_v15 = vsub.f32 1.0, %v574_v0  ;;  %v424_v60 = vand.u32 2147483647, %v408_v2 }
  0x8e   :  { %3484 = vmatprep.subr.bf16.mxu1 %v3903_v1  ;;  %3463 = vmatprep.subr.bf16.mxu0 %v3903_v1  ;;  %v3464_v16 = vpack.c.bf16 %v455_v55, %v454_v6  ;;  %v425_v17 = vand.u32 2147483647, %v409_v10  ;;  %v560_v51 = vsub.f32 %v4046_v43, %v4208_v59  ;;  %v575_v18 = vand.u32 2147483647, %v559_v11 }
  0x8f   :  { %v605_v62 = vmax.f32 %v589_v12, 0.0  ;;  %v606_v9 = vmax.f32 %v590_v15, 0.0  ;;  %v440_v21 = vsub.f32 1.0, %v424_v60  ;;  %v410_v22 = vsub.f32 %v4051_v47, %v4180_v33 }
  0x90   :  { %v441_v23 = vsub.f32 1.0, %v425_v17  ;;  %v576_v25 = vand.u32 2147483647, %v560_v51  ;;  %v591_v26 = vsub.f32 1.0, %v575_v18  ;;  %v411_v29 = vsub.f32 %v4053_v48, %v4180_v33 }
  0x91   :  { %3486 = vmatpush3.bf16.msra.mxu1 %v3485_v8  ;;  %3465 = vmatpush3.bf16.msra.mxu0 %v3464_v16  ;;  %v3488_v30 = vpack.c.bf16 %v606_v9, %v605_v62  ;;  %v456_v52 = vmax.f32 %v440_v21, 0.0  ;;  %v426_v31 = vand.u32 2147483647, %v410_v22  ;;  %v561_v32 = vsub.f32 %v4051_v47, %v4208_v59 }
  0x92   :  { %3487 = vmatprep.subr.bf16.mxu1 %v3903_v1  ;;  %3466 = vmatprep.subr.bf16.mxu0 %v3903_v1  ;;  %v457_v35 = vmax.f32 %v441_v23, 0.0  ;;  %v592_v53 = vsub.f32 1.0, %v576_v25  ;;  %v607_v49 = vmax.f32 %v591_v26, 0.0  ;;  %v427_v54 = vand.u32 2147483647, %v411_v29 }
  0x93   :  { %v442_v56 = vsub.f32 1.0, %v426_v31  ;;  %v562_v57 = vsub.f32 %v4053_v48, %v4208_v59  ;;  %v577_v61 = vand.u32 2147483647, %v561_v32  ;;  %v412_v58 = vsub.f32 %v4058_v50, %v4180_v33 }
  0x94   :  { %v3467_v63 = vpack.c.bf16 %v457_v35, %v456_v52  ;;  %v608_v45 = vmax.f32 %v592_v53, 0.0  ;;  %v443_v0 = vsub.f32 1.0, %v427_v54  ;;  %v413_v2 = vsub.f32 %v4142_v37, %v4180_v33 }
  0x95   :  { %3489 = vmatpush3.bf16.msra.mxu1 %v3488_v30  ;;  %v458_v6 = vmax.f32 %v442_v56, 0.0  ;;  %v578_v55 = vand.u32 2147483647, %v562_v57  ;;  %v593_v10 = vsub.f32 1.0, %v577_v61  ;;  %v428_v11 = vand.u32 2147483647, %v412_v58 }
  0x96   :  { %3490 = vmatprep.subr.bf16.mxu1 %v3903_v1  ;;  %3468 = vmatpush3.bf16.msra.mxu0 %v3467_v63  ;;  %v3491_v8 = vpack.c.bf16 %v608_v45, %v607_v49  ;;  %v459_v12 = vmax.f32 %v443_v0, 0.0  ;;  %v429_v15 = vand.u32 2147483647, %v413_v2  ;;  %v563_v33 = vsub.f32 %v4058_v50, %v4208_v59 }
  0x97   :  { %3469 = vmatprep.subr.bf16.mxu0 %v3903_v1  ;;  %v594_v60 = vsub.f32 1.0, %v578_v55  ;;  %v609_v16 = vmax.f32 %v593_v10, 0.0  ;;  %v444_v17 = vsub.f32 1.0, %v428_v11  ;;  %v564_v51 = vsub.f32 %v4142_v37, %v4208_v59 }
  0x98   :  { %v3470_v18 = vpack.c.bf16 %v459_v12, %v458_v6  ;;  %v445_v62 = vsub.f32 1.0, %v429_v15  ;;  %v579_v9 = vand.u32 2147483647, %v563_v33  ;;  %v695_v21 = vadd.f32 %v694_v39, %v4183_v36 }
  0x99   :  { %3492 = vmatpush3.bf16.msra.mxu1 %v3491_v8  ;;  %v610_v22 = vmax.f32 %v594_v60, 0.0  ;;  %v460_v23 = vmax.f32 %v444_v17, 0.0  ;;  %v580_v25 = vand.u32 2147483647, %v564_v51  ;;  %v844_v26 = vmul.f32 %v843_v46, %v3991_v5 }
  0x9a   :  { %3493 = vmatprep.subr.bf16.mxu1 %v3903_v1  ;;  %3471 = vmatpush3.bf16.msra.mxu0 %v3470_v18  ;;  %v461_v59 = vmax.f32 %v445_v62, 0.0  ;;  %v595_v29 = vsub.f32 1.0, %v579_v9  ;;  %v697_v30 = vmax.f32 %v696_v40, %v695_v21  ;;  %v845_v36 = vstv %s4260_s19  ;;  %s4645_s19 = sld [smem:[#allocation3 + $0xc]] }
  0x9b   :  { %v3494_v39 = vpack.c.bf16 %v610_v22, %v609_v16  ;;  %3472 = vmatprep.subr.bf16.mxu0 %v3903_v1  ;;  %v596_v52 = vsub.f32 1.0, %v580_v25  ;;  %v846_v31 = vadd.f32 %v845_v36, %v844_v26  ;;  %v847_v32 = vstv %s4264_s20  ;;  %s4650_s20 = sld [smem:[#allocation5 + $0xc]] }
  0x9c   :  { %v3473_v35 = vpack.c.bf16 %v461_v59, %v460_v23  ;;  %v611_v53 = vmax.f32 %v595_v29, 0.0  ;;  %v4302_v46 = vmin.f32 %v698_v44, %v697_v30  ;;  %v849_v49 = vstv %s4272_s21  ;;  %s4655_s21 = sld [smem:[#allocation6 + $0xc]] }
  0x9d   :  { %3495 = vmatpush3.bf16.msra.mxu1 %v3494_v39  ;;  %v612_v54 = vmax.f32 %v596_v52, 0.0  ;;  %v848_v56 = vmax.f32 %v847_v32, %v846_v31  ;;  %v994_v57 = vstv %s4278_s23  ;;  %v996_v61 = vstv %s4276_s22  ;;  %s4751_s22 = sld [smem:[#allocation4 + $0xd]] }
  0x9e   :  { %3496 = vmatprep.subr.bf16.mxu1 %v3903_v1  ;;  %3474 = vmatpush3.bf16.msra.mxu0 %v3473_v35  ;;  %v700_v40 = vsub.f32 %v3995_v7, %v4302_v46  ;;  %v701_v58 = vsub.f32 %v4006_v13, %v4302_v46  ;;  %v702_v63 = vsub.f32 %v4008_v14, %v4302_v46  ;;  %v998_v44 = vstv %s4283_s26  ;;  %s4755_s23 = sld [smem:[#allocation3 + $0xd]] }
  0x9f   :  { %v3497_v45 = vpack.c.bf16 %v612_v54, %v611_v53  ;;  %3499 = vmatprep.subr.bf16.mxu0 %v3903_v1  ;;  %v4316_v0 = vmin.f32 %v849_v49, %v848_v56  ;;  %v703_v2 = vsub.f32 %v4014_v19, %v4302_v46  ;;  %v704_v6 = vsub.f32 %v4016_v20, %v4302_v46  ;;  %s4760_s26 = sld [smem:[#allocation5 + $0xd]] }
  0xa0   :  { %v716_v55 = vand.u32 2147483647, %v700_v40  ;;  %v717_v10 = vand.u32 2147483647, %v701_v58  ;;  %v718_v11 = vand.u32 2147483647, %v702_v63  ;;  %v705_v8 = vsub.f32 %v4025_v24, %v4302_v46 }
  0xa1   :  { %3498 = vmatpush3.bf16.msra.mxu1 %v3497_v45  ;;  %2946 = vmatmul.mubr.f32.vlgmr.msra.gmra.mrb[2].mxu0 %v4185_v38  ;;  %v851_v12 = vsub.f32 %v3995_v7, %v4316_v0  ;;  %v852_v15 = vsub.f32 %v4006_v13, %v4316_v0  ;;  %v719_v33 = vand.u32 2147483647, %v703_v2  ;;  %v853_v60 = vsub.f32 %v4008_v14, %v4316_v0 }
  0xa2   :  { %3523 = vmatprep.subr.bf16.mxu1 %v3903_v1  ;;  %v732_v16 = vsub.f32 1.0, %v716_v55  ;;  %v733_v17 = vsub.f32 1.0, %v717_v10  ;;  %v734_v51 = vsub.f32 1.0, %v718_v11  ;;  %v854_v18 = vsub.f32 %v4014_v19, %v4316_v0  ;;  %3015 = vmatprep.mubr.msk.f32.mxu0 %vm3904_vm0, %v3905_v4 }
  0xa3   :  { %v867_v62 = vand.u32 2147483647, %v851_v12  ;;  %v868_v9 = vand.u32 2147483647, %v852_v15  ;;  %v735_v21 = vsub.f32 1.0, %v719_v33  ;;  %v855_v22 = vsub.f32 %v4016_v20, %v4316_v0 }
  0xa4   :  { %2981 = vmatmul.mubr.f32.vlgmr.msra.gmra.mrb[2].mxu1 %v4185_v38  ;;  %v748_v23 = vmax.f32 %v732_v16, 0.0  ;;  %v749_v25 = vmax.f32 %v733_v17, 0.0  ;;  %v750_v26 = vmax.f32 %v734_v51, 0.0  ;;  %v869_v59 = vand.u32 2147483647, %v853_v60 }
  0xa5   :  { %v883_v29 = vsub.f32 1.0, %v867_v62  ;;  %v884_v30 = vsub.f32 1.0, %v868_v9  ;;  %v751_v36 = vmax.f32 %v735_v21, 0.0  ;;  %v870_v39 = vand.u32 2147483647, %v854_v18  ;;  %3050 = vmatprep.mubr.msk.f32.mxu1 %vm3904_vm0, %v3905_v4 }
  0xa6   :  { %v3500_v52 = vpack.c.bf16 %v749_v25, %v748_v23  ;;  %v885_v31 = vsub.f32 1.0, %v869_v59  ;;  %v720_v32 = vand.u32 2147483647, %v704_v6  ;;  %v721_v35 = vand.u32 2147483647, %v705_v8 }
  0xa7   :  { %v899_v53 = vmax.f32 %v883_v29, 0.0  ;;  %v900_v49 = vmax.f32 %v884_v30, 0.0  ;;  %v3503_v54 = vpack.c.bf16 %v751_v36, %v750_v26  ;;  %v886_v56 = vsub.f32 1.0, %v870_v39 }
  0xa8   :  { %3501 = vmatpush3.bf16.msra.mxu0 %v3500_v52  ;;  %v901_v40 = vmax.f32 %v885_v31, 0.0  ;;  %v736_v58 = vsub.f32 1.0, %v720_v32  ;;  %v737_v63 = vsub.f32 1.0, %v721_v35  ;;  %v856_v45 = vsub.f32 %v4025_v24, %v4316_v0 }
  0xa9   :  { %v3524_v2 = vpack.c.bf16 %v900_v49, %v899_v53  ;;  %3502 = vmatprep.subr.bf16.mxu0 %v3903_v1  ;;  %v902_v55 = vmax.f32 %v886_v56, 0.0  ;;  %v871_v10 = vand.u32 2147483647, %v855_v22  ;;  %v706_v6 = vsub.f32 %v4028_v27, %v4302_v46 }
  0xaa   :  { %v752_v11 = vmax.f32 %v736_v58, 0.0  ;;  %v753_v8 = vmax.f32 %v737_v63, 0.0  ;;  %v872_v12 = vand.u32 2147483647, %v856_v45  ;;  %v707_v15 = vsub.f32 %v4030_v28, %v4302_v46 }
  0xab   :  { %3525 = vmatpush3.bf16.msra.mxu1 %v3524_v2  ;;  %v3527_v33 = vpack.c.bf16 %v902_v55, %v901_v40  ;;  %v887_v60 = vsub.f32 1.0, %v871_v10  ;;  %v722_v16 = vand.u32 2147483647, %v706_v6  ;;  %v857_v17 = vsub.f32 %v4028_v27, %v4316_v0 }
  0xac   :  { %3526 = vmatprep.subr.bf16.mxu1 %v3903_v1  ;;  %3504 = vmatpush3.bf16.msra.mxu0 %v3503_v54  ;;  %v3506_v51 = vpack.c.bf16 %v753_v8, %v752_v11  ;;  %v888_v18 = vsub.f32 1.0, %v872_v12  ;;  %v723_v62 = vand.u32 2147483647, %v707_v15  ;;  %v858_v9 = vsub.f32 %v4030_v28, %v4316_v0 }
  0xad   :  { %3505 = vmatprep.subr.bf16.mxu0 %v3903_v1  ;;  %v903_v21 = vmax.f32 %v887_v60, 0.0  ;;  %v738_v22 = vsub.f32 1.0, %v722_v16  ;;  %v873_v23 = vand.u32 2147483647, %v857_v17  ;;  %v708_v25 = vsub.f32 %v4036_v34, %v4302_v46 }
  0xae   :  { %v904_v26 = vmax.f32 %v888_v18, 0.0  ;;  %v739_v59 = vsub.f32 1.0, %v723_v62  ;;  %v874_v29 = vand.u32 2147483647, %v858_v9  ;;  %v709_v30 = vsub.f32 %v4042_v41, %v4302_v46 }
  0xaf   :  { %3528 = vmatpush3.bf16.msra.mxu1 %v3527_v33  ;;  %v754_v36 = vmax.f32 %v738_v22, 0.0  ;;  %v889_v39 = vsub.f32 1.0, %v873_v23  ;;  %v724_v52 = vand.u32 2147483647, %v708_v25  ;;  %v859_v31 = vsub.f32 %v4036_v34, %v4316_v0 }
  0xb0   :  { %3529 = vmatprep.subr.bf16.mxu1 %v3903_v1  ;;  %3507 = vmatpush3.bf16.msra.mxu0 %v3506_v51  ;;  %v3530_v32 = vpack.c.bf16 %v904_v26, %v903_v21  ;;  %v755_v35 = vmax.f32 %v739_v59, 0.0  ;;  %v890_v53 = vsub.f32 1.0, %v874_v29  ;;  %v725_v49 = vand.u32 2147483647, %v709_v30 }
  0xb1   :  { %3508 = vmatprep.subr.bf16.mxu0 %v3903_v1  ;;  %v905_v54 = vmax.f32 %v889_v39, 0.0  ;;  %v740_v56 = vsub.f32 1.0, %v724_v52  ;;  %v860_v40 = vsub.f32 %v4042_v41, %v4316_v0  ;;  %v875_v58 = vand.u32 2147483647, %v859_v31 }
  0xb2   :  { %v3509_v63 = vpack.c.bf16 %v755_v35, %v754_v36  ;;  %v906_v45 = vmax.f32 %v890_v53, 0.0  ;;  %v741_v2 = vsub.f32 1.0, %v725_v49  ;;  %v710_v55 = vsub.f32 %v4044_v42, %v4302_v46 }
  0xb3   :  { %3531 = vmatpush3.bf16.msra.mxu1 %v3530_v32  ;;  %v756_v10 = vmax.f32 %v740_v56, 0.0  ;;  %v876_v6 = vand.u32 2147483647, %v860_v40  ;;  %v891_v11 = vsub.f32 1.0, %v875_v58  ;;  %v711_v8 = vsub.f32 %v4046_v43, %v4302_v46 }
  0xb4   :  { %3532 = vmatprep.subr.bf16.mxu1 %v3903_v1  ;;  %3510 = vmatpush3.bf16.msra.mxu0 %v3509_v63  ;;  %v3533_v12 = vpack.c.bf16 %v906_v45, %v905_v54  ;;  %v757_v15 = vmax.f32 %v741_v2, 0.0  ;;  %v726_v33 = vand.u32 2147483647, %v710_v55  ;;  %v861_v60 = vsub.f32 %v4044_v42, %v4316_v0 }
  0xb5   :  { %3511 = vmatprep.subr.bf16.mxu0 %v3903_v1  ;;  %v892_v16 = vsub.f32 1.0, %v876_v6  ;;  %v907_v17 = vmax.f32 %v891_v11, 0.0  ;;  %v727_v51 = vand.u32 2147483647, %v711_v8  ;;  %v862_v18 = vsub.f32 %v4046_v43, %v4316_v0 }
  0xb6   :  { %v3512_v62 = vpack.c.bf16 %v757_v15, %v756_v10  ;;  %v742_v9 = vsub.f32 1.0, %v726_v33  ;;  %v877_v21 = vand.u32 2147483647, %v861_v60  ;;  %v712_v22 = vsub.f32 %v4051_v47, %v4302_v46 }
  0xb7   :  { %3534 = vmatpush3.bf16.msra.mxu1 %v3533_v12  ;;  %v908_v23 = vmax.f32 %v892_v16, 0.0  ;;  %v743_v25 = vsub.f32 1.0, %v727_v51  ;;  %v878_v26 = vand.u32 2147483647, %v862_v18  ;;  %v713_v59 = vsub.f32 %v4053_v48, %v4302_v46 }
  0xb8   :  { %3535 = vmatprep.subr.bf16.mxu1 %v3903_v1  ;;  %3513 = vmatpush3.bf16.msra.mxu0 %v3512_v62  ;;  %v758_v29 = vmax.f32 %v742_v9, 0.0  ;;  %v893_v30 = vsub.f32 1.0, %v877_v21  ;;  %v728_v36 = vand.u32 2147483647, %v712_v22  ;;  %v863_v39 = vsub.f32 %v4051_v47, %v4316_v0 }
  0xb9   :  { %v3536_v52 = vpack.c.bf16 %v908_v23, %v907_v17  ;;  %3514 = vmatprep.subr.bf16.mxu0 %v3903_v1  ;;  %v759_v31 = vmax.f32 %v743_v25, 0.0  ;;  %v894_v32 = vsub.f32 1.0, %v878_v26  ;;  %v729_v35 = vand.u32 2147483647, %v713_v59 }
  0xba   :  { %v909_v53 = vmax.f32 %v893_v30, 0.0  ;;  %v744_v49 = vsub.f32 1.0, %v728_v36  ;;  %v864_v54 = vsub.f32 %v4053_v48, %v4316_v0  ;;  %v879_v56 = vand.u32 2147483647, %v863_v39 }
  0xbb   :  { %3537 = vmatpush3.bf16.msra.mxu1 %v3536_v52  ;;  %v3515_v40 = vpack.c.bf16 %v759_v31, %v758_v29  ;;  %v910_v58 = vmax.f32 %v894_v32, 0.0  ;;  %v745_v63 = vsub.f32 1.0, %v729_v35  ;;  %v714_v45 = vsub.f32 %v4058_v50, %v4302_v46 }
  0xbc   :  { %3538 = vmatprep.subr.bf16.mxu1 %v3903_v1  ;;  %v760_v2 = vmax.f32 %v744_v49, 0.0  ;;  %v880_v55 = vand.u32 2147483647, %v864_v54  ;;  %v895_v10 = vsub.f32 1.0, %v879_v56  ;;  %v715_v6 = vsub.f32 %v4142_v37, %v4302_v46 }
  0xbd   :  { %3516 = vmatpush3.bf16.msra.mxu0 %v3515_v40  ;;  %v3539_v11 = vpack.c.bf16 %v910_v58, %v909_v53  ;;  %v761_v8 = vmax.f32 %v745_v63, 0.0  ;;  %v730_v12 = vand.u32 2147483647, %v714_v45  ;;  %v865_v15 = vsub.f32 %v4058_v50, %v4316_v0 }
  0xbe   :  { %3517 = vmatprep.subr.bf16.mxu0 %v3903_v1  ;;  %v896_v33 = vsub.f32 1.0, %v880_v55  ;;  %v911_v60 = vmax.f32 %v895_v10, 0.0  ;;  %v731_v16 = vand.u32 2147483647, %v715_v6  ;;  %v866_v46 = vsub.f32 %v4142_v37, %v4316_v0 }
  0xbf   :  { %3540 = vmatpush3.bf16.msra.mxu1 %v3539_v11  ;;  %v3518_v17 = vpack.c.bf16 %v761_v8, %v760_v2  ;;  %v746_v51 = vsub.f32 1.0, %v730_v12  ;;  %v881_v18 = vand.u32 2147483647, %v865_v15  ;;  %v995_v62 = vmul.f32 %v994_v57, %v3991_v5 }
  0xc0   :  { %3541 = vmatprep.subr.bf16.mxu1 %v3903_v1  ;;  %v912_v9 = vmax.f32 %v896_v33, 0.0  ;;  %v747_v21 = vsub.f32 1.0, %v731_v16  ;;  %v882_v22 = vand.u32 2147483647, %v866_v46  ;;  %v1000_v23 = vstv %s4378_s27  ;;  %s4765_s27 = sld [smem:[#allocation6 + $0xd]] }
  0xc1   :  { %3519 = vmatpush3.bf16.msra.mxu0 %v3518_v17  ;;  %v762_v0 = vmax.f32 %v746_v51, 0.0  ;;  %v897_v25 = vsub.f32 1.0, %v881_v18  ;;  %v997_v26 = vadd.f32 %v996_v61, %v995_v62  ;;  %v1145_v59 = vstv %s4386_s29  ;;  %s4773_s29 = sld [smem:[#allocation3 + $0xe]] }
  0xc2   :  { %v3542_v29 = vpack.c.bf16 %v912_v9, %v911_v60  ;;  %3520 = vmatprep.subr.bf16.mxu0 %v3903_v1  ;;  %v763_v57 = vmax.f32 %v747_v21, 0.0  ;;  %v898_v30 = vsub.f32 1.0, %v882_v22  ;;  %v1146_v36 = vmul.f32 %v1145_v59, %v3991_v5 }
  0xc3   :  { %v913_v39 = vmax.f32 %v897_v25, 0.0  ;;  %v999_v52 = vmax.f32 %v998_v44, %v997_v26  ;;  %v1147_v31 = vstv %s4383_s28  ;;  %v1149_v32 = vstv %s4390_s30  ;;  %s4769_s28 = sld [smem:[#allocation4 + $0xe]] }
  0xc4   :  { %3543 = vmatpush3.bf16.msra.mxu1 %v3542_v29  ;;  %v3521_v35 = vpack.c.bf16 %v763_v57, %v762_v0  ;;  %v914_v61 = vmax.f32 %v898_v30, 0.0  ;;  %v1148_v53 = vadd.f32 %v1147_v31, %v1146_v36  ;;  %v1151_v49 = vstv %s4394_s6  ;;  %s4778_s30 = sld [smem:[#allocation5 + $0xe]]  ;;  %s4876_s6 = sld [smem:[#allocation4 + $0xf]] }
  0xc5   :  { %3544 = vmatprep.subr.bf16.mxu1 %v3903_v1  ;;  %v4428_v54 = vmin.f32 %v1000_v23, %v999_v52  ;;  %v1299_v56 = vstv %s4396_s4  ;;  %v1301_v40 = vstv %s4401_s7  ;;  %v1303_v58 = vstv %s4405_s8  ;;  %s4880_s4 = sld [smem:[#allocation6 + $0xe]]  ;;  %s4888_s7 = sld [smem:[#allocation3 + $0xf]] }
  0xc6   :  { %3522 = vmatpush3.bf16.msra.mxu0 %v3521_v35  ;;  %v3545_v63 = vpack.c.bf16 %v914_v61, %v913_v39  ;;  %v1150_v45 = vmax.f32 %v1149_v32, %v1148_v53  ;;  %v4434_v44 = vmul.f32 %v1299_v56, %v3991_v5  ;;  %v1305_v2 = vstv %s4410_s9  ;;  %s4890_s8 = sld [smem:[#allocation5 + $0xf]] }
  0xc7   :  { %3547 = vmatprep.subr.bf16.mxu0 %v3903_v1  ;;  %v1002_v55 = vsub.f32 %v3995_v7, %v4428_v54  ;;  %v1003_v10 = vsub.f32 %v4006_v13, %v4428_v54  ;;  %v1004_v6 = vsub.f32 %v4008_v14, %v4428_v54  ;;  %v1005_v11 = vsub.f32 %v4014_v19, %v4428_v54  ;;  %s4897_s9 = sld [smem:[#allocation6 + $0xf]] }
  0xc8   :  { %3546 = vmatpush3.bf16.msra.mxu1 %v3545_v63  ;;  %v4446_v8 = vmin.f32 %v1151_v49, %v1150_v45  ;;  %v1006_v12 = vsub.f32 %v4016_v20, %v4428_v54  ;;  %v1007_v15 = vsub.f32 %v4025_v24, %v4428_v54  ;;  %v1008_v33 = vsub.f32 %v4028_v27, %v4428_v54 }
  0xc9   :  { %3016 = vmatmul.mubr.f32.vlgmr.msra.gmra.mrb[4].mxu0 %v4185_v38  ;;  %3571 = vmatprep.subr.bf16.mxu1 %v3903_v1  ;;  %v1018_v60 = vand.u32 2147483647, %v1002_v55  ;;  %v1019_v16 = vand.u32 2147483647, %v1003_v10  ;;  %v1020_v46 = vand.u32 2147483647, %v1004_v6  ;;  %v1009_v17 = vsub.f32 %v4030_v28, %v4428_v54 }
  0xca   :  { %v1153_v51 = vsub.f32 %v3995_v7, %v4446_v8  ;;  %v1154_v18 = vsub.f32 %v4006_v13, %v4446_v8  ;;  %v1021_v62 = vand.u32 2147483647, %v1005_v11  ;;  %v1155_v9 = vsub.f32 %v4008_v14, %v4446_v8  ;;  %3085 = vmatprep.mubr.msk.f32.mxu0 %vm3904_vm0, %v3905_v4 }
  0xcb   :  { %3051 = vmatmul.mubr.f32.vlgmr.msra.gmra.mrb[4].mxu1 %v4185_v38  ;;  %v1034_v21 = vsub.f32 1.0, %v1018_v60  ;;  %v1035_v22 = vsub.f32 1.0, %v1019_v16  ;;  %v1036_v23 = vsub.f32 1.0, %v1020_v46  ;;  %v1156_v0 = vsub.f32 %v4014_v19, %v4446_v8 }
  0xcc   :  { %v1169_v25 = vand.u32 2147483647, %v1153_v51  ;;  %v1170_v26 = vand.u32 2147483647, %v1154_v18  ;;  %v1037_v59 = vsub.f32 1.0, %v1021_v62  ;;  %v1157_v29 = vsub.f32 %v4016_v20, %v4446_v8  ;;  %3120 = vmatprep.mubr.msk.f32.mxu1 %vm3904_vm0, %v3905_v4 }
  0xcd   :  { %v1050_v57 = vmax.f32 %v1034_v21, 0.0  ;;  %v1051_v30 = vmax.f32 %v1035_v22, 0.0  ;;  %v1052_v36 = vmax.f32 %v1036_v23, 0.0  ;;  %v1171_v39 = vand.u32 2147483647, %v1155_v9 }
  0xce   :  { %v1185_v38 = vsub.f32 1.0, %v1169_v25  ;;  %v1186_v52 = vsub.f32 1.0, %v1170_v26  ;;  %v1053_v31 = vmax.f32 %v1037_v59, 0.0  ;;  %v1172_v32 = vand.u32 2147483647, %v1156_v0 }
  0xcf   :  { %v3548_v35 = vpack.c.bf16 %v1051_v30, %v1050_v57  ;;  %v1187_v61 = vsub.f32 1.0, %v1171_v39  ;;  %v1022_v53 = vand.u32 2147483647, %v1006_v12  ;;  %v1023_v49 = vand.u32 2147483647, %v1007_v15 }
  0xd0   :  { %v1201_v56 = vmax.f32 %v1185_v38, 0.0  ;;  %v1202_v63 = vmax.f32 %v1186_v52, 0.0  ;;  %v3551_v45 = vpack.c.bf16 %v1053_v31, %v1052_v36  ;;  %v1188_v55 = vsub.f32 1.0, %v1172_v32 }
  0xd1   :  { %3549 = vmatpush3.bf16.msra.mxu0 %v3548_v35  ;;  %v1203_v10 = vmax.f32 %v1187_v61, 0.0  ;;  %v1038_v6 = vsub.f32 1.0, %v1022_v53  ;;  %v1039_v11 = vsub.f32 1.0, %v1023_v49  ;;  %v1158_v60 = vsub.f32 %v4025_v24, %v4446_v8 }
  0xd2   :  { %v3572_v16 = vpack.c.bf16 %v1202_v63, %v1201_v56  ;;  %3550 = vmatprep.subr.bf16.mxu0 %v3903_v1  ;;  %v1204_v46 = vmax.f32 %v1188_v55, 0.0  ;;  %v1173_v51 = vand.u32 2147483647, %v1157_v29  ;;  %v1024_v18 = vand.u32 2147483647, %v1008_v33 }
  0xd3   :  { %v1054_v62 = vmax.f32 %v1038_v6, 0.0  ;;  %v1055_v12 = vmax.f32 %v1039_v11, 0.0  ;;  %v1174_v15 = vand.u32 2147483647, %v1158_v60  ;;  %v1025_v9 = vand.u32 2147483647, %v1009_v17 }
  0xd4   :  { %3573 = vmatpush3.bf16.msra.mxu1 %v3572_v16  ;;  %v3575_v21 = vpack.c.bf16 %v1204_v46, %v1203_v10  ;;  %v1189_v22 = vsub.f32 1.0, %v1173_v51  ;;  %v1040_v23 = vsub.f32 1.0, %v1024_v18  ;;  %v1159_v0 = vsub.f32 %v4028_v27, %v4446_v8 }
  0xd5   :  { %3574 = vmatprep.subr.bf16.mxu1 %v3903_v1  ;;  %3552 = vmatpush3.bf16.msra.mxu0 %v3551_v45  ;;  %v3554_v25 = vpack.c.bf16 %v1055_v12, %v1054_v62  ;;  %v1190_v26 = vsub.f32 1.0, %v1174_v15  ;;  %v1041_v59 = vsub.f32 1.0, %v1025_v9  ;;  %v1160_v33 = vsub.f32 %v4030_v28, %v4446_v8 }
  0xd6   :  { %3553 = vmatprep.subr.bf16.mxu0 %v3903_v1  ;;  %v1205_v29 = vmax.f32 %v1189_v22, 0.0  ;;  %v1056_v17 = vmax.f32 %v1040_v23, 0.0  ;;  %v1175_v57 = vand.u32 2147483647, %v1159_v0  ;;  %v1010_v30 = vsub.f32 %v4036_v34, %v4428_v54 }
  0xd7   :  { %v1206_v36 = vmax.f32 %v1190_v26, 0.0  ;;  %v1057_v39 = vmax.f32 %v1041_v59, 0.0  ;;  %v1176_v38 = vand.u32 2147483647, %v1160_v33  ;;  %v1011_v52 = vsub.f32 %v4042_v41, %v4428_v54 }
  0xd8   :  { %3576 = vmatpush3.bf16.msra.mxu1 %v3575_v21  ;;  %v1191_v31 = vsub.f32 1.0, %v1175_v57  ;;  %v1026_v32 = vand.u32 2147483647, %v1010_v30  ;;  %v1161_v35 = vsub.f32 %v4036_v34, %v4446_v8  ;;  %v1162_v61 = vsub.f32 %v4042_v41, %v4446_v8 }
  0xd9   :  { %3577 = vmatprep.subr.bf16.mxu1 %v3903_v1  ;;  %3555 = vmatpush3.bf16.msra.mxu0 %v3554_v25  ;;  %v3578_v53 = vpack.c.bf16 %v1206_v36, %v1205_v29  ;;  %v3557_v49 = vpack.c.bf16 %v1057_v39, %v1056_v17  ;;  %v1192_v56 = vsub.f32 1.0, %v1176_v38  ;;  %v1027_v63 = vand.u32 2147483647, %v1011_v52 }
  0xda   :  { %3556 = vmatprep.subr.bf16.mxu0 %v3903_v1  ;;  %v1207_v45 = vmax.f32 %v1191_v31, 0.0  ;;  %v1042_v55 = vsub.f32 1.0, %v1026_v32  ;;  %v1177_v10 = vand.u32 2147483647, %v1161_v35  ;;  %v1178_v6 = vand.u32 2147483647, %v1162_v61 }
  0xdb   :  { %v1208_v11 = vmax.f32 %v1192_v56, 0.0  ;;  %v1043_v60 = vsub.f32 1.0, %v1027_v63  ;;  %v1012_v16 = vsub.f32 %v4044_v42, %v4428_v54  ;;  %v1013_v46 = vsub.f32 %v4046_v43, %v4428_v54 }
  0xdc   :  { %3579 = vmatpush3.bf16.msra.mxu1 %v3578_v53  ;;  %v1058_v51 = vmax.f32 %v1042_v55, 0.0  ;;  %v1193_v18 = vsub.f32 1.0, %v1177_v10  ;;  %v1194_v62 = vsub.f32 1.0, %v1178_v6  ;;  %v1163_v12 = vsub.f32 %v4044_v42, %v4446_v8 }
  0xdd   :  { %3580 = vmatprep.subr.bf16.mxu1 %v3903_v1  ;;  %3558 = vmatpush3.bf16.msra.mxu0 %v3557_v49  ;;  %v3581_v15 = vpack.c.bf16 %v1208_v11, %v1207_v45  ;;  %v1059_v9 = vmax.f32 %v1043_v60, 0.0  ;;  %v1028_v21 = vand.u32 2147483647, %v1012_v16  ;;  %v1029_v22 = vand.u32 2147483647, %v1013_v46 }
  0xde   :  { %3559 = vmatprep.subr.bf16.mxu0 %v3903_v1  ;;  %v1209_v23 = vmax.f32 %v1193_v18, 0.0  ;;  %v1210_v0 = vmax.f32 %v1194_v62, 0.0  ;;  %v1164_v25 = vsub.f32 %v4046_v43, %v4446_v8  ;;  %v1179_v26 = vand.u32 2147483647, %v1163_v12 }
  0xdf   :  { %v3560_v59 = vpack.c.bf16 %v1059_v9, %v1058_v51  ;;  %v1044_v33 = vsub.f32 1.0, %v1028_v21  ;;  %v1045_v29 = vsub.f32 1.0, %v1029_v22  ;;  %v1014_v17 = vsub.f32 %v4051_v47, %v4428_v54 }
  0xe0   :  { %3582 = vmatpush3.bf16.msra.mxu1 %v3581_v15  ;;  %v3584_v57 = vpack.c.bf16 %v1210_v0, %v1209_v23  ;;  %v1180_v30 = vand.u32 2147483647, %v1164_v25  ;;  %v1195_v36 = vsub.f32 1.0, %v1179_v26  ;;  %v1015_v39 = vsub.f32 %v4053_v48, %v4428_v54 }
  0xe1   :  { %3583 = vmatprep.subr.bf16.mxu1 %v3903_v1  ;;  %3561 = vmatpush3.bf16.msra.mxu0 %v3560_v59  ;;  %v1060_v38 = vmax.f32 %v1044_v33, 0.0  ;;  %v1061_v52 = vmax.f32 %v1045_v29, 0.0  ;;  %v1030_v31 = vand.u32 2147483647, %v1014_v17  ;;  %v1165_v32 = vsub.f32 %v4051_v47, %v4446_v8 }
  0xe2   :  { %3562 = vmatprep.subr.bf16.mxu0 %v3903_v1  ;;  %v1196_v35 = vsub.f32 1.0, %v1180_v30  ;;  %v1211_v61 = vmax.f32 %v1195_v36, 0.0  ;;  %v1031_v53 = vand.u32 2147483647, %v1015_v39  ;;  %v1166_v49 = vsub.f32 %v4053_v48, %v4446_v8 }
  0xe3   :  { %v3563_v56 = vpack.c.bf16 %v1061_v52, %v1060_v38  ;;  %v1046_v63 = vsub.f32 1.0, %v1030_v31  ;;  %v1181_v45 = vand.u32 2147483647, %v1165_v32  ;;  %v1016_v55 = vsub.f32 %v4058_v50, %v4428_v54 }
  0xe4   :  { %3585 = vmatpush3.bf16.msra.mxu1 %v3584_v57  ;;  %v1212_v10 = vmax.f32 %v1196_v35, 0.0  ;;  %v1047_v6 = vsub.f32 1.0, %v1031_v53  ;;  %v1182_v11 = vand.u32 2147483647, %v1166_v49  ;;  %v1017_v60 = vsub.f32 %v4142_v37, %v4428_v54 }
  0xe5   :  { %3586 = vmatprep.subr.bf16.mxu1 %v3903_v1  ;;  %3564 = vmatpush3.bf16.msra.mxu0 %v3563_v56  ;;  %v1062_v16 = vmax.f32 %v1046_v63, 0.0  ;;  %v1197_v46 = vsub.f32 1.0, %v1181_v45  ;;  %v1032_v51 = vand.u32 2147483647, %v1016_v55  ;;  %v1167_v18 = vsub.f32 %v4058_v50, %v4446_v8 }
  0xe6   :  { %v3587_v62 = vpack.c.bf16 %v1212_v10, %v1211_v61  ;;  %3565 = vmatprep.subr.bf16.mxu0 %v3903_v1  ;;  %v1063_v12 = vmax.f32 %v1047_v6, 0.0  ;;  %v1198_v54 = vsub.f32 1.0, %v1182_v11  ;;  %v1033_v15 = vand.u32 2147483647, %v1017_v60 }
  0xe7   :  { %v1213_v9 = vmax.f32 %v1197_v46, 0.0  ;;  %v1048_v21 = vsub.f32 1.0, %v1032_v51  ;;  %v1168_v22 = vsub.f32 %v4142_v37, %v4446_v8  ;;  %v1183_v23 = vand.u32 2147483647, %v1167_v18 }
  0xe8   :  { %3588 = vmatpush3.bf16.msra.mxu1 %v3587_v62  ;;  %v3566_v0 = vpack.c.bf16 %v1063_v12, %v1062_v16  ;;  %v1214_v25 = vmax.f32 %v1198_v54, 0.0  ;;  %v1049_v26 = vsub.f32 1.0, %v1033_v15  ;;  %v1302_v59 = vadd.f32 %v1301_v40, %v4434_v44  ;;  %v3798_v62 = vld [vmem:[#allocation7] sm:$0xff] }
  0xe9   :  { %3589 = vmatprep.subr.bf16.mxu1 %v3903_v1  ;;  %v1064_v33 = vmax.f32 %v1048_v21, 0.0  ;;  %v1184_v29 = vand.u32 2147483647, %v1168_v22  ;;  %v1199_v17 = vsub.f32 1.0, %v1183_v23  ;;  %v1449_v57 = vstv %s4504_s10  ;;  %s3906_s10 = smov [#allocation10]  }
  0xea   :  { %3567 = vmatpush3.bf16.msra.mxu0 %v3566_v0  ;;  %v3590_v8 = vpack.c.bf16 %v1214_v25, %v1213_v9  ;;  %v1065_v30 = vmax.f32 %v1049_v26, 0.0  ;;  %v1304_v36 = vmax.f32 %v1303_v58, %v1302_v59  ;;  %v1450_v39 = vmul.f32 %v1449_v57, %v3991_v5 }
  0xeb   :  { %3568 = vmatprep.subr.bf16.mxu0 %v3903_v1  ;;  %v1200_v40 = vsub.f32 1.0, %v1184_v29  ;;  %v1215_v44 = vmax.f32 %v1199_v17, 0.0  ;;  %v1451_v38 = vstv %s4508_s0  ;;  %v1453_v52 = vstv %s4513_s11  ;;  %s2499_s0 = sshll.u32 %s3906_s10, 4  ;;  %s2500_s0 = int_to_ptr.vmem [resolvable:$true] %s2499_s0 }
  0xec   :  { %3591 = vmatpush3.bf16.msra.mxu1 %v3590_v8  ;;  %v3569_v31 = vpack.c.bf16 %v1065_v30, %v1064_v33  ;;  %v4549_v32 = vmin.f32 %v1305_v2, %v1304_v36  ;;  %v1452_v35 = vadd.f32 %v1451_v38, %v1450_v39  ;;  %v1455_v61 = vstv %s4518_s12  ;;  %s3868_s11 = scalar_lea.vmem %s2500_s0, 256  ;;  %p3873_p13 = scmp.lt.s32.totalorder %s2500_s0, %s2500_s0 }
  0xed   :  { %3592 = vmatprep.subr.bf16.mxu1 %v3903_v1  ;;  %v1216_v53 = vmax.f32 %v1200_v40, 0.0  ;;  %v1599_v58 = vstv %s4522_s1  ;;  %v1601_v49 = vstv %s4526_s2  ;;  %v1603_v56 = vstv %s4531_s13  ;;  %p3869_p12 = scmp.ne.s32.totalorder %s2500_s0, %s3868_s11  ;;  %p3874_p0 = scmp.lt.s32.totalorder %s3868_s11, %s3868_s11 }
  0xee   :  { %3570 = vmatpush3.bf16.msra.mxu0 %v3569_v31  ;;  %v1307_v63 = vsub.f32 %v3995_v7, %v4549_v32  ;;  %v1308_v45 = vsub.f32 %v4006_v13, %v4549_v32  ;;  %v1454_v55 = vmax.f32 %v1453_v52, %v1452_v35  ;;  %v1309_v2 = vsub.f32 %v4008_v14, %v4549_v32 }
  0xef   :  { %v3593_v10 = vpack.c.bf16 %v1216_v53, %v1215_v44  ;;  %3595 = vmatprep.subr.bf16.mxu0 %v3903_v1  ;;  %v1310_v6 = vsub.f32 %v4014_v19, %v4549_v32  ;;  %v1311_v11 = vsub.f32 %v4016_v20, %v4549_v32  ;;  %v1312_v60 = vsub.f32 %v4025_v24, %v4549_v32  ;;  %p3875_p1 = por %p3874_p0, %p3873_p13 }
  0xf0   :  { %v1323_v16 = vand.u32 2147483647, %v1307_v63  ;;  %v1324_v46 = vand.u32 2147483647, %v1308_v45  ;;  %v4569_v51 = vmin.f32 %v1455_v61, %v1454_v55  ;;  %v1325_v18 = vand.u32 2147483647, %v1309_v2 }
  0xf1   :  { %3594 = vmatpush3.bf16.msra.mxu1 %v3593_v10  ;;  %3086 = vmatmul.mubr.f32.vlgmr.msra.gmra.mrb[6].mxu0 %v3798_v62  ;;  %v1326_v12 = vand.u32 2147483647, %v1310_v6  ;;  %v1327_v54 = vand.u32 2147483647, %v1311_v11  ;;  %v1328_v15 = vand.u32 2147483647, %v1312_v60  ;;  %v1313_v9 = vsub.f32 %v4028_v27, %v4549_v32  ;;  %p3876_p2 = pnand %p3875_p1, %p3869_p12 }
  0xf2   :  { %3619 = vmatprep.subr.bf16.mxu1 %v3903_v1  ;;  %v1339_v21 = vsub.f32 1.0, %v1323_v16  ;;  %v1340_v22 = vsub.f32 1.0, %v1324_v46  ;;  %v1457_v23 = vsub.f32 %v3995_v7, %v4569_v51  ;;  %v1458_v0 = vsub.f32 %v4006_v13, %v4569_v51  ;;  %3155 = vmatprep.mubr.msk.f32.mxu0 %vm3904_vm0, %v3905_v4 }
  0xf3   :  { %v1341_v25 = vsub.f32 1.0, %v1325_v18  ;;  %v1342_v26 = vsub.f32 1.0, %v1326_v12  ;;  %v1459_v59 = vsub.f32 %v4008_v14, %v4569_v51  ;;  %v1460_v33 = vsub.f32 %v4014_v19, %v4569_v51 }
  0xf4   :  { %3121 = vmatmul.mubr.f32.vlgmr.msra.gmra.mrb[6].mxu1 %v3798_v62  ;;  %v1355_v29 = vmax.f32 %v1339_v21, 0.0  ;;  %v1356_v17 = vmax.f32 %v1340_v22, 0.0  ;;  %v1473_v57 = vand.u32 2147483647, %v1457_v23  ;;  %v1474_v8 = vand.u32 2147483647, %v1458_v0 }
  0xf5   :  { %v1357_v30 = vmax.f32 %v1341_v25, 0.0  ;;  %v1358_v36 = vmax.f32 %v1342_v26, 0.0  ;;  %v1475_v39 = vand.u32 2147483647, %v1459_v59  ;;  %v1476_v40 = vand.u32 2147483647, %v1460_v33  ;;  %3190 = vmatprep.mubr.msk.f32.mxu1 %vm3904_vm0, %v3905_v4 }
  0xf6   :  { %v3596_v44 = vpack.c.bf16 %v1356_v17, %v1355_v29  ;;  %v1489_v38 = vsub.f32 1.0, %v1473_v57  ;;  %v1490_v52 = vsub.f32 1.0, %v1474_v8  ;;  %v1343_v31 = vsub.f32 1.0, %v1327_v54 }
  0xf7   :  { %v3599_v35 = vpack.c.bf16 %v1358_v36, %v1357_v30  ;;  %v1491_v61 = vsub.f32 1.0, %v1475_v39  ;;  %v1492_v53 = vsub.f32 1.0, %v1476_v40  ;;  %v1344_v63 = vsub.f32 1.0, %v1328_v15 }
  0xf8   :  { %3597 = vmatpush3.bf16.msra.mxu0 %v3596_v44  ;;  %v1505_v45 = vmax.f32 %v1489_v38, 0.0  ;;  %v1506_v55 = vmax.f32 %v1490_v52, 0.0  ;;  %v1359_v2 = vmax.f32 %v1343_v31, 0.0  ;;  %v1461_v10 = vsub.f32 %v4016_v20, %v4569_v51 }
  0xf9   :  { %3598 = vmatprep.subr.bf16.mxu0 %v3903_v1  ;;  %v1507_v6 = vmax.f32 %v1491_v61, 0.0  ;;  %v1508_v11 = vmax.f32 %v1492_v53, 0.0  ;;  %v1360_v60 = vmax.f32 %v1344_v63, 0.0  ;;  %v1462_v16 = vsub.f32 %v4025_v24, %v4569_v51 }
  0xfa   :  { %v3620_v46 = vpack.c.bf16 %v1506_v55, %v1505_v45  ;;  %v1477_v18 = vand.u32 2147483647, %v1461_v10  ;;  %v1314_v62 = vsub.f32 %v4030_v28, %v4549_v32  ;;  %v1329_v12 = vand.u32 2147483647, %v1313_v9 }
  0xfb   :  { %v3623_v54 = vpack.c.bf16 %v1508_v11, %v1507_v6  ;;  %v3602_v15 = vpack.c.bf16 %v1360_v60, %v1359_v2  ;;  %v1478_v21 = vand.u32 2147483647, %v1462_v16  ;;  %v1463_v22 = vsub.f32 %v4028_v27, %v4569_v51 }
  0xfc   :  { %3621 = vmatpush3.bf16.msra.mxu1 %v3620_v46  ;;  %3600 = vmatpush3.bf16.msra.mxu0 %v3599_v35  ;;  %v1493_v23 = vsub.f32 1.0, %v1477_v18  ;;  %v1330_v0 = vand.u32 2147483647, %v1314_v62  ;;  %v1345_v25 = vsub.f32 1.0, %v1329_v12  ;;  %v1464_v26 = vsub.f32 %v4030_v28, %v4569_v51 }
  0xfd   :  { %3622 = vmatprep.subr.bf16.mxu1 %v3903_v1  ;;  %3601 = vmatprep.subr.bf16.mxu0 %v3903_v1  ;;  %v1494_v59 = vsub.f32 1.0, %v1478_v21  ;;  %v1479_v9 = vand.u32 2147483647, %v1463_v22  ;;  %v1315_v33 = vsub.f32 %v4036_v34, %v4549_v32  ;;  %v1316_v29 = vsub.f32 %v4042_v41, %v4549_v32 }
  0xfe   :  { %v1509_v17 = vmax.f32 %v1493_v23, 0.0  ;;  %v1346_v57 = vsub.f32 1.0, %v1330_v0  ;;  %v1361_v8 = vmax.f32 %v1345_v25, 0.0  ;;  %v1480_v30 = vand.u32 2147483647, %v1464_v26 }
  0xff   :  { %v1510_v36 = vmax.f32 %v1494_v59, 0.0  ;;  %v1495_v39 = vsub.f32 1.0, %v1479_v9  ;;  %v1331_v40 = vand.u32 2147483647, %v1315_v33  ;;  %v1332_v44 = vand.u32 2147483647, %v1316_v29 }
 0x100   :  { %3624 = vmatpush3.bf16.msra.mxu1 %v3623_v54  ;;  %3603 = vmatpush3.bf16.msra.mxu0 %v3602_v15  ;;  %v1362_v38 = vmax.f32 %v1346_v57, 0.0  ;;  %v1496_v52 = vsub.f32 1.0, %v1480_v30  ;;  %v1465_v31 = vsub.f32 %v4036_v34, %v4569_v51  ;;  %v1466_v35 = vsub.f32 %v4042_v41, %v4569_v51 }
 0x101   :  { %3625 = vmatprep.subr.bf16.mxu1 %v3903_v1  ;;  %v3626_v61 = vpack.c.bf16 %v1510_v36, %v1509_v17  ;;  %3604 = vmatprep.subr.bf16.mxu0 %v3903_v1  ;;  %v1511_v53 = vmax.f32 %v1495_v39, 0.0  ;;  %v1347_v63 = vsub.f32 1.0, %v1331_v40  ;;  %v1348_v45 = vsub.f32 1.0, %v1332_v44 }
 0x102   :  { %v3605_v55 = vpack.c.bf16 %v1362_v38, %v1361_v8  ;;  %v1512_v2 = vmax.f32 %v1496_v52, 0.0  ;;  %v1481_v10 = vand.u32 2147483647, %v1465_v31  ;;  %v1482_v6 = vand.u32 2147483647, %v1466_v35 }
 0x103   :  { %v1363_v11 = vmax.f32 %v1347_v63, 0.0  ;;  %v1364_v60 = vmax.f32 %v1348_v45, 0.0  ;;  %v1317_v16 = vsub.f32 %v4044_v42, %v4549_v32  ;;  %v1318_v46 = vsub.f32 %v4046_v43, %v4549_v32 }
 0x104   :  { %3627 = vmatpush3.bf16.msra.mxu1 %v3626_v61  ;;  %3606 = vmatpush3.bf16.msra.mxu0 %v3605_v55  ;;  %v3629_v18 = vpack.c.bf16 %v1512_v2, %v1511_v53  ;;  %v1497_v62 = vsub.f32 1.0, %v1481_v10  ;;  %v1498_v12 = vsub.f32 1.0, %v1482_v6  ;;  %v1467_v54 = vsub.f32 %v4044_v42, %v4569_v51 }
 0x105   :  { %3628 = vmatprep.subr.bf16.mxu1 %v3903_v1  ;;  %3607 = vmatprep.subr.bf16.mxu0 %v3903_v1  ;;  %v3608_v15 = vpack.c.bf16 %v1364_v60, %v1363_v11  ;;  %v1333_v21 = vand.u32 2147483647, %v1317_v16  ;;  %v1334_v22 = vand.u32 2147483647, %v1318_v46  ;;  %v1468_v23 = vsub.f32 %v4046_v43, %v4569_v51 }
 0x106   :  { %v1513_v0 = vmax.f32 %v1497_v62, 0.0  ;;  %v1514_v25 = vmax.f32 %v1498_v12, 0.0  ;;  %v1483_v26 = vand.u32 2147483647, %v1467_v54  ;;  %v1319_v59 = vsub.f32 %v4051_v47, %v4549_v32 }
 0x107   :  { %v1349_v9 = vsub.f32 1.0, %v1333_v21  ;;  %v1350_v33 = vsub.f32 1.0, %v1334_v22  ;;  %v1484_v29 = vand.u32 2147483647, %v1468_v23  ;;  %v1320_v17 = vsub.f32 %v4053_v48, %v4549_v32 }
 0x108   :  { %3630 = vmatpush3.bf16.msra.mxu1 %v3629_v18  ;;  %3609 = vmatpush3.bf16.msra.mxu0 %v3608_v15  ;;  %v3632_v57 = vpack.c.bf16 %v1514_v25, %v1513_v0  ;;  %v1499_v8 = vsub.f32 1.0, %v1483_v26  ;;  %v1335_v30 = vand.u32 2147483647, %v1319_v59  ;;  %v1469_v36 = vsub.f32 %v4051_v47, %v4569_v51 }
 0x109   :  { %3631 = vmatprep.subr.bf16.mxu1 %v3903_v1  ;;  %3610 = vmatprep.subr.bf16.mxu0 %v3903_v1  ;;  %v1365_v39 = vmax.f32 %v1349_v9, 0.0  ;;  %v1366_v40 = vmax.f32 %v1350_v33, 0.0  ;;  %v1500_v44 = vsub.f32 1.0, %v1484_v29  ;;  %v1336_v38 = vand.u32 2147483647, %v1320_v17 }
 0x10a   :  { %v1515_v52 = vmax.f32 %v1499_v8, 0.0  ;;  %v1351_v31 = vsub.f32 1.0, %v1335_v30  ;;  %v1470_v35 = vsub.f32 %v4053_v48, %v4569_v51  ;;  %v1485_v61 = vand.u32 2147483647, %v1469_v36 }
 0x10b   :  { %v3611_v53 = vpack.c.bf16 %v1366_v40, %v1365_v39  ;;  %v1516_v63 = vmax.f32 %v1500_v44, 0.0  ;;  %v1352_v45 = vsub.f32 1.0, %v1336_v38  ;;  %v1321_v55 = vsub.f32 %v4058_v50, %v4549_v32 }
 0x10c   :  { %3633 = vmatpush3.bf16.msra.mxu1 %v3632_v57  ;;  %v1367_v2 = vmax.f32 %v1351_v31, 0.0  ;;  %v1486_v10 = vand.u32 2147483647, %v1470_v35  ;;  %v1501_v6 = vsub.f32 1.0, %v1485_v61  ;;  %v1322_v11 = vsub.f32 %v4142_v37, %v4549_v32 }
 0x10d   :  { %3634 = vmatprep.subr.bf16.mxu1 %v3903_v1  ;;  %3612 = vmatpush3.bf16.msra.mxu0 %v3611_v53  ;;  %v3635_v60 = vpack.c.bf16 %v1516_v63, %v1515_v52  ;;  %v1368_v16 = vmax.f32 %v1352_v45, 0.0  ;;  %v1337_v46 = vand.u32 2147483647, %v1321_v55  ;;  %v1471_v18 = vsub.f32 %v4058_v50, %v4569_v51  ;;  %v4678_v45 = vld [vmem:[#allocation7 + $0x8] sm:$0xff] }
 0x10e   :  { %3613 = vmatprep.subr.bf16.mxu0 %v3903_v1  ;;  %v1502_v62 = vsub.f32 1.0, %v1486_v10  ;;  %v1517_v12 = vmax.f32 %v1501_v6, 0.0  ;;  %v1338_v32 = vand.u32 2147483647, %v1322_v11  ;;  %v1472_v54 = vsub.f32 %v4142_v37, %v4569_v51 }
 0x10f   :  { %v3614_v15 = vpack.c.bf16 %v1368_v16, %v1367_v2  ;;  %v1353_v21 = vsub.f32 1.0, %v1337_v46  ;;  %v1487_v22 = vand.u32 2147483647, %v1471_v18  ;;  %v1600_v23 = vmul.f32 %v1599_v58, %v3991_v5 }
 0x110   :  { %3636 = vmatpush3.bf16.msra.mxu1 %v3635_v60  ;;  %v1518_v0 = vmax.f32 %v1502_v62, 0.0  ;;  %v1354_v25 = vsub.f32 1.0, %v1338_v32  ;;  %v1488_v26 = vand.u32 2147483647, %v1472_v54  ;;  %v1605_v59 = vstv %s4621_s14 }
 0x111   :  { %3637 = vmatprep.subr.bf16.mxu1 %v3903_v1  ;;  %3615 = vmatpush3.bf16.msra.mxu0 %v3614_v15  ;;  %v1369_v51 = vmax.f32 %v1353_v21, 0.0  ;;  %v1503_v9 = vsub.f32 1.0, %v1487_v22  ;;  %v1602_v33 = vadd.f32 %v1601_v49, %v1600_v23  ;;  %v1749_v29 = vstv %s4629_s15 }
 0x112   :  { %v3638_v17 = vpack.c.bf16 %v1518_v0, %v1517_v12  ;;  %3616 = vmatprep.subr.bf16.mxu0 %v3903_v1  ;;  %v1370_v58 = vmax.f32 %v1354_v25, 0.0  ;;  %v1504_v57 = vsub.f32 1.0, %v1488_v26  ;;  %v1750_v8 = vmul.f32 %v1749_v29, %v3991_v5 }
 0x113   :  { %v1519_v30 = vmax.f32 %v1503_v9, 0.0  ;;  %v1604_v36 = vmax.f32 %v1603_v56, %v1602_v33  ;;  %v1751_v39 = vstv %s4625_s3  ;;  %v1753_v40 = vstv %s4635_s16 }
 0x114   :  { %3639 = vmatpush3.bf16.msra.mxu1 %v3638_v17  ;;  %v3617_v44 = vpack.c.bf16 %v1370_v58, %v1369_v51  ;;  %v1520_v49 = vmax.f32 %v1504_v57, 0.0  ;;  %v1752_v38 = vadd.f32 %v1751_v39, %v1750_v8  ;;  %v1755_v52 = vstv %s4639_s17 }
 0x115   :  { %3640 = vmatprep.subr.bf16.mxu1 %v3903_v1  ;;  %v4673_v31 = vmin.f32 %v1605_v59, %v1604_v36  ;;  %v1899_v35 = vstv %s4641_s18  ;;  %v1901_v61 = vstv %s4645_s19  ;;  %v1903_v53 = vstv %s4650_s20 }
 0x116   :  { %3618 = vmatpush3.bf16.msra.mxu0 %v3617_v44  ;;  %v3641_v63 = vpack.c.bf16 %v1520_v49, %v1519_v30  ;;  %v1754_v56 = vmax.f32 %v1753_v40, %v1752_v38  ;;  %v4681_v55 = vmul.f32 %v1899_v35, %v3991_v5  ;;  %v1905_v2 = vstv %s4655_s21 }
 0x117   :  { %3643 = vmatprep.subr.bf16.mxu0 %v3903_v1  ;;  %v1607_v10 = vsub.f32 %v3995_v7, %v4673_v31  ;;  %v1608_v6 = vsub.f32 %v4006_v13, %v4673_v31  ;;  %v1609_v11 = vsub.f32 %v4008_v14, %v4673_v31  ;;  %v1610_v60 = vsub.f32 %v4014_v19, %v4673_v31 }
 0x118   :  { %3642 = vmatpush3.bf16.msra.mxu1 %v3641_v63  ;;  %v4693_v16 = vmin.f32 %v1755_v52, %v1754_v56  ;;  %v1611_v46 = vsub.f32 %v4016_v20, %v4673_v31  ;;  %v1612_v18 = vsub.f32 %v4025_v24, %v4673_v31  ;;  %v1613_v62 = vsub.f32 %v4028_v27, %v4673_v31 }
 0x119   :  { %3156 = vmatmul.mubr.f32.vlgmr.msra.gmra.mrb[8].mxu0 %v4678_v45  ;;  %3667 = vmatprep.subr.bf16.mxu1 %v3903_v1  ;;  %v1623_v12 = vand.u32 2147483647, %v1607_v10  ;;  %v1624_v32 = vand.u32 2147483647, %v1608_v6  ;;  %v1625_v54 = vand.u32 2147483647, %v1609_v11  ;;  %v1614_v15 = vsub.f32 %v4030_v28, %v4673_v31 }
 0x11a   :  { %v1757_v21 = vsub.f32 %v3995_v7, %v4693_v16  ;;  %v1758_v22 = vsub.f32 %v4006_v13, %v4693_v16  ;;  %v1626_v23 = vand.u32 2147483647, %v1610_v60  ;;  %v1759_v0 = vsub.f32 %v4008_v14, %v4693_v16  ;;  %3225 = vmatprep.mubr.msk.f32.mxu0 %vm3904_vm0, %v3905_v4 }
 0x11b   :  { %3191 = vmatmul.mubr.f32.vlgmr.msra.gmra.mrb[8].mxu1 %v4678_v45  ;;  %v1639_v25 = vsub.f32 1.0, %v1623_v12  ;;  %v1640_v26 = vsub.f32 1.0, %v1624_v32  ;;  %v1641_v59 = vsub.f32 1.0, %v1625_v54  ;;  %v1760_v51 = vsub.f32 %v4014_v19, %v4693_v16 }
 0x11c   :  { %v1773_v9 = vand.u32 2147483647, %v1757_v21  ;;  %v1774_v33 = vand.u32 2147483647, %v1758_v22  ;;  %v1642_v29 = vsub.f32 1.0, %v1626_v23  ;;  %v1761_v17 = vsub.f32 %v4016_v20, %v4693_v16  ;;  %3260 = vmatprep.mubr.msk.f32.mxu1 %vm3904_vm0, %v3905_v4 }
 0x11d   :  { %v1655_v58 = vmax.f32 %v1639_v25, 0.0  ;;  %v1656_v57 = vmax.f32 %v1640_v26, 0.0  ;;  %v1657_v8 = vmax.f32 %v1641_v59, 0.0  ;;  %v1775_v30 = vand.u32 2147483647, %v1759_v0 }
 0x11e   :  { %v1789_v36 = vsub.f32 1.0, %v1773_v9  ;;  %v1790_v39 = vsub.f32 1.0, %v1774_v33  ;;  %v1658_v40 = vmax.f32 %v1642_v29, 0.0  ;;  %v1776_v44 = vand.u32 2147483647, %v1760_v51 }
 0x11f   :  { %v3644_v49 = vpack.c.bf16 %v1656_v57, %v1655_v58  ;;  %v1791_v38 = vsub.f32 1.0, %v1775_v30  ;;  %v1627_v52 = vand.u32 2147483647, %v1611_v46  ;;  %v1628_v35 = vand.u32 2147483647, %v1612_v18 }
 0x120   :  { %v1805_v63 = vmax.f32 %v1789_v36, 0.0  ;;  %v1806_v56 = vmax.f32 %v1790_v39, 0.0  ;;  %v3647_v10 = vpack.c.bf16 %v1658_v40, %v1657_v8  ;;  %v1792_v6 = vsub.f32 1.0, %v1776_v44 }
 0x121   :  { %3645 = vmatpush3.bf16.msra.mxu0 %v3644_v49  ;;  %v1807_v11 = vmax.f32 %v1791_v38, 0.0  ;;  %v1643_v60 = vsub.f32 1.0, %v1627_v52  ;;  %v1644_v12 = vsub.f32 1.0, %v1628_v35  ;;  %v1762_v32 = vsub.f32 %v4025_v24, %v4693_v16 }
 0x122   :  { %v3668_v54 = vpack.c.bf16 %v1806_v56, %v1805_v63  ;;  %3646 = vmatprep.subr.bf16.mxu0 %v3903_v1  ;;  %v1808_v21 = vmax.f32 %v1792_v6, 0.0  ;;  %v1777_v22 = vand.u32 2147483647, %v1761_v17  ;;  %v1629_v23 = vand.u32 2147483647, %v1613_v62 }
 0x123   :  { %v1659_v0 = vmax.f32 %v1643_v60, 0.0  ;;  %v1660_v46 = vmax.f32 %v1644_v12, 0.0  ;;  %v1778_v18 = vand.u32 2147483647, %v1762_v32  ;;  %v1630_v25 = vand.u32 2147483647, %v1614_v15 }
 0x124   :  { %3669 = vmatpush3.bf16.msra.mxu1 %v3668_v54  ;;  %v3671_v26 = vpack.c.bf16 %v1808_v21, %v1807_v11  ;;  %v1793_v59 = vsub.f32 1.0, %v1777_v22  ;;  %v1645_v51 = vsub.f32 1.0, %v1629_v23  ;;  %v1763_v9 = vsub.f32 %v4028_v27, %v4693_v16 }
 0x125   :  { %3670 = vmatprep.subr.bf16.mxu1 %v3903_v1  ;;  %3648 = vmatpush3.bf16.msra.mxu0 %v3647_v10  ;;  %v3650_v33 = vpack.c.bf16 %v1660_v46, %v1659_v0  ;;  %v1794_v29 = vsub.f32 1.0, %v1778_v18  ;;  %v1646_v58 = vsub.f32 1.0, %v1630_v25  ;;  %v1764_v62 = vsub.f32 %v4030_v28, %v4693_v16 }
 0x126   :  { %3649 = vmatprep.subr.bf16.mxu0 %v3903_v1  ;;  %v1809_v17 = vmax.f32 %v1793_v59, 0.0  ;;  %v1661_v15 = vmax.f32 %v1645_v51, 0.0  ;;  %v1779_v57 = vand.u32 2147483647, %v1763_v9  ;;  %v1615_v8 = vsub.f32 %v4036_v34, %v4673_v31 }
 0x127   :  { %v1810_v30 = vmax.f32 %v1794_v29, 0.0  ;;  %v1662_v36 = vmax.f32 %v1646_v58, 0.0  ;;  %v1780_v39 = vand.u32 2147483647, %v1764_v62  ;;  %v1616_v40 = vsub.f32 %v4042_v41, %v4673_v31 }
 0x128   :  { %3672 = vmatpush3.bf16.msra.mxu1 %v3671_v26  ;;  %v1795_v44 = vsub.f32 1.0, %v1779_v57  ;;  %v1631_v49 = vand.u32 2147483647, %v1615_v8  ;;  %v1765_v38 = vsub.f32 %v4036_v34, %v4693_v16  ;;  %v1766_v52 = vsub.f32 %v4042_v41, %v4693_v16 }
 0x129   :  { %3673 = vmatprep.subr.bf16.mxu1 %v3903_v1  ;;  %3651 = vmatpush3.bf16.msra.mxu0 %v3650_v33  ;;  %v3674_v35 = vpack.c.bf16 %v1810_v30, %v1809_v17  ;;  %v3653_v63 = vpack.c.bf16 %v1662_v36, %v1661_v15  ;;  %v1796_v56 = vsub.f32 1.0, %v1780_v39  ;;  %v1632_v10 = vand.u32 2147483647, %v1616_v40 }
 0x12a   :  { %3652 = vmatprep.subr.bf16.mxu0 %v3903_v1  ;;  %v1811_v6 = vmax.f32 %v1795_v44, 0.0  ;;  %v1647_v11 = vsub.f32 1.0, %v1631_v49  ;;  %v1781_v60 = vand.u32 2147483647, %v1765_v38  ;;  %v1782_v12 = vand.u32 2147483647, %v1766_v52 }
 0x12b   :  { %v1812_v32 = vmax.f32 %v1796_v56, 0.0  ;;  %v1648_v54 = vsub.f32 1.0, %v1632_v10  ;;  %v1617_v21 = vsub.f32 %v4044_v42, %v4673_v31  ;;  %v1618_v22 = vsub.f32 %v4046_v43, %v4673_v31 }
 0x12c   :  { %3675 = vmatpush3.bf16.msra.mxu1 %v3674_v35  ;;  %v1663_v23 = vmax.f32 %v1647_v11, 0.0  ;;  %v1797_v0 = vsub.f32 1.0, %v1781_v60  ;;  %v1798_v46 = vsub.f32 1.0, %v1782_v12  ;;  %v1767_v18 = vsub.f32 %v4044_v42, %v4693_v16 }
 0x12d   :  { %3676 = vmatprep.subr.bf16.mxu1 %v3903_v1  ;;  %3654 = vmatpush3.bf16.msra.mxu0 %v3653_v63  ;;  %v3677_v25 = vpack.c.bf16 %v1812_v32, %v1811_v6  ;;  %v1664_v26 = vmax.f32 %v1648_v54, 0.0  ;;  %v1633_v59 = vand.u32 2147483647, %v1617_v21  ;;  %v1634_v51 = vand.u32 2147483647, %v1618_v22 }
 0x12e   :  { %3655 = vmatprep.subr.bf16.mxu0 %v3903_v1  ;;  %v1813_v9 = vmax.f32 %v1797_v0, 0.0  ;;  %v1814_v33 = vmax.f32 %v1798_v46, 0.0  ;;  %v1768_v29 = vsub.f32 %v4046_v43, %v4693_v16  ;;  %v1783_v58 = vand.u32 2147483647, %v1767_v18 }
 0x12f   :  { %v3656_v62 = vpack.c.bf16 %v1664_v26, %v1663_v23  ;;  %v1649_v17 = vsub.f32 1.0, %v1633_v59  ;;  %v1650_v15 = vsub.f32 1.0, %v1634_v51  ;;  %v1619_v57 = vsub.f32 %v4051_v47, %v4673_v31 }
 0x130   :  { %3678 = vmatpush3.bf16.msra.mxu1 %v3677_v25  ;;  %v3680_v8 = vpack.c.bf16 %v1814_v33, %v1813_v9  ;;  %v1784_v30 = vand.u32 2147483647, %v1768_v29  ;;  %v1799_v36 = vsub.f32 1.0, %v1783_v58  ;;  %v1620_v39 = vsub.f32 %v4053_v48, %v4673_v31 }
 0x131   :  { %3679 = vmatprep.subr.bf16.mxu1 %v3903_v1  ;;  %3657 = vmatpush3.bf16.msra.mxu0 %v3656_v62  ;;  %v1665_v40 = vmax.f32 %v1649_v17, 0.0  ;;  %v1666_v44 = vmax.f32 %v1650_v15, 0.0  ;;  %v1635_v49 = vand.u32 2147483647, %v1619_v57  ;;  %v1769_v38 = vsub.f32 %v4051_v47, %v4693_v16 }
 0x132   :  { %3658 = vmatprep.subr.bf16.mxu0 %v3903_v1  ;;  %v1800_v52 = vsub.f32 1.0, %v1784_v30  ;;  %v1815_v35 = vmax.f32 %v1799_v36, 0.0  ;;  %v1636_v63 = vand.u32 2147483647, %v1620_v39  ;;  %v1770_v56 = vsub.f32 %v4053_v48, %v4693_v16 }
 0x133   :  { %v3659_v10 = vpack.c.bf16 %v1666_v44, %v1665_v40  ;;  %v1651_v6 = vsub.f32 1.0, %v1635_v49  ;;  %v1785_v11 = vand.u32 2147483647, %v1769_v38  ;;  %v1621_v60 = vsub.f32 %v4058_v50, %v4673_v31 }
 0x134   :  { %3681 = vmatpush3.bf16.msra.mxu1 %v3680_v8  ;;  %v1816_v12 = vmax.f32 %v1800_v52, 0.0  ;;  %v1652_v32 = vsub.f32 1.0, %v1636_v63  ;;  %v1786_v54 = vand.u32 2147483647, %v1770_v56  ;;  %v1622_v21 = vsub.f32 %v4142_v37, %v4673_v31 }
 0x135   :  { %3682 = vmatprep.subr.bf16.mxu1 %v3903_v1  ;;  %3660 = vmatpush3.bf16.msra.mxu0 %v3659_v10  ;;  %v1667_v22 = vmax.f32 %v1651_v6, 0.0  ;;  %v1801_v23 = vsub.f32 1.0, %v1785_v11  ;;  %v1637_v0 = vand.u32 2147483647, %v1621_v60  ;;  %v1771_v46 = vsub.f32 %v4058_v50, %v4693_v16 }
 0x136   :  { %v3683_v18 = vpack.c.bf16 %v1816_v12, %v1815_v35  ;;  %3661 = vmatprep.subr.bf16.mxu0 %v3903_v1  ;;  %v1668_v25 = vmax.f32 %v1652_v32, 0.0  ;;  %v1802_v31 = vsub.f32 1.0, %v1786_v54  ;;  %v1638_v26 = vand.u32 2147483647, %v1622_v21 }
 0x137   :  { %v1817_v59 = vmax.f32 %v1801_v23, 0.0  ;;  %v1653_v51 = vsub.f32 1.0, %v1637_v0  ;;  %v1772_v9 = vsub.f32 %v4142_v37, %v4693_v16  ;;  %v1787_v33 = vand.u32 2147483647, %v1771_v46 }
 0x138   :  { %3684 = vmatpush3.bf16.msra.mxu1 %v3683_v18  ;;  %v3662_v29 = vpack.c.bf16 %v1668_v25, %v1667_v22  ;;  %v1818_v58 = vmax.f32 %v1802_v31, 0.0  ;;  %v1654_v62 = vsub.f32 1.0, %v1638_v26  ;;  %v1902_v17 = vadd.f32 %v1901_v61, %v4681_v55 }
 0x139   :  { %3685 = vmatprep.subr.bf16.mxu1 %v3903_v1  ;;  %v1669_v15 = vmax.f32 %v1653_v51, 0.0  ;;  %v1788_v57 = vand.u32 2147483647, %v1772_v9  ;;  %v1803_v8 = vsub.f32 1.0, %v1787_v33  ;;  %v2049_v30 = vstv %s4751_s22 }
 0x13a   :  { %3663 = vmatpush3.bf16.msra.mxu0 %v3662_v29  ;;  %v3686_v16 = vpack.c.bf16 %v1818_v58, %v1817_v59  ;;  %v1670_v36 = vmax.f32 %v1654_v62, 0.0  ;;  %v1904_v39 = vmax.f32 %v1903_v53, %v1902_v17  ;;  %v2050_v40 = vmul.f32 %v2049_v30, %v3991_v5 }
 0x13b   :  { %3664 = vmatprep.subr.bf16.mxu0 %v3903_v1  ;;  %v1804_v61 = vsub.f32 1.0, %v1788_v57  ;;  %v1819_v55 = vmax.f32 %v1803_v8, 0.0  ;;  %v2051_v44 = vstv %s4755_s23  ;;  %v2053_v49 = vstv %s4760_s26 }
 0x13c   :  { %3687 = vmatpush3.bf16.msra.mxu1 %v3686_v16  ;;  %v3665_v38 = vpack.c.bf16 %v1670_v36, %v1669_v15  ;;  %v4796_v52 = vmin.f32 %v1905_v2, %v1904_v39  ;;  %v2052_v35 = vadd.f32 %v2051_v44, %v2050_v40  ;;  %v2055_v63 = vstv %s4765_s27 }
 0x13d   :  { %3688 = vmatprep.subr.bf16.mxu1 %v3903_v1  ;;  %v1820_v56 = vmax.f32 %v1804_v61, 0.0  ;;  %v2199_v53 = vstv %s4769_s28  ;;  %v2201_v10 = vstv %s4773_s29  ;;  %v2203_v6 = vstv %s4778_s30 }
 0x13e   :  { %3666 = vmatpush3.bf16.msra.mxu0 %v3665_v38  ;;  %v1907_v11 = vsub.f32 %v3995_v7, %v4796_v52  ;;  %v1908_v60 = vsub.f32 %v4006_v13, %v4796_v52  ;;  %v2054_v12 = vmax.f32 %v2053_v49, %v2052_v35  ;;  %v1909_v2 = vsub.f32 %v4008_v14, %v4796_v52 }
 0x13f   :  { %v3689_v32 = vpack.c.bf16 %v1820_v56, %v1819_v55  ;;  %3691 = vmatprep.subr.bf16.mxu0 %v3903_v1  ;;  %v1910_v54 = vsub.f32 %v4014_v19, %v4796_v52  ;;  %v1911_v21 = vsub.f32 %v4016_v20, %v4796_v52  ;;  %v1912_v22 = vsub.f32 %v4025_v24, %v4796_v52 }
 0x140   :  { %v1923_v23 = vand.u32 2147483647, %v1907_v11  ;;  %v1924_v0 = vand.u32 2147483647, %v1908_v60  ;;  %v4816_v46 = vmin.f32 %v2055_v63, %v2054_v12  ;;  %v1925_v18 = vand.u32 2147483647, %v1909_v2 }
 0x141   :  { %3690 = vmatpush3.bf16.msra.mxu1 %v3689_v32  ;;  %3226 = vmatmul.mubr.f32.vlgmr.msra.gmra.mrb[10].mxu0 %v4678_v45  ;;  %v1926_v25 = vand.u32 2147483647, %v1910_v54  ;;  %v1927_v31 = vand.u32 2147483647, %v1911_v21  ;;  %v1928_v26 = vand.u32 2147483647, %v1912_v22  ;;  %v1913_v59 = vsub.f32 %v4028_v27, %v4796_v52 }
 0x142   :  { %3715 = vmatprep.subr.bf16.mxu1 %v3903_v1  ;;  %v1939_v51 = vsub.f32 1.0, %v1923_v23  ;;  %v1940_v9 = vsub.f32 1.0, %v1924_v0  ;;  %v2057_v33 = vsub.f32 %v3995_v7, %v4816_v46  ;;  %v2058_v29 = vsub.f32 %v4006_v13, %v4816_v46  ;;  %3295 = vmatprep.mubr.msk.f32.mxu0 %vm3904_vm0, %v3905_v4 }
 0x143   :  { %v1941_v58 = vsub.f32 1.0, %v1925_v18  ;;  %v1942_v62 = vsub.f32 1.0, %v1926_v25  ;;  %v2059_v17 = vsub.f32 %v4008_v14, %v4816_v46  ;;  %v2060_v15 = vsub.f32 %v4014_v19, %v4816_v46 }
 0x144   :  { %3261 = vmatmul.mubr.f32.vlgmr.msra.gmra.mrb[10].mxu1 %v4678_v45  ;;  %v1955_v57 = vmax.f32 %v1939_v51, 0.0  ;;  %v1956_v8 = vmax.f32 %v1940_v9, 0.0  ;;  %v2073_v30 = vand.u32 2147483647, %v2057_v33  ;;  %v2074_v16 = vand.u32 2147483647, %v2058_v29 }
 0x145   :  { %v1957_v36 = vmax.f32 %v1941_v58, 0.0  ;;  %v1958_v39 = vmax.f32 %v1942_v62, 0.0  ;;  %v2075_v40 = vand.u32 2147483647, %v2059_v17  ;;  %v2076_v61 = vand.u32 2147483647, %v2060_v15  ;;  %3330 = vmatprep.mubr.msk.f32.mxu1 %vm3904_vm0, %v3905_v4 }
 0x146   :  { %v3692_v55 = vpack.c.bf16 %v1956_v8, %v1955_v57  ;;  %v2089_v44 = vsub.f32 1.0, %v2073_v30  ;;  %v2090_v49 = vsub.f32 1.0, %v2074_v16  ;;  %v1943_v38 = vsub.f32 1.0, %v1927_v31 }
 0x147   :  { %v3695_v35 = vpack.c.bf16 %v1958_v39, %v1957_v36  ;;  %v2091_v63 = vsub.f32 1.0, %v2075_v40  ;;  %v2092_v56 = vsub.f32 1.0, %v2076_v61  ;;  %v1944_v11 = vsub.f32 1.0, %v1928_v26 }
 0x148   :  { %3693 = vmatpush3.bf16.msra.mxu0 %v3692_v55  ;;  %v2105_v60 = vmax.f32 %v2089_v44, 0.0  ;;  %v2106_v12 = vmax.f32 %v2090_v49, 0.0  ;;  %v1959_v2 = vmax.f32 %v1943_v38, 0.0  ;;  %v2061_v32 = vsub.f32 %v4016_v20, %v4816_v46 }
 0x149   :  { %3694 = vmatprep.subr.bf16.mxu0 %v3903_v1  ;;  %v2107_v54 = vmax.f32 %v2091_v63, 0.0  ;;  %v2108_v21 = vmax.f32 %v2092_v56, 0.0  ;;  %v1960_v22 = vmax.f32 %v1944_v11, 0.0  ;;  %v2062_v23 = vsub.f32 %v4025_v24, %v4816_v46 }
 0x14a   :  { %v3716_v0 = vpack.c.bf16 %v2106_v12, %v2105_v60  ;;  %v2077_v18 = vand.u32 2147483647, %v2061_v32  ;;  %v1914_v25 = vsub.f32 %v4030_v28, %v4796_v52  ;;  %v1929_v31 = vand.u32 2147483647, %v1913_v59 }
 0x14b   :  { %v3719_v26 = vpack.c.bf16 %v2108_v21, %v2107_v54  ;;  %v3698_v51 = vpack.c.bf16 %v1960_v22, %v1959_v2  ;;  %v2078_v9 = vand.u32 2147483647, %v2062_v23  ;;  %v2063_v33 = vsub.f32 %v4028_v27, %v4816_v46 }
 0x14c   :  { %3717 = vmatpush3.bf16.msra.mxu1 %v3716_v0  ;;  %3696 = vmatpush3.bf16.msra.mxu0 %v3695_v35  ;;  %v2093_v29 = vsub.f32 1.0, %v2077_v18  ;;  %v1930_v58 = vand.u32 2147483647, %v1914_v25  ;;  %v1945_v62 = vsub.f32 1.0, %v1929_v31  ;;  %v2064_v17 = vsub.f32 %v4030_v28, %v4816_v46  ;;  %v4846_v15 = vpop.f32.mrb[0].mxu0 }
 0x14d   :  { %3718 = vmatprep.subr.bf16.mxu1 %v3903_v1  ;;  %3697 = vmatprep.subr.bf16.mxu0 %v3903_v1  ;;  %v2094_v59 = vsub.f32 1.0, %v2078_v9  ;;  %v2079_v57 = vand.u32 2147483647, %v2063_v33  ;;  %v1915_v8 = vsub.f32 %v4036_v34, %v4796_v52  ;;  %v1916_v30 = vsub.f32 %v4042_v41, %v4796_v52  ;;  %v2877_v16 = vpop.f32.mrb[1].mxu0 }
 0x14e   :  { %v2109_v36 = vmax.f32 %v2093_v29, 0.0  ;;  %v1946_v39 = vsub.f32 1.0, %v1930_v58  ;;  %v1961_v40 = vmax.f32 %v1945_v62, 0.0  ;;  %v2080_v61 = vand.u32 2147483647, %v2064_v17  ;;  %v4854_v55 = vpop.f32.mrb[0].mxu1 }
 0x14f   :  { %v2110_v44 = vmax.f32 %v2094_v59, 0.0  ;;  %v2095_v49 = vsub.f32 1.0, %v2079_v57  ;;  %v1931_v38 = vand.u32 2147483647, %v1915_v8  ;;  %v1932_v35 = vand.u32 2147483647, %v1916_v30 }
 0x150   :  { %3720 = vmatpush3.bf16.msra.mxu1 %v3719_v26  ;;  %3699 = vmatpush3.bf16.msra.mxu0 %v3698_v51  ;;  %v1962_v63 = vmax.f32 %v1946_v39, 0.0  ;;  %v2096_v56 = vsub.f32 1.0, %v2080_v61  ;;  %v2065_v11 = vsub.f32 %v4036_v34, %v4816_v46  ;;  %v2066_v60 = vsub.f32 %v4042_v41, %v4816_v46  ;;  %v2912_v12 = vpop.f32.mrb[1].mxu1 }
 0x151   :  { %3721 = vmatprep.subr.bf16.mxu1 %v3903_v1  ;;  %v3722_v2 = vpack.c.bf16 %v2110_v44, %v2109_v36  ;;  %3700 = vmatprep.subr.bf16.mxu0 %v3903_v1  ;;  %v2111_v32 = vmax.f32 %v2095_v49, 0.0  ;;  %v1947_v54 = vsub.f32 1.0, %v1931_v38  ;;  %v1948_v21 = vsub.f32 1.0, %v1932_v35 }
 0x152   :  { %v3701_v22 = vpack.c.bf16 %v1962_v63, %v1961_v40  ;;  %v2112_v23 = vmax.f32 %v2096_v56, 0.0  ;;  %v2081_v0 = vand.u32 2147483647, %v2065_v11  ;;  %v2082_v18 = vand.u32 2147483647, %v2066_v60 }
 0x153   :  { %v1963_v25 = vmax.f32 %v1947_v54, 0.0  ;;  %v1964_v31 = vmax.f32 %v1948_v21, 0.0  ;;  %v1917_v26 = vsub.f32 %v4044_v42, %v4796_v52  ;;  %v1918_v51 = vsub.f32 %v4046_v43, %v4796_v52 }
 0x154   :  { %3723 = vmatpush3.bf16.msra.mxu1 %v3722_v2  ;;  %3702 = vmatpush3.bf16.msra.mxu0 %v3701_v22  ;;  %v3725_v9 = vpack.c.bf16 %v2112_v23, %v2111_v32  ;;  %v2097_v33 = vsub.f32 1.0, %v2081_v0  ;;  %v2098_v29 = vsub.f32 1.0, %v2082_v18  ;;  %v2067_v58 = vsub.f32 %v4044_v42, %v4816_v46 }
 0x155   :  { %3724 = vmatprep.subr.bf16.mxu1 %v3903_v1  ;;  %3703 = vmatprep.subr.bf16.mxu0 %v3903_v1  ;;  %v3704_v62 = vpack.c.bf16 %v1964_v31, %v1963_v25  ;;  %v1933_v17 = vand.u32 2147483647, %v1917_v26  ;;  %v1934_v59 = vand.u32 2147483647, %v1918_v51  ;;  %v2068_v57 = vsub.f32 %v4046_v43, %v4816_v46 }
 0x156   :  { %v2113_v8 = vmax.f32 %v2097_v33, 0.0  ;;  %v2114_v30 = vmax.f32 %v2098_v29, 0.0  ;;  %v2083_v16 = vand.u32 2147483647, %v2067_v58  ;;  %v1919_v36 = vsub.f32 %v4051_v47, %v4796_v52 }
 0x157   :  { %v1949_v39 = vsub.f32 1.0, %v1933_v17  ;;  %v1950_v40 = vsub.f32 1.0, %v1934_v59  ;;  %v2084_v61 = vand.u32 2147483647, %v2068_v57  ;;  %v1920_v44 = vsub.f32 %v4053_v48, %v4796_v52 }
 0x158   :  { %3726 = vmatpush3.bf16.msra.mxu1 %v3725_v9  ;;  %3705 = vmatpush3.bf16.msra.mxu0 %v3704_v62  ;;  %v3728_v49 = vpack.c.bf16 %v2114_v30, %v2113_v8  ;;  %v2099_v38 = vsub.f32 1.0, %v2083_v16  ;;  %v1935_v35 = vand.u32 2147483647, %v1919_v36  ;;  %v2069_v63 = vsub.f32 %v4051_v47, %v4816_v46 }
 0x159   :  { %3727 = vmatprep.subr.bf16.mxu1 %v3903_v1  ;;  %3706 = vmatprep.subr.bf16.mxu0 %v3903_v1  ;;  %v1965_v56 = vmax.f32 %v1949_v39, 0.0  ;;  %v1966_v11 = vmax.f32 %v1950_v40, 0.0  ;;  %v2100_v60 = vsub.f32 1.0, %v2084_v61  ;;  %v1936_v12 = vand.u32 2147483647, %v1920_v44 }
 0x15a   :  { %v2115_v2 = vmax.f32 %v2099_v38, 0.0  ;;  %v1951_v32 = vsub.f32 1.0, %v1935_v35  ;;  %v2070_v54 = vsub.f32 %v4053_v48, %v4816_v46  ;;  %v2085_v21 = vand.u32 2147483647, %v2069_v63 }
 0x15b   :  { %v3707_v22 = vpack.c.bf16 %v1966_v11, %v1965_v56  ;;  %v2116_v23 = vmax.f32 %v2100_v60, 0.0  ;;  %v1952_v0 = vsub.f32 1.0, %v1936_v12  ;;  %v1921_v18 = vsub.f32 %v4058_v50, %v4796_v52 }
 0x15c   :  { %3729 = vmatpush3.bf16.msra.mxu1 %v3728_v49  ;;  %v1967_v25 = vmax.f32 %v1951_v32, 0.0  ;;  %v2086_v31 = vand.u32 2147483647, %v2070_v54  ;;  %v2101_v26 = vsub.f32 1.0, %v2085_v21  ;;  %v1922_v51 = vsub.f32 %v4142_v37, %v4796_v52 }
 0x15d   :  { %3730 = vmatprep.subr.bf16.mxu1 %v3903_v1  ;;  %3708 = vmatpush3.bf16.msra.mxu0 %v3707_v22  ;;  %v3731_v9 = vpack.c.bf16 %v2116_v23, %v2115_v2  ;;  %v1968_v33 = vmax.f32 %v1952_v0, 0.0  ;;  %v1937_v29 = vand.u32 2147483647, %v1921_v18  ;;  %v2071_v58 = vsub.f32 %v4058_v50, %v4816_v46 }
 0x15e   :  { %3709 = vmatprep.subr.bf16.mxu0 %v3903_v1  ;;  %v2102_v62 = vsub.f32 1.0, %v2086_v31  ;;  %v2117_v17 = vmax.f32 %v2101_v26, 0.0  ;;  %v1938_v59 = vand.u32 2147483647, %v1922_v51  ;;  %v2072_v52 = vsub.f32 %v4142_v37, %v4816_v46 }
 0x15f   :  { %v3710_v57 = vpack.c.bf16 %v1968_v33, %v1967_v25  ;;  %v1953_v8 = vsub.f32 1.0, %v1937_v29  ;;  %v2087_v30 = vand.u32 2147483647, %v2071_v58  ;;  %v2200_v16 = vmul.f32 %v2199_v53, %v3991_v5 }
 0x160   :  { %3732 = vmatpush3.bf16.msra.mxu1 %v3731_v9  ;;  %v2118_v36 = vmax.f32 %v2102_v62, 0.0  ;;  %v1954_v39 = vsub.f32 1.0, %v1938_v59  ;;  %v2088_v40 = vand.u32 2147483647, %v2072_v52  ;;  %v2205_v61 = vstv %s4880_s4 }
 0x161   :  { %3733 = vmatprep.subr.bf16.mxu1 %v3903_v1  ;;  %3711 = vmatpush3.bf16.msra.mxu0 %v3710_v57  ;;  %v1969_v44 = vmax.f32 %v1953_v8, 0.0  ;;  %v2103_v49 = vsub.f32 1.0, %v2087_v30  ;;  %v2202_v46 = vadd.f32 %v2201_v10, %v2200_v16  ;;  %v2349_v38 = vstv %s4876_s6 }
 0x162   :  { %v3734_v35 = vpack.c.bf16 %v2118_v36, %v2117_v17  ;;  %3712 = vmatprep.subr.bf16.mxu0 %v3903_v1  ;;  %v1970_v53 = vmax.f32 %v1954_v39, 0.0  ;;  %v2104_v63 = vsub.f32 1.0, %v2088_v40  ;;  %v2350_v56 = vmul.f32 %v2349_v38, %v3991_v5 }
 0x163   :  { %v2119_v11 = vmax.f32 %v2103_v49, 0.0  ;;  %v2204_v60 = vmax.f32 %v2203_v6, %v2202_v46  ;;  %v2351_v12 = vstv %s4888_s7  ;;  %v2353_v2 = vstv %s4890_s8 }
 0x164   :  { %3735 = vmatpush3.bf16.msra.mxu1 %v3734_v35  ;;  %v3713_v32 = vpack.c.bf16 %v1970_v53, %v1969_v44  ;;  %v2120_v54 = vmax.f32 %v2104_v63, 0.0  ;;  %v2352_v21 = vadd.f32 %v2351_v12, %v2350_v56  ;;  %v2355_v22 = vstv %s4897_s9 }
 0x165   :  { %3736 = vmatprep.subr.bf16.mxu1 %v3903_v1  ;;  %v4917_v10 = vmin.f32 %v2205_v61, %v2204_v60  ;;  %vm230_vm1 = vcmp.eq.s32.totalorder %v3979_v3, 0  ;;  %vm381_vm2 = vcmp.eq.s32.totalorder %v3979_v3, 1  ;;  %vm532_vm3 = vcmp.eq.s32.totalorder %v3979_v3, 2 }
 0x166   :  { %3714 = vmatpush3.bf16.msra.mxu0 %v3713_v32  ;;  %v3737_v23 = vpack.c.bf16 %v2120_v54, %v2119_v11  ;;  %v2354_v0 = vmax.f32 %v2353_v2, %v2352_v21  ;;  %v4924_v5 = vsel %vm230_vm1, %v4846_v15, 0.0  ;;  %vm683_vm4 = vcmp.eq.s32.totalorder %v3979_v3, 3 }
 0x167   :  { %3739 = vmatprep.subr.bf16.mxu0 %v3903_v1  ;;  %v2207_v6 = vsub.f32 %v3995_v7, %v4917_v10  ;;  %v2208_v18 = vsub.f32 %v4006_v13, %v4917_v10  ;;  %v2209_v25 = vsub.f32 %v4008_v14, %v4917_v10  ;;  %v2210_v31 = vsub.f32 %v4014_v19, %v4917_v10 }
 0x168   :  { %3738 = vmatpush3.bf16.msra.mxu1 %v3737_v23  ;;  %v4935_v26 = vmin.f32 %v2355_v22, %v2354_v0  ;;  %v2211_v15 = vsub.f32 %v4016_v20, %v4917_v10  ;;  %v2212_v51 = vsub.f32 %v4025_v24, %v4917_v10  ;;  %v2213_v9 = vsub.f32 %v4028_v27, %v4917_v10 }
 0x169   :  { %3296 = vmatmul.mubr.f32.vlgmr.msra.gmra.mrb[12].mxu0 %v4678_v45  ;;  %3763 = vmatprep.subr.bf16.mxu1 %v3903_v1  ;;  %v2223_v33 = vand.u32 2147483647, %v2207_v6  ;;  %v2224_v29 = vand.u32 2147483647, %v2208_v18  ;;  %v2225_v58 = vand.u32 2147483647, %v2209_v25  ;;  %v2214_v62 = vsub.f32 %v4030_v28, %v4917_v10 }
 0x16a   :  { %v2357_v17 = vsub.f32 %v3995_v7, %v4935_v26  ;;  %v2358_v59 = vsub.f32 %v4006_v13, %v4935_v26  ;;  %v2226_v52 = vand.u32 2147483647, %v2210_v31  ;;  %v2359_v57 = vsub.f32 %v4008_v14, %v4935_v26  ;;  %3365 = vmatprep.mubr.msk.f32.mxu0 %vm3904_vm0, %v3905_v4 }
 0x16b   :  { %3331 = vmatmul.mubr.f32.vlgmr.msra.gmra.mrb[12].mxu1 %v4678_v45  ;;  %v2239_v8 = vsub.f32 1.0, %v2223_v33  ;;  %v2240_v30 = vsub.f32 1.0, %v2224_v29  ;;  %v2241_v16 = vsub.f32 1.0, %v2225_v58  ;;  %v2360_v36 = vsub.f32 %v4014_v19, %v4935_v26 }
 0x16c   :  { %v2373_v39 = vand.u32 2147483647, %v2357_v17  ;;  %v2374_v7 = vand.u32 2147483647, %v2358_v59  ;;  %v2242_v40 = vsub.f32 1.0, %v2226_v52  ;;  %v2361_v13 = vsub.f32 %v4016_v20, %v4935_v26  ;;  %3400 = vmatprep.mubr.msk.f32.mxu1 %vm3904_vm0, %v3905_v4 }
 0x16d   :  { %v2255_v14 = vmax.f32 %v2239_v8, 0.0  ;;  %v2256_v61 = vmax.f32 %v2240_v30, 0.0  ;;  %v2257_v44 = vmax.f32 %v2241_v16, 0.0  ;;  %v2375_v49 = vand.u32 2147483647, %v2359_v57 }
 0x16e   :  { %v2389_v45 = vsub.f32 1.0, %v2373_v39  ;;  %v2390_v46 = vsub.f32 1.0, %v2374_v7  ;;  %v2258_v38 = vmax.f32 %v2242_v40, 0.0  ;;  %v2376_v35 = vand.u32 2147483647, %v2360_v36 }
 0x16f   :  { %v3740_v53 = vpack.c.bf16 %v2256_v61, %v2255_v14  ;;  %v2391_v63 = vsub.f32 1.0, %v2375_v49  ;;  %v2227_v19 = vand.u32 2147483647, %v2211_v15  ;;  %v2228_v56 = vand.u32 2147483647, %v2212_v51 }
 0x170   :  { %v2405_v11 = vmax.f32 %v2389_v45, 0.0  ;;  %v2406_v60 = vmax.f32 %v2390_v46, 0.0  ;;  %v3743_v12 = vpack.c.bf16 %v2258_v38, %v2257_v44  ;;  %v2392_v2 = vsub.f32 1.0, %v2376_v35 }
 0x171   :  { %3741 = vmatpush3.bf16.msra.mxu0 %v3740_v53  ;;  %v2407_v4 = vmax.f32 %v2391_v63, 0.0  ;;  %v2243_v20 = vsub.f32 1.0, %v2227_v19  ;;  %v2244_v32 = vsub.f32 1.0, %v2228_v56  ;;  %v2362_v54 = vsub.f32 %v4025_v24, %v4935_v26 }
 0x172   :  { %v3764_v21 = vpack.c.bf16 %v2406_v60, %v2405_v11  ;;  %3742 = vmatprep.subr.bf16.mxu0 %v3903_v1  ;;  %v2408_v22 = vmax.f32 %v2392_v2, 0.0  ;;  %v2377_v23 = vand.u32 2147483647, %v2361_v13  ;;  %v2229_v0 = vand.u32 2147483647, %v2213_v9 }
 0x173   :  { %v2259_v6 = vmax.f32 %v2243_v20, 0.0  ;;  %v2260_v18 = vmax.f32 %v2244_v32, 0.0  ;;  %v2378_v25 = vand.u32 2147483647, %v2362_v54  ;;  %v2230_v31 = vand.u32 2147483647, %v2214_v62 }
 0x174   :  { %3765 = vmatpush3.bf16.msra.mxu1 %v3764_v21  ;;  %v3767_v15 = vpack.c.bf16 %v2408_v22, %v2407_v4  ;;  %v2393_v51 = vsub.f32 1.0, %v2377_v23  ;;  %v2245_v33 = vsub.f32 1.0, %v2229_v0  ;;  %v2363_v29 = vsub.f32 %v4028_v27, %v4935_v26  ;;  %v4968_v58 = vpop.f32.mrb[2].mxu0 }
 0x175   :  { %3766 = vmatprep.subr.bf16.mxu1 %v3903_v1  ;;  %3744 = vmatpush3.bf16.msra.mxu0 %v3743_v12  ;;  %v3746_v24 = vpack.c.bf16 %v2260_v18, %v2259_v6  ;;  %v2394_v17 = vsub.f32 1.0, %v2378_v25  ;;  %v2246_v59 = vsub.f32 1.0, %v2230_v31  ;;  %v2364_v9 = vsub.f32 %v4030_v28, %v4935_v26  ;;  %v2947_v52 = vpop.f32.mrb[3].mxu0 }
 0x176   :  { %3745 = vmatprep.subr.bf16.mxu0 %v3903_v1  ;;  %v2409_v62 = vmax.f32 %v2393_v51, 0.0  ;;  %v2261_v57 = vmax.f32 %v2245_v33, 0.0  ;;  %v2379_v8 = vand.u32 2147483647, %v2363_v29  ;;  %v2215_v27 = vsub.f32 %v4036_v34, %v4917_v10 }
 0x177   :  { %v2410_v30 = vmax.f32 %v2394_v17, 0.0  ;;  %v2262_v16 = vmax.f32 %v2246_v59, 0.0  ;;  %v2380_v36 = vand.u32 2147483647, %v2364_v9  ;;  %v2216_v39 = vsub.f32 %v4042_v41, %v4917_v10  ;;  %v4978_v7 = vpop.f32.mrb[2].mxu1 }
 0x178   :  { %3768 = vmatpush3.bf16.msra.mxu1 %v3767_v15  ;;  %v2395_v40 = vsub.f32 1.0, %v2379_v8  ;;  %v2231_v28 = vand.u32 2147483647, %v2215_v27  ;;  %v2365_v13 = vsub.f32 %v4036_v34, %v4935_v26  ;;  %v2366_v14 = vsub.f32 %v4042_v41, %v4935_v26  ;;  %v2982_v61 = vpop.f32.mrb[3].mxu1 }
 0x179   :  { %3769 = vmatprep.subr.bf16.mxu1 %v3903_v1  ;;  %3747 = vmatpush3.bf16.msra.mxu0 %v3746_v24  ;;  %v3770_v44 = vpack.c.bf16 %v2410_v30, %v2409_v62  ;;  %v3749_v49 = vpack.c.bf16 %v2262_v16, %v2261_v57  ;;  %v2396_v45 = vsub.f32 1.0, %v2380_v36  ;;  %v2232_v46 = vand.u32 2147483647, %v2216_v39 }
 0x17a   :  { %3748 = vmatprep.subr.bf16.mxu0 %v3903_v1  ;;  %v2411_v38 = vmax.f32 %v2395_v40, 0.0  ;;  %v2247_v35 = vsub.f32 1.0, %v2231_v28  ;;  %v2381_v53 = vand.u32 2147483647, %v2365_v13  ;;  %v2382_v63 = vand.u32 2147483647, %v2366_v14 }
 0x17b   :  { %v2412_v19 = vmax.f32 %v2396_v45, 0.0  ;;  %v2248_v56 = vsub.f32 1.0, %v2232_v46  ;;  %v4990_v34 = vsel %vm381_vm2, %v4854_v55, %v4924_v5  ;;  %v2217_v41 = vsub.f32 %v4044_v42, %v4917_v10 }
 0x17c   :  { %3771 = vmatpush3.bf16.msra.mxu1 %v3770_v44  ;;  %v2263_v11 = vmax.f32 %v2247_v35, 0.0  ;;  %v2397_v60 = vsub.f32 1.0, %v2381_v53  ;;  %v2398_v12 = vsub.f32 1.0, %v2382_v63  ;;  %v2218_v2 = vsub.f32 %v4046_v43, %v4917_v10 }
 0x17d   :  { %3772 = vmatprep.subr.bf16.mxu1 %v3903_v1  ;;  %3750 = vmatpush3.bf16.msra.mxu0 %v3749_v49  ;;  %v3773_v4 = vpack.c.bf16 %v2412_v19, %v2411_v38  ;;  %v2264_v20 = vmax.f32 %v2248_v56, 0.0  ;;  %v2233_v32 = vand.u32 2147483647, %v2217_v41  ;;  %v2367_v55 = vsub.f32 %v4044_v42, %v4935_v26 }
 0x17e   :  { %3751 = vmatprep.subr.bf16.mxu0 %v3903_v1  ;;  %v2413_v5 = vmax.f32 %v2397_v60, 0.0  ;;  %v2414_v54 = vmax.f32 %v2398_v12, 0.0  ;;  %v2234_v21 = vand.u32 2147483647, %v2218_v2  ;;  %v2368_v22 = vsub.f32 %v4046_v43, %v4935_v26  ;;  %v3799_v2 = vld [vmem:[#allocation7 + $0x8] sm:$0xff] }
 0x17f   :  { %v3752_v23 = vpack.c.bf16 %v2264_v20, %v2263_v11  ;;  %v2249_v0 = vsub.f32 1.0, %v2233_v32  ;;  %v2383_v6 = vand.u32 2147483647, %v2367_v55  ;;  %v2219_v18 = vsub.f32 %v4051_v47, %v4917_v10 }
 0x180   :  { %3774 = vmatpush3.bf16.msra.mxu1 %v3773_v4  ;;  %v3776_v42 = vpack.c.bf16 %v2414_v54, %v2413_v5  ;;  %v2250_v25 = vsub.f32 1.0, %v2234_v21  ;;  %v2384_v31 = vand.u32 2147483647, %v2368_v22  ;;  %v2220_v15 = vsub.f32 %v4053_v48, %v4917_v10 }
 0x181   :  { %3775 = vmatprep.subr.bf16.mxu1 %v3903_v1  ;;  %3753 = vmatpush3.bf16.msra.mxu0 %v3752_v23  ;;  %v2265_v51 = vmax.f32 %v2249_v0, 0.0  ;;  %v2399_v43 = vsub.f32 1.0, %v2383_v6  ;;  %v2235_v33 = vand.u32 2147483647, %v2219_v18  ;;  %v2369_v29 = vsub.f32 %v4051_v47, %v4935_v26 }
 0x182   :  { %3754 = vmatprep.subr.bf16.mxu0 %v3903_v1  ;;  %v2266_v24 = vmax.f32 %v2250_v25, 0.0  ;;  %v2400_v17 = vsub.f32 1.0, %v2384_v31  ;;  %v2236_v59 = vand.u32 2147483647, %v2220_v15  ;;  %v2370_v9 = vsub.f32 %v4053_v48, %v4935_v26 }
 0x183   :  { %v2415_v52 = vmax.f32 %v2399_v43, 0.0  ;;  %v2251_v62 = vsub.f32 1.0, %v2235_v33  ;;  %v2385_v57 = vand.u32 2147483647, %v2369_v29  ;;  %v2221_v8 = vsub.f32 %v4058_v50, %v4917_v10 }
 0x184   :  { %3777 = vmatpush3.bf16.msra.mxu1 %v3776_v42  ;;  %v3755_v27 = vpack.c.bf16 %v2266_v24, %v2265_v51  ;;  %v2416_v30 = vmax.f32 %v2400_v17, 0.0  ;;  %v2252_v16 = vsub.f32 1.0, %v2236_v59  ;;  %v2386_v36 = vand.u32 2147483647, %v2370_v9 }
 0x185   :  { %3778 = vmatprep.subr.bf16.mxu1 %v3903_v1  ;;  %v2267_v47 = vmax.f32 %v2251_v62, 0.0  ;;  %v2401_v39 = vsub.f32 1.0, %v2385_v57  ;;  %v2222_v40 = vsub.f32 %v4142_v37, %v4917_v10  ;;  %v2237_v28 = vand.u32 2147483647, %v2221_v8 }
 0x186   :  { %3756 = vmatpush3.bf16.msra.mxu0 %v3755_v27  ;;  %v3779_v48 = vpack.c.bf16 %v2416_v30, %v2415_v52  ;;  %v2268_v13 = vmax.f32 %v2252_v16, 0.0  ;;  %v2402_v14 = vsub.f32 1.0, %v2386_v36  ;;  %v2371_v61 = vsub.f32 %v4058_v50, %v4935_v26 }
 0x187   :  { %3757 = vmatprep.subr.bf16.mxu0 %v3903_v1  ;;  %v2417_v44 = vmax.f32 %v2401_v39, 0.0  ;;  %v2238_v49 = vand.u32 2147483647, %v2222_v40  ;;  %v2253_v45 = vsub.f32 1.0, %v2237_v28  ;;  %v2372_v46 = vsub.f32 %v4142_v37, %v4935_v26 }
 0x188   :  { %3780 = vmatpush3.bf16.msra.mxu1 %v3779_v48  ;;  %v3758_v38 = vpack.c.bf16 %v2268_v13, %v2267_v47  ;;  %v2418_v35 = vmax.f32 %v2402_v14, 0.0  ;;  %v2387_v10 = vand.u32 2147483647, %v2371_v61  ;;  %v533_v53 = vsel %vm532_vm3, %v4968_v58, %v4990_v34 }
 0x189   :  { %3781 = vmatprep.subr.bf16.mxu1 %v3903_v1  ;;  %v2254_v50 = vsub.f32 1.0, %v2238_v49  ;;  %v2269_v63 = vmax.f32 %v2253_v45, 0.0  ;;  %v2388_v19 = vand.u32 2147483647, %v2372_v46  ;;  %v684_v56 = vsel %vm683_vm4, %v4978_v7, %v533_v53 }
 0x18a   :  { %3759 = vmatpush3.bf16.msra.mxu0 %v3758_v38  ;;  %v3782_v37 = vpack.c.bf16 %v2418_v35, %v2417_v44  ;;  %v2403_v26 = vsub.f32 1.0, %v2387_v10  ;;  %vm834_vm5 = vcmp.eq.s32.totalorder %v3979_v3, 4  ;;  %vm985_vm6 = vcmp.eq.s32.totalorder %v3979_v3, 5 }
 0x18b   :  { %3760 = vmatprep.subr.bf16.mxu0 %v3903_v1  ;;  %v2270_v41 = vmax.f32 %v2254_v50, 0.0  ;;  %v2404_v11 = vsub.f32 1.0, %v2388_v19  ;;  %vm1136_vm7 = vcmp.eq.s32.totalorder %v3979_v3, 6  ;;  %vm1287_vm8 = vcmp.eq.s32.totalorder %v3979_v3, 7 }
 0x18c   :  { %3783 = vmatpush3.bf16.msra.mxu1 %v3782_v37  ;;  %v2419_v60 = vmax.f32 %v2403_v26, 0.0 }
 0x18d   :  { %3784 = vmatprep.subr.bf16.mxu1 %v3903_v1  ;;  %v3761_v58 = vpack.c.bf16 %v2270_v41, %v2269_v63  ;;  %v2420_v34 = vmax.f32 %v2404_v11, 0.0 }
 0x18f   :  { %3762 = vmatpush3.bf16.msra.mxu0 %v3761_v58  ;;  %v3785_v12 = vpack.c.bf16 %v2420_v34, %v2419_v60 }
 0x191   :  { %3786 = vmatpush3.bf16.msra.mxu1 %v3785_v12 }
 0x192   :  { %3366 = vmatmul.mubr.f32.vlgmr.msra.gmra.mrb[14].mxu0 %v3799_v2 }
 0x194   :  { %3401 = vmatmul.mubr.f32.vlgmr.msra.gmra.mrb[14].mxu1 %v3799_v2 }
 0x19c   :  { %v830_v7 = vpop.f32.mrb[4].mxu0 }
 0x19d   :  { %v835_v4 = vsel %vm834_vm5, %v830_v7, %v684_v56  ;;  %v3017_v20 = vpop.f32.mrb[5].mxu0 }
 0x19e   :  { %v981_v32 = vpop.f32.mrb[4].mxu1 }
 0x19f   :  { %v986_v1 = vsel %vm985_vm6, %v981_v32, %v835_v4  ;;  %v3052_v55 = vpop.f32.mrb[5].mxu1 }
 0x1c4   :  { %v1132_v5 = vpop.f32.mrb[6].mxu0 }
 0x1c5   :  { %v1137_v54 = vsel %vm1136_vm7, %v1132_v5, %v986_v1  ;;  %v3087_v21 = vpop.f32.mrb[7].mxu0 }
 0x1c7   :  { %v1283_v22 = vpop.f32.mrb[6].mxu1 }
 0x1c8   :  { %v1288_v23 = vsel %vm1287_vm8, %v1283_v22, %v1137_v54  ;;  %v3122_v0 = vpop.f32.mrb[7].mxu1 }
 0x1c9   :  { %1289 = vst [vmem:[#allocation10] sm:$0xff] %v1288_v23 }
 0x1ec   :  { %v1437_v6 = vpop.f32.mrb[8].mxu0 }
 0x1ed   :  { %v1441_v18 = vsel %vm230_vm1, %v1437_v6, 0.0  ;;  %v3157_v42 = vpop.f32.mrb[9].mxu0 }
 0x1ee   :  { %v1587_v25 = vpop.f32.mrb[8].mxu1 }
 0x1ef   :  { %v1591_v31 = vsel %vm381_vm2, %v1587_v25, %v1441_v18  ;;  %v3192_v15 = vpop.f32.mrb[9].mxu1 }
 0x214   :  { %v1737_v51 = vpop.f32.mrb[10].mxu0 }
 0x215   :  { %v1741_v43 = vsel %vm532_vm3, %v1737_v51, %v1591_v31  ;;  %v3227_v33 = vpop.f32.mrb[11].mxu0 }
 0x217   :  { %v1887_v29 = vpop.f32.mrb[10].mxu1 }
 0x218   :  { %v1891_v24 = vsel %vm683_vm4, %v1887_v29, %v1741_v43  ;;  %v3262_v17 = vpop.f32.mrb[11].mxu1 }
 0x23c   :  { %v2037_v59 = vpop.f32.mrb[12].mxu0 }
 0x23d   :  { %v2041_v9 = vsel %vm834_vm5, %v2037_v59, %v1891_v24  ;;  %v3297_v52 = vpop.f32.mrb[13].mxu0 }
 0x23e   :  { %v2187_v62 = vpop.f32.mrb[12].mxu1 }
 0x23f   :  { %v2191_v57 = vsel %vm985_vm6, %v2187_v62, %v2041_v9  ;;  %v3332_v8 = vpop.f32.mrb[13].mxu1 }
 0x265   :  { %v2337_v27 = vpop.f32.mrb[14].mxu0 }
 0x266   :  { %v2341_v30 = vsel %vm1136_vm7, %v2337_v27, %v2191_v57  ;;  %v3367_v16 = vpop.f32.mrb[15].mxu0 }
 0x267   :  { %v2487_v36 = vpop.f32.mrb[14].mxu1 }
 0x268   :  { %v2491_v47 = vsel %vm1287_vm8, %v2487_v36, %v2341_v30  ;;  %v3402_v39 = vpop.f32.mrb[15].mxu1 }
 0x269   :  { %2493 = vst [vmem:[#allocation10 + $0x8] sm:$0xff] %v2491_v47 }
 0x26a   :  { %3879 = shalt.err (!%p3876_p2)
}
 0x26b   :  { %s3880_s2 = scalar_lea.hbm %s5079_s5, 256 }
 0x26c   :  { %p3881_p3 = scmp.ne.s32.totalorder %s5079_s5, %s3880_s2  ;;  %p3884_p4 = scmp.lt.u32.totalorder %s3880_s2, %s5079_s5 }
 0x26e   :  { %p3886_p5 = pnand %p3884_p4, %p3881_p3 }
 0x270   :  { %3889 = shalt.err (!%p3886_p5)
}
 0x271   :  { %2505 = dma.vmem_to_hbm [thread:$0]  %s2500_s0, 256, %s5079_s5, [#allocation9], %s3901_s24, %s3901_s24, %s3902_s25  }
 0x272   :  { %3894 = dma.done.wait [#allocation9], 256  }
 0x273   :  { %3895 = vsyncadd [#allocation9], 4294967040 }
 0x274   :  { %2509 = vsyncpa [#allocation8], 1 }
 0x275   :  { %2510 = vsyncpa [#allocation9], 1 }

</bundles_post_ra>
